<compile_context>
chip_gen: v7x
topology: tpu7x:2x2x1
jax: 0.10.0
libtpu: 0.0.40
codegen_flags: <defaults>
</compile_context>

<pallas_src>
import functools

import jax
import jax.numpy as jnp
from jax import lax
from jax.experimental import pallas as pl
from jax.experimental.pallas import tpu as pltpu


def _softplus(v):
    # torch.nn.Softplus(beta=1, threshold=20): v if v > 20 else log1p(exp(v)).
    # The unselected branch evaluates exp(v) for v > 20 too; for v > ~88 it
    # yields +inf which the `where` discards -- benign, do not "fix" with clamps.
    return jnp.where(v > 20.0, v, jnp.log1p(jnp.exp(v)))


def _icnn_kernel(xT_ref, wz_ref, wout_ref, o_ref, zaug_ref, *,
                 dim, dimh, daug, n_hidden):
    """One lane-tile of the ICNN forward (all-MXU formulation).

    xT_ref   : (dim, tile_n)       transposed input tile
    wz_ref   : (L, dimh, daug)     augmented layer slabs, daug = dimh + ntail:
                 slab 0      : [   0   |  W0z     |  b0z     | 0 ]
                 slab 1..L-1 : [ Wz_l  | Wx_{l-1} | bx_{l-1} | 0 ]
    wout_ref : (8, daug)           row 0 = [ WzL | WxL | 0 ], rows 1..7 zero
    o_ref    : (1, 1, tile_n)      lane-dense output row
    zaug_ref : (daug, tile_n)      VMEM scratch holding [ z ; x^T ; 1 ; 0 ]
    """
    f32 = jnp.float32
    hi = lax.Precision.HIGHEST          # true-f32 MXU accuracy (multi-pass)
    tile_n = xT_ref.shape[-1]
    ntail = daug - dimh

    # Tail rows [x^T ; 1 ; 0] written once per tile, reused by every layer.
    xT = xT_ref[...].astype(f32)                                   # (dim, tile_n)
    tail = jnp.concatenate(
        [xT,
         jnp.ones((1, tile_n), f32),
         jnp.zeros((ntail - dim - 1, tile_n), f32)], axis=0)       # (ntail, tile_n)
    zaug_ref[dimh:daug, :] = tail

    # Layer 0: z = softplus(W0z @ x + b0z).  Only the tail columns of slab 0
    # are populated, so contract against the tail alone (tiny K, still MXU).
    w0 = wz_ref[0][:, dimh:daug].astype(f32)                       # (dimh, ntail)
    z = _softplus(jnp.dot(w0, tail, preferred_element_type=f32, precision=hi))
    zaug_ref[0:dimh, :] = z

    # Hidden layers: z = softplus(Wz_l @ z + Wx_{l-1} @ x + bx_{l-1}).
    # The x-side weights + bias ride along in the augmented K dimension, so each
    # layer is one lane-dense (dimh, daug)@(daug, tile_n) matmul -- no VPU
    # broadcast chains, no separate bias add.
    for l in range(1, n_hidden):
        w = wz_ref[l].astype(f32)                                  # (dimh, daug)
        z = _softplus(jnp.dot(w, zaug_ref[...],
                              preferred_element_type=f32, precision=hi))
        zaug_ref[0:dimh, :] = z

    # Output layer: [WzL | WxL | 0] @ z_aug; take the lane-dense first row.
    out = jnp.dot(wout_ref[...].astype(f32), zaug_ref[...],
                  preferred_element_type=f32, precision=hi)        # (8, tile_n)
    o_ref[0] = out[0:1, :].astype(o_ref.dtype)


def _round_up(x, m):
    return ((x + m - 1) // m) * m


def _cores_per_chip():
    # v7x has 2 TensorCores per chip (megacore); v5e / v6e have 1.
    try:
        kind = jax.devices()[0].device_kind.lower()
        if "v7" in kind or "7x" in kind:
            return 2
    except Exception:
        pass
    return 1


def _choose_tiling(n_rows, target=2048, lane_floor=256):
    """Lane-tile (multiple of 256, never below 256) and padded row count.

    The ~0.35us per-grid-step overhead dominates this kernel, so tiles are as
    big as possible (VMEM is not a constraint on any generation).  Single-TC
    chips never split just to add steps; on v7x we prefer >= 2 parallel steps
    so both TensorCores are used, padding rather than going below 256 lanes.
    """
    n_min = _round_up(max(n_rows, 1), lane_floor)
    tile = min(_round_up(target, lane_floor), n_min)
    nsteps = -(-n_min // tile)
    if _cores_per_chip() >= 2 and nsteps < 2 and n_min >= 2 * lane_floor:
        nsteps = 2
    # Re-balance the tile so padding is minimal at the chosen step count.
    tile = max(lane_floor, _round_up(-(-n_min // nsteps), lane_floor))
    n_pad = nsteps * tile
    return tile, n_pad


@functools.partial(jax.jit,
                   static_argnames=("num_hidden_layers", "tile_n", "n_pad"))
def _icnn_forward_impl(x, wz_aug, wout, *, num_hidden_layers, tile_n, n_pad):
    n, dim = x.shape
    L, dimh, daug = wz_aug.shape
    assert L == num_hidden_layers
    num_tiles = n_pad // tile_n

    x_pad = jnp.pad(x.astype(jnp.float32), ((0, n_pad - n), (0, 0)))
    xT = x_pad.T                                                   # (dim, n_pad)

    kernel = functools.partial(_icnn_kernel, dim=dim, dimh=dimh, daug=daug,
                               n_hidden=num_hidden_layers)

    flops = 2 * n_pad * (dimh * (daug - dimh)
                         + (num_hidden_layers - 1) * dimh * daug
                         + 8 * daug)
    transcendentals = 2 * num_hidden_layers * dimh * n_pad
    bytes_accessed = 4 * (dim * n_pad + wz_aug.size + wout.size + n_pad)

    out = pl.pallas_call(
        kernel,
        out_shape=jax.ShapeDtypeStruct((num_tiles, 1, tile_n), jnp.float32),
        grid_spec=pltpu.PrefetchScalarGridSpec(
            num_scalar_prefetch=0,
            grid=(num_tiles,),
            in_specs=[
                pl.BlockSpec((dim, tile_n), lambda i: (0, i)),          # x^T tile
                pl.BlockSpec((L, dimh, daug), lambda i: (0, 0, 0)),     # layer slabs
                pl.BlockSpec((8, daug), lambda i: (0, 0)),              # output slab
            ],
            out_specs=pl.BlockSpec((1, 1, tile_n), lambda i: (i, 0, 0)),
            scratch_shapes=[pltpu.VMEM((daug, tile_n), jnp.float32)],   # z_aug
        ),
        compiler_params=pltpu.CompilerParams(
            dimension_semantics=("parallel",)),
        cost_estimate=pl.CostEstimate(flops=flops,
                                      transcendentals=transcendentals,
                                      bytes_accessed=bytes_accessed),
    )(xT, wz_aug, wout)

    return out.reshape(-1)[:n][:, None].astype(x.dtype)


def icnn_forward(x, wz_aug, wout, *, num_hidden_layers=4, tile_target=2048):
    """x: (N, dim). wz_aug: (L, dimh, dimh+8). wout: (8, dimh+8)."""
    tile_n, n_pad = _choose_tiling(x.shape[0], tile_target)
    return _icnn_forward_impl(x, wz_aug, wout,
                              num_hidden_layers=num_hidden_layers,
                              tile_n=tile_n, n_pad=n_pad)


# ----------------------------------------------------------------------------
# Parameter construction (PyTorch nn.Linear layout) and packing into the
# kernel's two weight operands.
# ----------------------------------------------------------------------------
def init_params(key, dim=2, dimh=64, num_hidden_layers=4):
    """PyTorch-layout weights: W is (out_features, in_features), b is (out,)."""
    def uinit(k, shape, fan_in):
        bound = 1.0 / jnp.sqrt(jnp.float32(fan_in))
        return jax.random.uniform(k, shape, jnp.float32, -bound, bound)

    ks = jax.random.split(key, 4 * num_hidden_layers + 4)
    p, i = {}, 0
    # Wzs[0]: Linear(dim, dimh) with bias
    p["W0z"] = uinit(ks[i], (dimh, dim), dim); i += 1
    p["b0z"] = uinit(ks[i], (dimh,), dim); i += 1
    # Wzs[1..L-1]: Linear(dimh, dimh, bias=False)
    for l in range(1, num_hidden_layers):
        p[f"Wz{l}"] = uinit(ks[i], (dimh, dimh), dimh); i += 1
    # Wzs[L]: Linear(dimh, 1, bias=False)
    p["WzL"] = uinit(ks[i], (1, dimh), dimh); i += 1
    # Wxs[0..L-2]: Linear(dim, dimh) with bias
    for l in range(num_hidden_layers - 1):
        p[f"Wx{l}"] = uinit(ks[i], (dimh, dim), dim); i += 1
        p[f"bx{l}"] = uinit(ks[i], (dimh,), dim); i += 1
    # Wxs[L-1]: Linear(dim, 1, bias=False)
    p["WxL"] = uinit(ks[i], (1, dim), dim); i += 1
    return p


def pack_params(p, dim=2, dimh=64, num_hidden_layers=4):
    """Pack into the kernel's augmented-MXU operands (see _icnn_kernel)."""
    ntail = max(8, _round_up(dim + 1, 8))
    daug = dimh + ntail

    slabs = []
    s0 = jnp.zeros((dimh, daug), jnp.float32)
    s0 = s0.at[:, dimh:dimh + dim].set(p["W0z"])
    s0 = s0.at[:, dimh + dim].set(p["b0z"])
    slabs.append(s0)
    for l in range(1, num_hidden_layers):
        s = jnp.zeros((dimh, daug), jnp.float32)
        s = s.at[:, :dimh].set(p[f"Wz{l}"])
        s = s.at[:, dimh:dimh + dim].set(p[f"Wx{l - 1}"])
        s = s.at[:, dimh + dim].set(p[f"bx{l - 1}"])
        slabs.append(s)
    wz_aug = jnp.stack(slabs)                              # (L, dimh, daug)

    wout = jnp.zeros((8, daug), jnp.float32)               # M padded to 8
    wout = wout.at[0, :dimh].set(p["WzL"][0])
    wout = wout.at[0, dimh:dimh + dim].set(p["WxL"][0])
    return wz_aug, wout


def icnn_reference(x, p, num_hidden_layers=4):
    """Pure-JAX mirror of the PyTorch forward (matmuls pinned to f32)."""
    hi = lax.Precision.HIGHEST
    sp = lambda v: jnp.where(v > 20.0, v, jnp.log1p(jnp.exp(v)))
    z = sp(jnp.dot(x, p["W0z"].T, precision=hi) + p["b0z"])
    for l in range(num_hidden_layers - 1):
        z = sp(jnp.dot(z, p[f"Wz{l + 1}"].T, precision=hi)
               + jnp.dot(x, p[f"Wx{l}"].T, precision=hi) + p[f"bx{l}"])
    return (jnp.dot(z, p["WzL"].T, precision=hi)
            + jnp.dot(x, p["WxL"].T, precision=hi))


if __name__ == "__main__":
    key = jax.random.PRNGKey(0)
    k_param, k_x1, k_x2 = jax.random.split(key, 3)

    dim, dimh, L = 2, 64, 4
    params = init_params(k_param, dim=dim, dimh=dimh, num_hidden_layers=L)
    wz_aug, wout = pack_params(params, dim=dim, dimh=dimh, num_hidden_layers=L)

    ok = True
    for k_x, N in ((k_x1, 16), (k_x2, 300)):   # single-tile and padded/multi-step
        x = jax.random.normal(k_x, (N, dim), jnp.float32)
        out = jax.block_until_ready(
            icnn_forward(x, wz_aug, wout, num_hidden_layers=L))
        ref = icnn_reference(x, params, num_hidden_layers=L)
        if out.shape != (N, 1):
            ok = False
            print(f"BAD_SHAPE N={N} shape={out.shape}")
            continue
        err = float(jnp.max(jnp.abs(out - ref)))
        if not bool(jnp.allclose(out, ref, atol=1e-4, rtol=1e-4)):
            ok = False
            print(f"MISMATCH N={N} max_err={err}")

    if ok:
        print("KERNEL_OK")
</pallas_src>

<mosaic_0001>
module attributes {stable_mosaic.version = 11 : i64} {
  func.func @_icnn_kernel(%arg0: i32, %arg1: memref<2x256xf32, #tpu.memory_space<vmem>>, %arg2: memref<4x64x72xf32, #tpu.memory_space<vmem>>, %arg3: memref<8x72xf32, #tpu.memory_space<vmem>>, %arg4: memref<1x1x256xf32, #tpu.memory_space<vmem>>, %arg5: memref<72x256xf32, #tpu.memory_space<vmem>>) attributes {dimension_semantics = [#tpu.dimension_semantics<parallel>], iteration_bounds = array<i64: 1>, scalar_prefetch = 0 : i64, scratch_operands = 1 : i64, tpu.core_type = #tpu.core_type<tc>, window_params = [{transform_indices = @transform_0, window_bounds = array<i64: 2, 256>}, {pipeline_mode = #tpu.pipeline_mode<synchronous>, transform_indices = @transform_1, window_bounds = array<i64: 4, 64, 72>}, {pipeline_mode = #tpu.pipeline_mode<synchronous>, transform_indices = @transform_2, window_bounds = array<i64: 8, 72>}, {transform_indices = @transform_3, window_bounds = array<i64: 1, 1, 256>}]} {
    %c0 = arith.constant 0 : index
    %c0_0 = arith.constant 0 : index
    %0 = vector.load %arg1[%c0, %c0_0] : memref<2x256xf32, #tpu.memory_space<vmem>>, vector<2x256xf32>
    %cst = arith.constant 1.000000e+00 : f32
    %1 = vector.broadcast %cst : f32 to vector<1x256xf32>
    %cst_1 = arith.constant 0.000000e+00 : f32
    %2 = vector.broadcast %cst_1 : f32 to vector<5x256xf32>
    %3 = tpu.concatenate %0, %1, %2 in 0 : vector<2x256xf32>, vector<1x256xf32>, vector<5x256xf32> -> vector<8x256xf32>
    %c64 = arith.constant 64 : index
    %c0_2 = arith.constant 0 : index
    %4 = vector.load %arg5[%c64, %c0_2] : memref<72x256xf32, #tpu.memory_space<vmem>>, vector<8x256xf32>
    tpu.vector_store %arg5[%c64, %c0_2], %3 {strides = array<i32>} : memref<72x256xf32, #tpu.memory_space<vmem>>, vector<8x256xf32>,
    %c0_3 = arith.constant 0 : index
    %c0_4 = arith.constant 0 : index
    %c0_5 = arith.constant 0 : index
    %5 = vector.load %arg2[%c0_3, %c0_4, %c0_5] : memref<4x64x72xf32, #tpu.memory_space<vmem>>, vector<1x64x72xf32>
    %6 = vector.shape_cast %5 : vector<1x64x72xf32> to vector<64x72xf32>
    %7 = vector.extract_strided_slice %6 {offsets = [0, 64], sizes = [64, 8], strides = [1, 1]} : vector<64x72xf32> to vector<64x8xf32>
    %cst_6 = arith.constant dense<0.000000e+00> : vector<64x256xf32>
    %8 = tpu.matmul %7, %3, %cst_6 {dimension_numbers = #tpu.dot_dimension_numbers<[1], [0], [0], [1], [0, 0, 1, 1], [], []>, precision = #tpu.contract_precision<fp32>} : vector<64x8xf32>, vector<8x256xf32>, vector<64x256xf32> -> vector<64x256xf32>
    %cst_7 = arith.constant 2.000000e+01 : f32
    %9 = vector.broadcast %cst_7 : f32 to vector<64x256xf32>
    %10 = arith.cmpf ogt, %8, %9 : vector<64x256xf32>
    %11 = math.exp %8 : vector<64x256xf32>
    %12 = math.log1p %11 : vector<64x256xf32>
    %13 = arith.select %10, %8, %12 : vector<64x256xi1>, vector<64x256xf32>
    %c0_8 = arith.constant 0 : index
    %c0_9 = arith.constant 0 : index
    %14 = vector.load %arg5[%c0_8, %c0_9] : memref<72x256xf32, #tpu.memory_space<vmem>>, vector<64x256xf32>
    tpu.vector_store %arg5[%c0_8, %c0_9], %13 {strides = array<i32>} : memref<72x256xf32, #tpu.memory_space<vmem>>, vector<64x256xf32>,
    %c1 = arith.constant 1 : index
    %c0_10 = arith.constant 0 : index
    %c0_11 = arith.constant 0 : index
    %15 = vector.load %arg2[%c1, %c0_10, %c0_11] : memref<4x64x72xf32, #tpu.memory_space<vmem>>, vector<1x64x72xf32>
    %16 = vector.shape_cast %15 : vector<1x64x72xf32> to vector<64x72xf32>
    %c0_12 = arith.constant 0 : index
    %c0_13 = arith.constant 0 : index
    %17 = vector.load %arg5[%c0_12, %c0_13] : memref<72x256xf32, #tpu.memory_space<vmem>>, vector<72x256xf32>
    %cst_14 = arith.constant dense<0.000000e+00> : vector<64x256xf32>
    %18 = tpu.matmul %16, %17, %cst_14 {dimension_numbers = #tpu.dot_dimension_numbers<[1], [0], [0], [1], [0, 0, 1, 1], [], []>, precision = #tpu.contract_precision<fp32>} : vector<64x72xf32>, vector<72x256xf32>, vector<64x256xf32> -> vector<64x256xf32>
    %cst_15 = arith.constant 2.000000e+01 : f32
    %19 = vector.broadcast %cst_15 : f32 to vector<64x256xf32>
    %20 = arith.cmpf ogt, %18, %19 : vector<64x256xf32>
    %21 = math.exp %18 : vector<64x256xf32>
    %22 = math.log1p %21 : vector<64x256xf32>
    %23 = arith.select %20, %18, %22 : vector<64x256xi1>, vector<64x256xf32>
    %c0_16 = arith.constant 0 : index
    %c0_17 = arith.constant 0 : index
    %24 = vector.load %arg5[%c0_16, %c0_17] : memref<72x256xf32, #tpu.memory_space<vmem>>, vector<64x256xf32>
    tpu.vector_store %arg5[%c0_16, %c0_17], %23 {strides = array<i32>} : memref<72x256xf32, #tpu.memory_space<vmem>>, vector<64x256xf32>,
    %c2 = arith.constant 2 : index
    %c0_18 = arith.constant 0 : index
    %c0_19 = arith.constant 0 : index
    %25 = vector.load %arg2[%c2, %c0_18, %c0_19] : memref<4x64x72xf32, #tpu.memory_space<vmem>>, vector<1x64x72xf32>
    %26 = vector.shape_cast %25 : vector<1x64x72xf32> to vector<64x72xf32>
    %c0_20 = arith.constant 0 : index
    %c0_21 = arith.constant 0 : index
    %27 = vector.load %arg5[%c0_20, %c0_21] : memref<72x256xf32, #tpu.memory_space<vmem>>, vector<72x256xf32>
    %cst_22 = arith.constant dense<0.000000e+00> : vector<64x256xf32>
    %28 = tpu.matmul %26, %27, %cst_22 {dimension_numbers = #tpu.dot_dimension_numbers<[1], [0], [0], [1], [0, 0, 1, 1], [], []>, precision = #tpu.contract_precision<fp32>} : vector<64x72xf32>, vector<72x256xf32>, vector<64x256xf32> -> vector<64x256xf32>
    %cst_23 = arith.constant 2.000000e+01 : f32
    %29 = vector.broadcast %cst_23 : f32 to vector<64x256xf32>
    %30 = arith.cmpf ogt, %28, %29 : vector<64x256xf32>
    %31 = math.exp %28 : vector<64x256xf32>
    %32 = math.log1p %31 : vector<64x256xf32>
    %33 = arith.select %30, %28, %32 : vector<64x256xi1>, vector<64x256xf32>
    %c0_24 = arith.constant 0 : index
    %c0_25 = arith.constant 0 : index
    %34 = vector.load %arg5[%c0_24, %c0_25] : memref<72x256xf32, #tpu.memory_space<vmem>>, vector<64x256xf32>
    tpu.vector_store %arg5[%c0_24, %c0_25], %33 {strides = array<i32>} : memref<72x256xf32, #tpu.memory_space<vmem>>, vector<64x256xf32>,
    %c3 = arith.constant 3 : index
    %c0_26 = arith.constant 0 : index
    %c0_27 = arith.constant 0 : index
    %35 = vector.load %arg2[%c3, %c0_26, %c0_27] : memref<4x64x72xf32, #tpu.memory_space<vmem>>, vector<1x64x72xf32>
    %36 = vector.shape_cast %35 : vector<1x64x72xf32> to vector<64x72xf32>
    %c0_28 = arith.constant 0 : index
    %c0_29 = arith.constant 0 : index
    %37 = vector.load %arg5[%c0_28, %c0_29] : memref<72x256xf32, #tpu.memory_space<vmem>>, vector<72x256xf32>
    %cst_30 = arith.constant dense<0.000000e+00> : vector<64x256xf32>
    %38 = tpu.matmul %36, %37, %cst_30 {dimension_numbers = #tpu.dot_dimension_numbers<[1], [0], [0], [1], [0, 0, 1, 1], [], []>, precision = #tpu.contract_precision<fp32>} : vector<64x72xf32>, vector<72x256xf32>, vector<64x256xf32> -> vector<64x256xf32>
    %cst_31 = arith.constant 2.000000e+01 : f32
    %39 = vector.broadcast %cst_31 : f32 to vector<64x256xf32>
    %40 = arith.cmpf ogt, %38, %39 : vector<64x256xf32>
    %41 = math.exp %38 : vector<64x256xf32>
    %42 = math.log1p %41 : vector<64x256xf32>
    %43 = arith.select %40, %38, %42 : vector<64x256xi1>, vector<64x256xf32>
    %c0_32 = arith.constant 0 : index
    %c0_33 = arith.constant 0 : index
    %44 = vector.load %arg5[%c0_32, %c0_33] : memref<72x256xf32, #tpu.memory_space<vmem>>, vector<64x256xf32>
    tpu.vector_store %arg5[%c0_32, %c0_33], %43 {strides = array<i32>} : memref<72x256xf32, #tpu.memory_space<vmem>>, vector<64x256xf32>,
    %c0_34 = arith.constant 0 : index
    %c0_35 = arith.constant 0 : index
    %45 = vector.load %arg3[%c0_34, %c0_35] : memref<8x72xf32, #tpu.memory_space<vmem>>, vector<8x72xf32>
    %c0_36 = arith.constant 0 : index
    %c0_37 = arith.constant 0 : index
    %46 = vector.load %arg5[%c0_36, %c0_37] : memref<72x256xf32, #tpu.memory_space<vmem>>, vector<72x256xf32>
    %cst_38 = arith.constant dense<0.000000e+00> : vector<8x256xf32>
    %47 = tpu.matmul %45, %46, %cst_38 {dimension_numbers = #tpu.dot_dimension_numbers<[1], [0], [0], [1], [0, 0, 1, 1], [], []>, precision = #tpu.contract_precision<fp32>} : vector<8x72xf32>, vector<72x256xf32>, vector<8x256xf32> -> vector<8x256xf32>
    %48 = vector.extract_strided_slice %47 {offsets = [0, 0], sizes = [1, 256], strides = [1, 1]} : vector<8x256xf32> to vector<1x256xf32>
    %c0_39 = arith.constant 0 : index
    %c0_40 = arith.constant 0 : index
    %c0_41 = arith.constant 0 : index
    %49 = vector.load %arg4[%c0_39, %c0_40, %c0_41] : memref<1x1x256xf32, #tpu.memory_space<vmem>>, vector<1x1x256xf32>
    %50 = vector.shape_cast %49 : vector<1x1x256xf32> to vector<1x256xf32>
    %51 = vector.shape_cast %48 : vector<1x256xf32> to vector<1x1x256xf32>
    tpu.vector_store %arg4[%c0_39, %c0_40, %c0_41], %51 {strides = array<i32>} : memref<1x1x256xf32, #tpu.memory_space<vmem>>, vector<1x1x256xf32>,
    return
  }
  func.func @transform_0(%arg0: i32) -> (i32, i32) {
    %c0_i32 = arith.constant 0 : i32
    %c0_i32_0 = arith.constant 0 : i32
    return %c0_i32, %arg0 : i32, i32
  }
  func.func @transform_1(%arg0: i32) -> (i32, i32, i32) {
    %c0_i32 = arith.constant 0 : i32
    %c0_i32_0 = arith.constant 0 : i32
    %c0_i32_1 = arith.constant 0 : i32
    %c0_i32_2 = arith.constant 0 : i32
    return %c0_i32, %c0_i32_0, %c0_i32_1 : i32, i32, i32
  }
  func.func @transform_2(%arg0: i32) -> (i32, i32) {
    %c0_i32 = arith.constant 0 : i32
    %c0_i32_0 = arith.constant 0 : i32
    %c0_i32_1 = arith.constant 0 : i32
    return %c0_i32, %c0_i32_0 : i32, i32
  }
  func.func @transform_3(%arg0: i32) -> (i32, i32, i32) {
    %c0_i32 = arith.constant 0 : i32
    %c0_i32_0 = arith.constant 0 : i32
    %c0_i32_1 = arith.constant 0 : i32
    return %arg0, %c0_i32, %c0_i32_0 : i32, i32, i32
  }
}

</mosaic_0001>

<bundles_post_ra>
// kernel: _icnn_forward_impl.1
= control target key start
LH: loop header
LB: loop body
LE: loop exit
PB: predicated region body
PF: predicated region fallthrough
CT: control target
= control target key end

     0   :  { %8 = vsyncpa [#allocation4], 0  ;;  %s6727_s12 = smov [#allocation3]   ;;  %s9596_s0 = inlined_call_operand.vmem [shape: f32[2,256], index: 0, kind: input, shape index: {}]   ;;  %s9597_s1 = inlined_call_operand.hbm [shape: f32[4,64,72], index: 1, kind: input, shape index: {}]   ;;  %s9598_s2 = inlined_call_operand.vmem [shape: f32[8,72], index: 2, kind: input, shape index: {}]   ;;  %s9599_s3 = inlined_call_operand.vmem [shape: f32[1,1,256], index: 3, kind: output, shape index: {}]  }
   0x1   :  { %s16_s13 = sshll.u32 %s6727_s12, 4  ;;  %s6703_s16 = scalar_lea.hbm %s9597_s1, 4096  ;;  %s17_s13 = int_to_ptr.vmem [resolvable:$true] %s16_s13 }
   0x2   :  { %p6704_p0 = scmp.ne.s32.totalorder %s9597_s1, %s6703_s16  ;;  %p6707_p1 = scmp.lt.u32.totalorder %s6703_s16, %s9597_s1 }
   0x4   :  { %p6709_p2 = pnand %p6707_p1, %p6704_p0 }
   0x6   :  { %6712 = shalt.err (!%p6709_p2)
}
   0x7   :  { %s6713_s21 = scalar_lea.vmem %s17_s13, 4096  ;;  %p6718_p4 = scmp.lt.s32.totalorder %s17_s13, %s17_s13 }
   0x8   :  { %p6714_p3 = scmp.ne.s32.totalorder %s17_s13, %s6713_s21  ;;  %p6719_p5 = scmp.lt.s32.totalorder %s6713_s21, %s6713_s21 }
   0xa   :  { %p6720_p6 = por %p6719_p5, %p6718_p4 }
   0xc   :  { %p6721_p7 = pnand %p6720_p6, %p6714_p3 }
   0xe   :  { %6724 = shalt.err (!%p6721_p7)
}
   0xf   :  { %s6728_s22 = smov 128   ;;  %s6729_s23 = smov 8  }
  0x10   :  { %22 = dma.hbm_to_vmem [thread:$0]  %s9597_s1, 4096, %s17_s13, [#allocation4], %s6728_s22, %s6728_s22, %s6729_s23  }
  0x11   :  { %6725 = dma.done.wait [#allocation4], 4096  }
  0x12   :  { %6726 = vsyncadd [#allocation4], 4294963200  ;;  %v9601_v0 = vmov 0.0   ;;  %v48_v1 = vld [vmem:[#allocation3] sm:$0xff]  ;;  %v50_v2 = vld [vmem:[#allocation3 + $0x10] sm:$0xff]  ;;  %vm40_vm0 = vcmask 1041408  }
  0x13   :  { %326 = vmatprep.mubr.f32.mxu0 %v9601_v0  ;;  %163 = vmatprep.mubr.f32.mxu1 %v9601_v0  ;;  %s6731_s26 = smov 64   ;;  %vm43_vm1 = vcmask 1042432   ;;  %v49_v3 = vld [vmem:[#allocation3 + $0x8] sm:$0xff]  ;;  %v51_v4 = vld [vmem:[#allocation3 + $0x18] sm:$0xff]  ;;  %v52_v11 = vld [vmem:[#allocation3 + $0x20] sm:$0xff]  ;;  %vm80_vm2 = vcmask 64512  }
  0x14   :  { %64 = vrot.lane.b32.xlu0 %v48_v1, %s6731_s26  ;;  %68 = vrot.lane.b32.xlu1 %v50_v2, %s6731_s26  ;;  %v5726_v5 = vld.sshfl [vmem:[%s9596_s0] sm:$0x33 pattern:$0x76325410]  ;;  %v53_v12 = vld [vmem:[#allocation3 + $0x28] sm:$0xff]  ;;  %v54_v18 = vld [vmem:[#allocation3 + $0x30] sm:$0xff] }
  0x15   :  { %v37_v6 = vcombine.high %v5726_v5, %v5726_v5  ;;  %v41_v7 = vsel %vm40_vm0, %v5726_v5, 1.0  ;;  %v55_v19 = vld [vmem:[#allocation3 + $0x38] sm:$0xff]  ;;  %vm1156_vm3 = vcmask 588800  }
  0x16   :  { %v44_v8 = vsel %vm43_vm1, %v41_v7, 0.0 }
  0x17   :  { %v42_v9 = vsel %vm40_vm0, %v37_v6, 1.0  ;;  %v6770_v10 = vand.u32 4294901760, %v44_v8 }
  0x18   :  { %66 = vrot.lane.b32.xlu0 %v49_v3, %s6731_s26  ;;  %70 = vrot.lane.b32.xlu1 %v51_v4, %s6731_s26  ;;  %v45_v13 = vsel %vm43_vm1, %v42_v9, 0.0 }
  0x19   :  { %v6772_v14 = vand.u32 4294901760, %v45_v13  ;;  %v6775_v15 = vsub.f32 %v44_v8, %v6770_v10 }
  0x1b   :  { %v6778_v16 = vsub.f32 %v45_v13, %v6772_v14  ;;  %v6781_v17 = vand.u32 4294901760, %v6775_v15  ;;  %98 = vmatprep.subr.mxu1 %v6772_v14 }
  0x1c   :  { %72 = vrot.lane.b32.xlu0 %v52_v11, %s6731_s26  ;;  %74 = vrot.lane.b32.xlu1 %v53_v12, %s6731_s26 }
  0x1d   :  { %9672 = vst [vmem:[#allocation6_spill] sm:$0xff] %v6781_v17  ;;  %v6785_v20 = vand.u32 4294901760, %v6778_v16  ;;  %v261_v21 = vsub.f32 %v6775_v15, %v6781_v17  ;;  %100 = vmatpush1.msra.mxu1 %v6770_v10 }
  0x1f   :  { %9673 = vst [vmem:[#allocation7_spill] sm:$0xff] %v6785_v20  ;;  %v255_v22 = vsub.f32 %v6778_v16, %v6785_v20  ;;  %v6792_v23 = vand.u32 4294901760, %v261_v21 }
  0x20   :  { %76 = vrot.lane.b32.xlu0 %v54_v18, %s6731_s26  ;;  %78 = vrot.lane.b32.xlu1 %v55_v19, %s6731_s26 }
  0x21   :  { %v6794_v24 = vand.u32 4294901760, %v255_v22 }
  0x23   :  { %257 = vmatprep.subr.mxu0 %v6794_v24 }
  0x24   :  { %263 = vmatpush1.msra.mxu0 %v6792_v23 }
  0x25   :  { %385 = vmatprep.subr.mxu0 %v6778_v16 }
  0x86   :  { %v65_v25 = vpop.permute.xlu0 %64  ;;  %v69_v26 = vpop.permute.xlu1 %68 }
  0x87   :  { %v81_v27 = vsel %vm80_vm2, %v65_v25, 0  ;;  %v85_v28 = vsel %vm80_vm2, %v69_v26, 0 }
  0x88   :  { %v6801_v29 = vand.u32 4294901760, %v81_v27  ;;  %v6803_v30 = vand.u32 4294901760, %v85_v28 }
  0x8a   :  { %v6806_v31 = vsub.f32 %v81_v27, %v6801_v29  ;;  %v67_v32 = vpop.permute.xlu0 %66  ;;  %328 = vmatmul.mubr.f32.vlgmr.msra.gmra.mrb[0].mxu0 %v6801_v29  ;;  %v71_v33 = vpop.permute.xlu1 %70  ;;  %v6810_v34 = vsub.f32 %v85_v28, %v6803_v30 }
  0x8b   :  { %v83_v35 = vsel %vm80_vm2, %v67_v32, 0  ;;  %333 = vmatprep.mubr.f32.mxu0 %v9601_v0  ;;  %v87_v36 = vsel %vm80_vm2, %v71_v33, 0  ;;  %388 = vmatpush1.msra.mxu0 %v6775_v15 }
  0x8c   :  { %v166_v37 = vand.u32 4294901760, %v6806_v31  ;;  %v6817_v38 = vand.u32 4294901760, %v83_v35  ;;  %v6819_v39 = vand.u32 4294901760, %v87_v36  ;;  %517 = vmatprep.subr.mxu0 %v6772_v14  ;;  %v188_v44 = vand.u32 4294901760, %v6810_v34 }
  0x8e   :  { %v6823_v40 = vsub.f32 %v83_v35, %v6817_v38  ;;  %335 = vmatmul.mubr.f32.gmra.mrb[2].mxu0 %v6817_v38  ;;  %v73_v41 = vpop.permute.xlu0 %72  ;;  %v167_v42 = vsub.f32 %v6806_v31, %v166_v37  ;;  %v75_v43 = vpop.permute.xlu1 %74  ;;  %v6831_v45 = vsub.f32 %v87_v36, %v6819_v39  ;;  %v189_v54 = vsub.f32 %v6810_v34, %v188_v44 }
  0x8f   :  { %340 = vmatprep.mubr.f32.mxu0 %v9601_v0  ;;  %v89_v46 = vsel %vm80_vm2, %v73_v41, 0  ;;  %v91_v50 = vsel %vm80_vm2, %v75_v43, 0 }
  0x90   :  { %v177_v47 = vand.u32 4294901760, %v6823_v40  ;;  %v6836_v48 = vand.u32 4294901760, %v89_v46  ;;  %v168_v49 = vand.u32 4294901760, %v167_v42  ;;  %v199_v53 = vand.u32 4294901760, %v6831_v45 }
  0x91   :  { %v6852_v56 = vand.u32 4294901760, %v91_v50  ;;  %v190_v60 = vand.u32 4294901760, %v189_v54  ;;  %v1131_v54 = vld [vmem:[#allocation3 + $0x48] sm:$0xff] }
  0x92   :  { %169 = vmatmul.mubr.f32.vlgmr.msra.gmra.mrb[0].mxu1 %v168_v49  ;;  %342 = vmatmul.mubr.f32.gmra.mrb[4].mxu0 %v6803_v30  ;;  %v178_v51 = vsub.f32 %v6823_v40, %v177_v47  ;;  %v77_v52 = vpop.permute.xlu0 %76  ;;  %v6850_v55 = vsub.f32 %v89_v46, %v6836_v48  ;;  %v79_v59 = vpop.permute.xlu1 %78  ;;  %v200_v61 = vsub.f32 %v6831_v45, %v199_v53  ;;  %v1130_v46 = vld [vmem:[#allocation3 + $0x40] sm:$0xff] }
  0x93   :  { %174 = vmatprep.mubr.f32.mxu1 %v9601_v0  ;;  %347 = vmatprep.mubr.f32.mxu0 %v9601_v0  ;;  %v93_v58 = vsel %vm80_vm2, %v77_v52, 0  ;;  %v6863_v63 = vsub.f32 %v91_v50, %v6852_v56  ;;  %v95_v2 = vsel %vm80_vm2, %v79_v59, 0  ;;  %v1158_v52 = vsel %vm1156_vm3, %v1130_v46, 0 }
  0x94   :  { %v179_v57 = vand.u32 4294901760, %v178_v51  ;;  %v210_v62 = vand.u32 4294901760, %v6850_v55  ;;  %v6865_v1 = vand.u32 4294901760, %v93_v58  ;;  %v6871_v3 = vand.u32 4294901760, %v95_v2 }
  0x95   :  { %v221_v4 = vand.u32 4294901760, %v6863_v63  ;;  %v201_v6 = vand.u32 4294901760, %v200_v61  ;;  %v1161_v61 = vsel %vm1156_vm3, %v1131_v54, 0 }
  0x96   :  { %180 = vmatmul.mubr.f32.gmra.mrb[2].mxu1 %v179_v57  ;;  %349 = vmatmul.mubr.f32.gmra.mrb[6].mxu0 %v6819_v39  ;;  %v231_v5 = vsub.f32 %v93_v58, %v6865_v1  ;;  %v211_v7 = vsub.f32 %v6850_v55, %v210_v62  ;;  %v242_v9 = vsub.f32 %v95_v2, %v6871_v3  ;;  %v6989_v58 = vand.u32 4294901760, %v1158_v52 }
  0x97   :  { %185 = vmatprep.mubr.f32.mxu1 %v9601_v0  ;;  %354 = vmatprep.mubr.f32.mxu0 %v9601_v0  ;;  %v222_v12 = vsub.f32 %v6863_v63, %v221_v4 }
  0x98   :  { %v232_v8 = vand.u32 4294901760, %v231_v5  ;;  %v212_v11 = vand.u32 4294901760, %v211_v7  ;;  %v243_v13 = vand.u32 4294901760, %v242_v9 }
  0x99   :  { %v223_v18 = vand.u32 4294901760, %v222_v12 }
  0x9a   :  { %191 = vmatmul.mubr.f32.gmra.mrb[4].mxu1 %v190_v60  ;;  %356 = vmatmul.mubr.f32.gmra.mrb[8].mxu0 %v6836_v48  ;;  %v233_v19 = vsub.f32 %v231_v5, %v232_v8  ;;  %v244_v22 = vsub.f32 %v242_v9, %v243_v13 }
  0x9b   :  { %196 = vmatprep.mubr.f32.mxu1 %v9601_v0  ;;  %361 = vmatprep.mubr.f32.mxu0 %v9601_v0 }
  0x9c   :  { %v234_v21 = vand.u32 4294901760, %v233_v19  ;;  %v245_v25 = vand.u32 4294901760, %v244_v22  ;;  %v1133_v22 = vld [vmem:[#allocation3 + $0x58] sm:$0xff] }
  0x9e   :  { %202 = vmatmul.mubr.f32.gmra.mrb[6].mxu1 %v201_v6  ;;  %363 = vmatmul.mubr.f32.gmra.mrb[10].mxu0 %v6852_v56 }
  0x9f   :  { %207 = vmatprep.mubr.f32.mxu1 %v9601_v0  ;;  %368 = vmatprep.mubr.f32.mxu0 %v9601_v0 }
  0xa2   :  { %213 = vmatmul.mubr.f32.gmra.mrb[8].mxu1 %v212_v11  ;;  %370 = vmatmul.mubr.f32.gmra.mrb[12].mxu0 %v6865_v1  ;;  %v1132_v11 = vld [vmem:[#allocation3 + $0x50] sm:$0xff] }
  0xa3   :  { %218 = vmatprep.mubr.f32.mxu1 %v9601_v0  ;;  %375 = vmatprep.mubr.f32.mxu0 %v9601_v0 }
  0xa6   :  { %224 = vmatmul.mubr.f32.gmra.mrb[10].mxu1 %v223_v18  ;;  %377 = vmatmul.mubr.f32.gmra.mrb[14].mxu0 %v6871_v3 }
  0xa7   :  { %229 = vmatprep.mubr.f32.mxu1 %v9601_v0  ;;  %451 = vmatprep.mubr.f32.mxu0 %v9601_v0 }
  0xaa   :  { %235 = vmatmul.mubr.f32.gmra.mrb[12].mxu1 %v234_v21  ;;  %454 = vmatmul.mubr.f32.vlgmr.msra.gmra.mrb[0].mxu0 %v6806_v31 }
  0xab   :  { %240 = vmatprep.mubr.f32.mxu1 %v9601_v0  ;;  %459 = vmatprep.mubr.f32.mxu0 %v9601_v0 }
  0xac   :  { %519 = vmatpush1.msra.mxu0 %v6770_v10 }
  0xad   :  { %658 = vmatprep.subr.mxu0 %v6785_v20 }
  0xae   :  { %246 = vmatmul.mubr.f32.gmra.mrb[14].mxu1 %v245_v25  ;;  %462 = vmatmul.mubr.f32.gmra.mrb[2].mxu0 %v6823_v40 }
  0xaf   :  { %467 = vmatprep.mubr.f32.mxu0 %v9601_v0  ;;  %1263 = vmatprep.mubr.f32.mxu1 %v9601_v0 }
  0xb2   :  { %470 = vmatmul.mubr.f32.gmra.mrb[4].mxu0 %v6810_v34 }
  0xb3   :  { %475 = vmatprep.mubr.f32.mxu0 %v9601_v0 }
  0xb6   :  { %478 = vmatmul.mubr.f32.gmra.mrb[6].mxu0 %v6831_v45 }
  0xb7   :  { %483 = vmatprep.mubr.f32.mxu0 %v9601_v0 }
  0xba   :  { %486 = vmatmul.mubr.f32.gmra.mrb[8].mxu0 %v6850_v55 }
  0xbb   :  { %491 = vmatprep.mubr.f32.mxu0 %v9601_v0 }
  0xbe   :  { %494 = vmatmul.mubr.f32.gmra.mrb[10].mxu0 %v6863_v63 }
  0xbf   :  { %499 = vmatprep.mubr.f32.mxu0 %v9601_v0 }
  0xc2   :  { %502 = vmatmul.mubr.f32.gmra.mrb[12].mxu0 %v231_v5 }
  0xc3   :  { %507 = vmatprep.mubr.f32.mxu0 %v9601_v0 }
  0xc6   :  { %510 = vmatmul.mubr.f32.gmra.mrb[14].mxu0 %v242_v9 }
  0xc7   :  { %582 = vmatprep.mubr.f32.mxu0 %v9601_v0 }
  0xca   :  { %586 = vmatmul.mubr.f32.vlgmr.msra.gmra.mrb[0].mxu0 %v166_v37 }
  0xcb   :  { %591 = vmatprep.mubr.f32.mxu0 %v9601_v0  ;;  %662 = vmatpush1.msra.mxu0 %v6781_v17 }
  0xcc   :  { %783 = vmatprep.subr.mxu0 %v6772_v14 }
  0xce   :  { %595 = vmatmul.mubr.f32.gmra.mrb[2].mxu0 %v177_v47 }
  0xcf   :  { %600 = vmatprep.mubr.f32.mxu0 %v9601_v0 }
  0xd2   :  { %604 = vmatmul.mubr.f32.gmra.mrb[4].mxu0 %v188_v44 }
  0xd3   :  { %609 = vmatprep.mubr.f32.mxu0 %v9601_v0 }
  0xd6   :  { %613 = vmatmul.mubr.f32.gmra.mrb[6].mxu0 %v199_v53 }
  0xd7   :  { %618 = vmatprep.mubr.f32.mxu0 %v9601_v0 }
  0xda   :  { %622 = vmatmul.mubr.f32.gmra.mrb[8].mxu0 %v210_v62 }
  0xdb   :  { %627 = vmatprep.mubr.f32.mxu0 %v9601_v0 }
  0xde   :  { %631 = vmatmul.mubr.f32.gmra.mrb[10].mxu0 %v221_v4  ;;  %v7001_v4 = vand.u32 4294901760, %v1161_v61 }
  0xdf   :  { %636 = vmatprep.mubr.f32.mxu0 %v9601_v0 }
  0xe0   :  { %v7010_v21 = vsub.f32 %v1161_v61, %v7001_v4 }
  0xe2   :  { %640 = vmatmul.mubr.f32.gmra.mrb[12].mxu0 %v232_v8 }
  0xe3   :  { %645 = vmatprep.mubr.f32.mxu0 %v9601_v0 }
  0xe6   :  { %649 = vmatmul.mubr.f32.gmra.mrb[14].mxu0 %v243_v13 }
  0xe7   :  { %725 = vmatprep.mubr.f32.mxu0 %v9601_v0 }
  0xea   :  { %727 = vmatmul.mubr.f32.vlgmr.msra.gmra.mrb[0].mxu0 %v6801_v29 }
  0xeb   :  { %732 = vmatprep.mubr.f32.mxu0 %v9601_v0  ;;  %785 = vmatpush1.msra.mxu0 %v6770_v10 }
  0xee   :  { %734 = vmatmul.mubr.f32.gmra.mrb[2].mxu0 %v6817_v38 }
  0xef   :  { %739 = vmatprep.mubr.f32.mxu0 %v9601_v0 }
  0xf2   :  { %741 = vmatmul.mubr.f32.gmra.mrb[4].mxu0 %v6803_v30 }
  0xf3   :  { %746 = vmatprep.mubr.f32.mxu0 %v9601_v0 }
  0xf6   :  { %748 = vmatmul.mubr.f32.gmra.mrb[6].mxu0 %v6819_v39 }
  0xf7   :  { %753 = vmatprep.mubr.f32.mxu0 %v9601_v0 }
  0xfa   :  { %755 = vmatmul.mubr.f32.gmra.mrb[8].mxu0 %v6836_v48 }
  0xfb   :  { %760 = vmatprep.mubr.f32.mxu0 %v9601_v0 }
  0xfe   :  { %762 = vmatmul.mubr.f32.gmra.mrb[10].mxu0 %v6852_v56 }
  0xff   :  { %767 = vmatprep.mubr.f32.mxu0 %v9601_v0 }
 0x102   :  { %769 = vmatmul.mubr.f32.gmra.mrb[12].mxu0 %v6865_v1 }
 0x103   :  { %774 = vmatprep.mubr.f32.mxu0 %v9601_v0 }
 0x106   :  { %776 = vmatmul.mubr.f32.gmra.mrb[14].mxu0 %v6871_v3 }
 0x107   :  { %848 = vmatprep.mubr.f32.mxu0 %v9601_v0 }
 0x10a   :  { %850 = vmatmul.mubr.f32.vlgmr.msra.gmra.mrb[0].mxu0 %v6801_v29 }
 0x10b   :  { %855 = vmatprep.mubr.f32.mxu0 %v9601_v0 }
 0x10e   :  { %857 = vmatmul.mubr.f32.gmra.mrb[2].mxu0 %v6817_v38 }
 0x10f   :  { %862 = vmatprep.mubr.f32.mxu0 %v9601_v0 }
 0x112   :  { %864 = vmatmul.mubr.f32.gmra.mrb[4].mxu0 %v6803_v30 }
 0x113   :  { %869 = vmatprep.mubr.f32.mxu0 %v9601_v0 }
 0x116   :  { %871 = vmatmul.mubr.f32.gmra.mrb[6].mxu0 %v6819_v39 }
 0x117   :  { %876 = vmatprep.mubr.f32.mxu0 %v9601_v0 }
 0x11a   :  { %878 = vmatmul.mubr.f32.gmra.mrb[8].mxu0 %v6836_v48 }
 0x11b   :  { %883 = vmatprep.mubr.f32.mxu0 %v9601_v0 }
 0x11e   :  { %885 = vmatmul.mubr.f32.gmra.mrb[10].mxu0 %v6852_v56 }
 0x11f   :  { %890 = vmatprep.mubr.f32.mxu0 %v9601_v0 }
 0x122   :  { %892 = vmatmul.mubr.f32.gmra.mrb[12].mxu0 %v6865_v1 }
 0x123   :  { %897 = vmatprep.mubr.f32.mxu0 %v9601_v0 }
 0x126   :  { %899 = vmatmul.mubr.f32.gmra.mrb[14].mxu0 %v6871_v3  ;;  %v6999_v3 = vsub.f32 %v1158_v52, %v6989_v58 }
 0x127   :  { %2554 = vmatprep.mubr.f32.mxu0 %v9601_v0 }
 0x128   :  { %9674 = vst [vmem:[#allocation8_spill] sm:$0xff] %v6999_v3  ;;  %v9600_v19 = vand.u32 4294901760, %v6999_v3 }
 0x165   :  { %v170_v26 = vpop.f32.mrb[0].mxu1 }
 0x166   :  { %v172_v27 = vpop.f32.mrb[1].mxu1 }
 0x169   :  { %v181_v28 = vpop.f32.mrb[2].mxu1 }
 0x16a   :  { %v183_v29 = vpop.f32.mrb[3].mxu1 }
 0x16d   :  { %v192_v30 = vpop.f32.mrb[4].mxu1 }
 0x16e   :  { %v194_v31 = vpop.f32.mrb[5].mxu1 }
 0x171   :  { %v203_v32 = vpop.f32.mrb[6].mxu1 }
 0x172   :  { %v205_v33 = vpop.f32.mrb[7].mxu1 }
 0x175   :  { %v6960_v34 = vpop.f32.mrb[8].mxu1 }
 0x176   :  { %v6962_v35 = vpop.f32.mrb[9].mxu1 }
 0x179   :  { %v6964_v36 = vpop.f32.mrb[10].mxu1 }
 0x17a   :  { %v6966_v37 = vpop.f32.mrb[11].mxu1 }
 0x17d   :  { %v6968_v38 = vpop.f32.mrb[12].mxu1 }
 0x17e   :  { %v6970_v39 = vpop.f32.mrb[13].mxu1 }
 0x181   :  { %v6972_v40 = vpop.f32.mrb[14].mxu1 }
 0x182   :  { %v6974_v41 = vpop.f32.mrb[15].mxu1 }
 0x1dd   :  { %v851_v42 = vpop.f32.mrb[0].mxu0 }
 0x1de   :  { %v6976_v43 = vadd.f32 %v851_v42, %v170_v26  ;;  %v853_v44 = vpop.f32.mrb[1].mxu0 }
 0x1df   :  { %v6978_v45 = vadd.f32 %v853_v44, %v172_v27 }
 0x1e0   :  { %v921_v47 = vmul.f32 1.442695, %v6976_v43  ;;  %vm905_vm4 = vcmp.gt.f32.partialorder %v6976_v43, 20.0 }
 0x1e1   :  { %v923_v48 = vmul.f32 1.442695, %v6978_v45  ;;  %v858_v49 = vpop.f32.mrb[2].mxu0  ;;  %vm906_vm6 = vcmp.gt.f32.partialorder %v6978_v45, 20.0 }
 0x1e2   :  { %6447 = vpow2.f32 %v921_v47  ;;  %v6982_v50 = vadd.f32 %v858_v49, %v181_v28  ;;  %v860_v51 = vpop.f32.mrb[3].mxu0 }
 0x1e3   :  { %6449 = vpow2.f32 %v923_v48  ;;  %v6985_v53 = vadd.f32 %v860_v51, %v183_v29  ;;  %v7013_v29 = vsel %vm1156_vm3, %v1132_v11, 0  ;;  %v7024_v48 = vsub.f32 %v6999_v3, %v9600_v19 }
 0x1e4   :  { %v925_v55 = vmul.f32 1.442695, %v6982_v50  ;;  %vm907_vm8 = vcmp.gt.f32.partialorder %v6982_v50, 20.0 }
 0x1e5   :  { %v927_v56 = vmul.f32 1.442695, %v6985_v53  ;;  %v865_v57 = vpop.f32.mrb[4].mxu0  ;;  %vm908_vm11 = vcmp.gt.f32.partialorder %v6985_v53, 20.0 }
 0x1e6   :  { %6451 = vpow2.f32 %v925_v55  ;;  %v6991_v59 = vadd.f32 %v865_v57, %v192_v30  ;;  %v867_v60 = vpop.f32.mrb[5].mxu0  ;;  %v7030_v57 = vand.u32 4294901760, %v7013_v29 }
 0x1e7   :  { %6453 = vpow2.f32 %v927_v56  ;;  %v6994_v62 = vadd.f32 %v867_v60, %v194_v31 }
 0x1e8   :  { %v929_v63 = vmul.f32 1.442695, %v6991_v59  ;;  %vm909_vm12 = vcmp.gt.f32.partialorder %v6991_v59, 20.0 }
 0x1e9   :  { %v931_v1 = vmul.f32 1.442695, %v6994_v62  ;;  %v872_v2 = vpop.f32.mrb[6].mxu0  ;;  %vm910_vm13 = vcmp.gt.f32.partialorder %v6994_v62, 20.0 }
 0x1ea   :  { %6455 = vpow2.f32 %v929_v63  ;;  %v7003_v5 = vadd.f32 %v872_v2, %v203_v32  ;;  %v874_v6 = vpop.f32.mrb[7].mxu0 }
 0x1eb   :  { %6457 = vpow2.f32 %v931_v1  ;;  %v7005_v7 = vadd.f32 %v874_v6, %v205_v33  ;;  %v7019_v33 = vsel %vm1156_vm3, %v1133_v22, 0 }
 0x1ec   :  { %v6448_v8 = vpop.eup %6447  ;;  %v933_v9 = vmul.f32 1.442695, %v7003_v5  ;;  %v7033_v60 = vand.u32 4294901760, %v7019_v33  ;;  %vm911_vm14 = vcmp.gt.f32.partialorder %v7003_v5, 20.0 }
 0x1ed   :  { %v6450_v12 = vpop.eup %6449  ;;  %v953_v13 = vadd.f32 1.0, %v6448_v8  ;;  %v879_v18 = vpop.f32.mrb[8].mxu0  ;;  %v956_v25 = vmul.f32 -0.5, %v6448_v8  ;;  %v959_v31 = vand.u32 2147483647, %v6448_v8  ;;  %vm912_vm2 = vcmp.gt.f32.partialorder %v7005_v7, 20.0 }
 0x1ee   :  { %v962_v26 = vadd.f32 1.0, %v6450_v12  ;;  %6459 = vpow2.f32 %v933_v9  ;;  %v881_v27 = vpop.f32.mrb[9].mxu0  ;;  %v965_v28 = vmul.f32 -0.5, %v6450_v12  ;;  %v7016_v32 = vadd.f32 %v879_v18, %v6960_v34 }
 0x1ef   :  { %6461 = vlog2.f32 %v953_v13  ;;  %v957_v51 = vadd.f32 1.0, %v956_v25  ;;  %v968_v52 = vand.u32 2147483647, %v6450_v12  ;;  %vm7038_vm5 = vcmp.lt.f32.partialorder %v959_v31, 0.0004427343 }
 0x1f0   :  { %v6452_v30 = vpop.eup %6451  ;;  %6463 = vlog2.f32 %v962_v26  ;;  %v966_v56 = vadd.f32 1.0, %v965_v28  ;;  %v935_v2 = vmul.f32 1.442695, %v7005_v7  ;;  %v7054_v19 = vadd.f32 %v881_v27, %v6962_v35 }
 0x1f1   :  { %v6454_v42 = vpop.eup %6453  ;;  %v971_v44 = vadd.f32 1.0, %v6452_v30  ;;  %v974_v46 = vmul.f32 -0.5, %v6452_v30  ;;  %v886_v47 = vpop.f32.mrb[10].mxu0  ;;  %v977_v1 = vand.u32 2147483647, %v6452_v30  ;;  %v958_v22 = vmul.f32 %v6448_v8, %v957_v51 }
 0x1f2   :  { %v980_v54 = vadd.f32 1.0, %v6454_v42  ;;  %v983_v55 = vmul.f32 -0.5, %v6454_v42  ;;  %v7027_v34 = vpop.f32.mrb[11].mxu0  ;;  %v986_v11 = vand.u32 2147483647, %v6454_v42 }
 0x1f3   :  { %6465 = vlog2.f32 %v971_v44  ;;  %v975_v9 = vadd.f32 1.0, %v974_v46  ;;  %vm7047_vm7 = vcmp.lt.f32.partialorder %v968_v52, 0.0004427343  ;;  %v967_v44 = vmul.f32 %v6450_v12, %v966_v56 }
 0x1f4   :  { %v7035_v61 = vpop.eup %6455  ;;  %6467 = vlog2.f32 %v980_v54  ;;  %v984_v26 = vadd.f32 1.0, %v983_v55  ;;  %vm7059_vm9 = vcmp.lt.f32.partialorder %v977_v1, 0.0004427343  ;;  %v937_v51 = vmul.f32 1.442695, %v7016_v32 }
 0x1f5   :  { %v7043_v6 = vpop.eup %6457  ;;  %v989_v13 = vadd.f32 1.0, %v7035_v61  ;;  %v893_v18 = vpop.f32.mrb[12].mxu0  ;;  %v992_v54 = vmul.f32 -0.5, %v7035_v61  ;;  %v7065_v52 = vadd.f32 %v886_v47, %v6964_v36  ;;  %v976_v55 = vmul.f32 %v6452_v30, %v975_v9 }
 0x1f6   :  { %v998_v28 = vadd.f32 1.0, %v7043_v6  ;;  %v895_v31 = vpop.f32.mrb[13].mxu0  ;;  %vm7067_vm10 = vcmp.lt.f32.partialorder %v986_v11, 0.0004427343  ;;  %v1001_v35 = vmul.f32 -0.5, %v7043_v6  ;;  %v7103_v25 = vadd.f32 %v7027_v34, %v6966_v37 }
 0x1f7   :  { %6469 = vlog2.f32 %v989_v13  ;;  %v995_v49 = vand.u32 2147483647, %v7035_v61  ;;  %v993_v30 = vadd.f32 1.0, %v992_v54  ;;  %v1004_v9 = vand.u32 2147483647, %v7043_v6 }
 0x1f8   :  { %v7056_v46 = vpop.eup %6459  ;;  %6471 = vlog2.f32 %v998_v28  ;;  %v985_v28 = vmul.f32 %v6454_v42, %v984_v26  ;;  %v939_v42 = vmul.f32 1.442695, %v7054_v19  ;;  %v1002_v63 = vadd.f32 1.0, %v1001_v35 }
 0x1f9   :  { %v6462_v12 = vpop.eup %6461  ;;  %v1007_v27 = vadd.f32 1.0, %v7056_v46  ;;  %v7073_v1 = vpop.f32.mrb[14].mxu0  ;;  %6473 = vpow2.f32 %v935_v2  ;;  %vm996_vm15 = vcmp.lt.f32.partialorder %v995_v49, 0.0004427343  ;;  %vm1005_vm0 = vcmp.lt.f32.partialorder %v1004_v9, 0.0004427343 }
 0x1fa   :  { %v6464_v13 = vpop.eup %6463  ;;  %v955_v0 = vmul.f32 0.6931472, %v6462_v12  ;;  %v7076_v36 = vpop.f32.mrb[15].mxu0  ;;  %v1010_v12 = vmul.f32 -0.5, %v7056_v46 }
 0x1fb   :  { %v964_v47 = vmul.f32 0.6931472, %v6464_v13  ;;  %6475 = vlog2.f32 %v1007_v27 }
 0x1fc   :  { %v961_v11 = vsel %vm7038_vm5, %v958_v22, %v955_v0  ;;  %6477 = vpow2.f32 %v937_v51  ;;  %v941_v0 = vmul.f32 1.442695, %v7065_v52  ;;  %v1011_v35 = vadd.f32 1.0, %v1010_v12 }
 0x1fd   :  { %v6466_v2 = vpop.eup %6465  ;;  %v7088_v26 = vsel %vm905_vm4, %v6976_v43, %v961_v11  ;;  %v970_v54 = vsel %vm7047_vm7, %v967_v44, %v964_v47  ;;  %6479 = vpow2.f32 %v939_v42  ;;  %v1013_v11 = vand.u32 2147483647, %v7056_v46 }
 0x1fe   :  { %v6468_v22 = vpop.eup %6467  ;;  %v1183_v27 = vand.u32 4294901760, %v7088_v26  ;;  %v7098_v51 = vsel %vm906_vm6, %v6978_v45, %v970_v54  ;;  %v973_v13 = vmul.f32 0.6931472, %v6466_v2  ;;  %6481 = vpow2.f32 %v941_v0 }
 0x1ff   :  { %v982_v43 = vmul.f32 0.6931472, %v6468_v22  ;;  %v7108_v47 = vadd.f32 %v893_v18, %v6968_v38  ;;  %v7111_v45 = vadd.f32 %v895_v31, %v6970_v39  ;;  %v1181_v42 = vand.u32 4294901760, %v7098_v51 }
 0x200   :  { %v979_v44 = vsel %vm7059_vm9, %v976_v55, %v973_v13  ;;  %v7125_v38 = vsub.f32 %v7088_v26, %v1183_v27  ;;  %v994_v18 = vmul.f32 %v7035_v61, %v993_v30  ;;  %v1012_v12 = vmul.f32 %v7056_v46, %v1011_v35 }
 0x201   :  { %v6470_v2 = vpop.eup %6469  ;;  %v7117_v54 = vsel %vm907_vm8, %v6982_v50, %v979_v44  ;;  %v988_v37 = vsel %vm7067_vm10, %v985_v28, %v982_v43  ;;  %v1003_v50 = vmul.f32 %v7043_v6, %v1002_v63  ;;  %vm7134_vm1 = vcmp.lt.f32.partialorder %v1013_v11, 0.0004427343 }
 0x202   :  { %v6472_v34 = vpop.eup %6471  ;;  %v991_v39 = vmul.f32 0.6931472, %v6470_v2  ;;  %v9604_v31 = vand.u32 4294901760, %v7117_v54  ;;  %v1100_v56 = vsel %vm908_vm11, %v6985_v53, %v988_v37  ;;  %v7141_v49 = vsub.f32 %v7098_v51, %v1181_v42 }
 0x203   :  { %v1000_v8 = vmul.f32 0.6931472, %v6472_v34  ;;  %v6474_v55 = vpop.eup %6473  ;;  %vm913_vm5 = vcmp.gt.f32.partialorder %v7016_v32, 20.0  ;;  %vm914_vm7 = vcmp.gt.f32.partialorder %v7054_v19, 20.0  ;;  %vm915_vm8 = vcmp.gt.f32.partialorder %v7065_v52, 20.0 }
 0x204   :  { %v997_v28 = vsel %vm996_vm15, %v994_v18, %v991_v39  ;;  %v1016_v53 = vadd.f32 1.0, %v6474_v55  ;;  %v7158_v43 = vsub.f32 %v7117_v54, %v9604_v31  ;;  %v1019_v11 = vmul.f32 -0.5, %v6474_v55 }
 0x205   :  { %v6476_v61 = vpop.eup %6475  ;;  %v7146_v6 = vsel %vm909_vm12, %v6991_v59, %v997_v28  ;;  %v1006_v30 = vsel %vm1005_vm0, %v1003_v50, %v1000_v8  ;;  %v1185_v59 = vand.u32 4294901760, %v1100_v56  ;;  %v1022_v8 = vand.u32 2147483647, %v6474_v55 }
 0x206   :  { %v6478_v9 = vpop.eup %6477  ;;  %v1191_v63 = vand.u32 4294901760, %v7146_v6  ;;  %v7153_v22 = vsel %vm910_vm13, %v6994_v62, %v1006_v30  ;;  %v1009_v13 = vmul.f32 0.6931472, %v6476_v61  ;;  %6483 = vlog2.f32 %v1016_v53 }
 0x207   :  { %v7160_v44 = vpop.eup %6479  ;;  %v9603_v35 = vand.u32 4294901760, %v7153_v22  ;;  %v1025_v37 = vadd.f32 1.0, %v6478_v9  ;;  %v1028_v34 = vmul.f32 -0.5, %v6478_v9  ;;  %v943_v50 = vmul.f32 1.442695, %v7103_v25 }
 0x208   :  { %v1015_v2 = vsel %vm7134_vm1, %v1012_v12, %v1009_v13  ;;  %v7165_v62 = vpop.eup %6481  ;;  %v7168_v39 = vsub.f32 %v7146_v6, %v1191_v63  ;;  %v1020_v61 = vadd.f32 1.0, %v1019_v11  ;;  %v7174_v0 = vsub.f32 %v1100_v56, %v1185_v59 }
 0x209   :  { %v1103_v18 = vsel %vm911_vm14, %v7003_v5, %v1015_v2  ;;  %6485 = vlog2.f32 %v1025_v37  ;;  %v1029_v30 = vadd.f32 1.0, %v1028_v34  ;;  %v1031_v12 = vand.u32 2147483647, %v6478_v9 }
 0x20a   :  { %v1195_v28 = vand.u32 4294901760, %v1103_v18  ;;  %v1034_v53 = vadd.f32 1.0, %v7160_v44  ;;  %v945_v13 = vmul.f32 1.442695, %v7108_v47  ;;  %v7182_v5 = vsub.f32 %v7153_v22, %v9603_v35 }
 0x20b   :  { %v1037_v11 = vmul.f32 -0.5, %v7160_v44  ;;  %v1043_v2 = vadd.f32 1.0, %v7165_v62  ;;  %vm7190_vm4 = vcmp.lt.f32.partialorder %v1022_v8, 0.0004427343  ;;  %v1021_v6 = vmul.f32 %v6474_v55, %v1020_v61 }
 0x20c   :  { %v7188_v37 = vsub.f32 %v1103_v18, %v1195_v28  ;;  %6487 = vlog2.f32 %v1034_v53  ;;  %v1030_v46 = vmul.f32 %v6478_v9, %v1029_v30  ;;  %v1046_v35 = vmul.f32 -0.5, %v7165_v62 }
 0x20d   :  { %6489 = vlog2.f32 %v1043_v2  ;;  %vm7196_vm6 = vcmp.lt.f32.partialorder %v1031_v12, 0.0004427343  ;;  %v1040_v56 = vand.u32 2147483647, %v7160_v44  ;;  %v947_v18 = vmul.f32 1.442695, %v7111_v45 }
 0x20e   :  { %6491 = vpow2.f32 %v943_v50  ;;  %v1038_v8 = vadd.f32 1.0, %v1037_v11  ;;  %v7204_v55 = vadd.f32 %v7073_v1, %v6972_v40  ;;  %v7208_v9 = vadd.f32 %v7076_v36, %v6974_v41 }
 0x20f   :  { %6493 = vpow2.f32 %v945_v13  ;;  %v1049_v12 = vand.u32 2147483647, %v7165_v62  ;;  %v7214_v50 = vpack.c.bf16 %v1185_v59, %v1181_v42  ;;  %v9689_v53 = vand.u32 4294901760, %v7117_v54 }
 0x210   :  { %v6484_v61 = vpop.eup %6483  ;;  %v1047_v41 = vadd.f32 1.0, %v1046_v35  ;;  %6495 = vpow2.f32 %v947_v18  ;;  %v949_v1 = vmul.f32 1.442695, %v7204_v55  ;;  %v951_v36 = vmul.f32 1.442695, %v7208_v9 }
 0x211   :  { %v7220_v13 = vpack.c.bf16 %v9689_v53, %v1183_v27  ;;  %v1018_v40 = vmul.f32 0.6931472, %v6484_v61  ;;  %5728 = vmatprep.subr.bf16.mxu1 %v7214_v50  ;;  %v7227_v51 = vpack.c.bf16 %v1195_v28, %v1191_v63  ;;  %v9606_v26 = vand.u32 4294901760, %v7141_v49 }
 0x212   :  { %v9605_v27 = vand.u32 4294901760, %v7174_v0  ;;  %6497 = vpow2.f32 %v949_v1  ;;  %v9692_v59 = vand.u32 4294901760, %v7125_v38  ;;  %v9693_v11 = vand.u32 4294901760, %v7158_v43 }
 0x213   :  { %9690 = vst [vmem:[#allocation9_spill] sm:$0xff] %v7220_v13  ;;  %9691 = vst [vmem:[#allocation10_spill] sm:$0xff] %v7227_v51  ;;  %v6486_v42 = vpop.eup %6485  ;;  %v1024_v54 = vsel %vm7190_vm4, %v1021_v6, %v1018_v40  ;;  %5730 = vmatpush1.bf16.msra.mxu1 %v7220_v13  ;;  %vm7243_vm9 = vcmp.lt.f32.partialorder %v1040_v56, 0.0004427343  ;;  %v7250_v6 = vsub.f32 %v7141_v49, %v9606_v26  ;;  %6499 = vpow2.f32 %v951_v36 }
 0x214   :  { %v1361_v35 = vsub.f32 %v7125_v38, %v9692_v59  ;;  %v1373_v63 = vsub.f32 %v7158_v43, %v9693_v11  ;;  %v1104_v28 = vsel %vm912_vm2, %v7005_v7, %v1024_v54  ;;  %v1027_v2 = vmul.f32 0.6931472, %v6486_v42 }
 0x215   :  { %v1193_v34 = vand.u32 4294901760, %v1104_v28  ;;  %v1039_v61 = vmul.f32 %v7160_v44, %v1038_v8  ;;  %v1048_v7 = vmul.f32 %v7165_v62, %v1047_v41  ;;  %vm7256_vm10 = vcmp.lt.f32.partialorder %v1049_v12, 0.0004427343 }
 0x216   :  { %v1374_v53 = vand.u32 4294901760, %v1373_v63  ;;  %v6488_v40 = vpop.eup %6487  ;;  %v1033_v1 = vsel %vm7196_vm6, %v1030_v46, %v1027_v2  ;;  %v1362_v42 = vand.u32 4294901760, %v1361_v35  ;;  %v9698_v44 = vand.u32 4294901760, %v7153_v22 }
 0x217   :  { %v6490_v54 = vpop.eup %6489  ;;  %v1105_v59 = vsel %vm913_vm5, %v7016_v32, %v1033_v1  ;;  %v1036_v11 = vmul.f32 0.6931472, %v6488_v40  ;;  %v1367_v31 = vsub.f32 %v7174_v0, %v9605_v27  ;;  %v1356_v41 = vand.u32 4294901760, %v7250_v6 }
 0x218   :  { %v7265_v8 = vpack.c.bf16 %v1193_v34, %v9698_v44  ;;  %v6492_v46 = vpop.eup %6491  ;;  %v1199_v62 = vand.u32 4294901760, %v1105_v59  ;;  %v1045_v12 = vmul.f32 0.6931472, %v6490_v54  ;;  %v7271_v36 = vpack.c.bf16 %v1374_v53, %v1362_v42 }
 0x219   :  { %v6494_v35 = vpop.eup %6493  ;;  %v1042_v32 = vsel %vm7243_vm9, %v1039_v61, %v1036_v11  ;;  %v1052_v63 = vadd.f32 1.0, %v6492_v46  ;;  %v1055_v2 = vmul.f32 -0.5, %v6492_v46  ;;  %v1058_v54 = vand.u32 2147483647, %v6492_v46 }
 0x21a   :  { %9699 = vst [vmem:[#allocation11_spill] sm:$0xff] %v7265_v8  ;;  %5732 = vmatprep.subr.bf16.mxu1 %v7265_v8  ;;  %v7277_v40 = vsub.f32 %v1105_v59, %v1199_v62  ;;  %v7282_v1 = vsel %vm914_vm7, %v7054_v19, %v1042_v32  ;;  %v1051_v6 = vsel %vm7256_vm10, %v1048_v7, %v1045_v12  ;;  %v1061_v53 = vadd.f32 1.0, %v6494_v35  ;;  %v6496_v18 = vpop.eup %6495 }
 0x21b   :  { %5734 = vmatpush1.bf16.msra.mxu1 %v7227_v51  ;;  %v9607_v61 = vand.u32 4294901760, %v7282_v1  ;;  %v1107_v42 = vsel %vm915_vm8, %v7065_v52, %v1051_v6  ;;  %6501 = vlog2.f32 %v1052_v63  ;;  %v1056_v11 = vadd.f32 1.0, %v1055_v2 }
 0x21c   :  { %v1203_v59 = vand.u32 4294901760, %v1107_v42  ;;  %6503 = vlog2.f32 %v1061_v53  ;;  %v9700_v19 = vand.u32 4294901760, %v7168_v39  ;;  %v6498_v7 = vpop.eup %6497  ;;  %v7296_v44 = vsub.f32 %v1104_v28, %v1193_v34 }
 0x21d   :  { %v1064_v12 = vmul.f32 -0.5, %v6494_v35  ;;  %v1067_v32 = vand.u32 2147483647, %v6494_v35  ;;  %v1368_v27 = vand.u32 4294901760, %v1367_v31  ;;  %v1070_v52 = vadd.f32 1.0, %v6496_v18  ;;  %v6500_v6 = vpop.eup %6499 }
 0x21e   :  { %v7294_v56 = vsub.f32 %v7168_v39, %v9700_v19  ;;  %v7299_v30 = vsub.f32 %v1107_v42, %v1203_v59  ;;  %v1073_v63 = vmul.f32 -0.5, %v6496_v18  ;;  %v7304_v2 = vsub.f32 %v7282_v1, %v9607_v61 }
 0x21f   :  { %vm7306_vm11 = vcmp.lt.f32.partialorder %v1058_v54, 0.0004427343  ;;  %v1065_v28 = vadd.f32 1.0, %v1064_v12  ;;  %v1079_v34 = vadd.f32 1.0, %v6498_v7  ;;  %v1082_v19 = vmul.f32 -0.5, %v6498_v7 }
 0x220   :  { %vm916_vm12 = vcmp.gt.f32.partialorder %v7103_v25, 20.0  ;;  %v1057_v31 = vmul.f32 %v6492_v46, %v1056_v11  ;;  %6505 = vlog2.f32 %v1070_v52  ;;  %v1074_v42 = vadd.f32 1.0, %v1073_v63 }
 0x221   :  { %v1076_v26 = vand.u32 2147483647, %v6496_v18  ;;  %vm917_vm13 = vcmp.gt.f32.partialorder %v7108_v47, 20.0  ;;  %vm7312_vm14 = vcmp.lt.f32.partialorder %v1067_v32, 0.0004427343  ;;  %6507 = vlog2.f32 %v1079_v34 }
 0x222   :  { %v1083_v54 = vadd.f32 1.0, %v1082_v19  ;;  %v1085_v61 = vand.u32 2147483647, %v6498_v7  ;;  %v1066_v12 = vmul.f32 %v6494_v35, %v1065_v28  ;;  %v1088_v20 = vadd.f32 1.0, %v6500_v6 }
 0x223   :  { %v1091_v51 = vmul.f32 -0.5, %v6500_v6  ;;  %v1075_v8 = vmul.f32 %v6496_v18, %v1074_v42  ;;  %v1094_v13 = vand.u32 2147483647, %v6500_v6  ;;  %v7317_v46 = vpack.c.bf16 %v1203_v59, %v1199_v62 }
 0x224   :  { %v7319_v11 = vpack.c.bf16 %v1368_v27, %v1356_v41  ;;  %vm7321_vm15 = vcmp.lt.f32.partialorder %v1076_v26, 0.0004427343  ;;  %v1084_v32 = vmul.f32 %v6498_v7, %v1083_v54  ;;  %6509 = vlog2.f32 %v1088_v20 }
 0x225   :  { %v1092_v63 = vadd.f32 1.0, %v1091_v51  ;;  %v9707_v34 = vand.u32 4294901760, %v7182_v5  ;;  %v6502_v35 = vpop.eup %6501  ;;  %vm918_vm0 = vcmp.gt.f32.partialorder %v7111_v45, 20.0  ;;  %vm7329_vm1 = vcmp.lt.f32.partialorder %v1085_v61, 0.0004427343 }
 0x226   :  { %v9619_v27 = vand.u32 4294901760, %v7296_v44  ;;  %v9710_v26 = vand.u32 4294901760, %v7188_v37  ;;  %v9618_v20 = vand.u32 4294901760, %v7304_v2  ;;  %v6504_v51 = vpop.eup %6503  ;;  %v1054_v41 = vmul.f32 0.6931472, %v6502_v35 }
 0x227   :  { %v1379_v19 = vsub.f32 %v7182_v5, %v9707_v34  ;;  %vm919_vm2 = vcmp.gt.f32.partialorder %v7204_v55, 20.0  ;;  %v1093_v59 = vmul.f32 %v6500_v6, %v1092_v63  ;;  %v1386_v7 = vand.u32 4294901760, %v7294_v56 }
 0x228   :  { %v1397_v62 = vsub.f32 %v7188_v37, %v9710_v26  ;;  %v9711_v61 = vand.u32 4294901760, %v7277_v40  ;;  %v1063_v42 = vmul.f32 0.6931472, %v6504_v51  ;;  %v1391_v34 = vsub.f32 %v7296_v44, %v9619_v27 }
 0x229   :  { %v1380_v54 = vand.u32 4294901760, %v1379_v19  ;;  %v1060_v17 = vsel %vm7306_vm11, %v1057_v31, %v1054_v41  ;;  %vm7348_vm4 = vcmp.lt.f32.partialorder %v1094_v13, 0.0004427343  ;;  %v1403_v56 = vsub.f32 %v7304_v2, %v9618_v20 }
 0x22a   :  { %v1409_v28 = vsub.f32 %v7277_v40, %v9711_v61  ;;  %v1398_v26 = vand.u32 4294901760, %v1397_v62  ;;  %v9714_v6 = vand.u32 4294901760, %v7299_v30  ;;  %v1108_v53 = vsel %vm916_vm12, %v7103_v25, %v1060_v17  ;;  %v6506_v51 = vpop.eup %6505 }
 0x22b   :  { %v1069_v13 = vsel %vm7312_vm14, %v1066_v12, %v1063_v42  ;;  %vm920_vm5 = vcmp.gt.f32.partialorder %v7208_v9, 20.0  ;;  %v1392_v31 = vand.u32 4294901760, %v1391_v34  ;;  %v1201_v41 = vand.u32 4294901760, %v1108_v53  ;;  %v6508_v20 = vpop.eup %6507 }
 0x22c   :  { %v1421_v63 = vsub.f32 %v7299_v30, %v9714_v6  ;;  %v7366_v62 = vpack.c.bf16 %v1398_v26, %v1386_v7  ;;  %v1109_v61 = vsel %vm917_vm13, %v7108_v47, %v1069_v13  ;;  %v1410_v6 = vand.u32 4294901760, %v1409_v28 }
 0x22d   :  { %v1207_v27 = vand.u32 4294901760, %v1109_v61  ;;  %v1072_v3 = vmul.f32 0.6931472, %v6506_v51  ;;  %v7371_v17 = vpack.c.bf16 %v1392_v31, %v1380_v54  ;;  %v7375_v22 = vsub.f32 %v1108_v53, %v1201_v41 }
 0x22e   :  { %v1422_v19 = vand.u32 4294901760, %v1421_v63  ;;  %v1081_v12 = vmul.f32 0.6931472, %v6508_v20  ;;  %v9715_v7 = vand.u32 4294901760, %v7282_v1  ;;  %v6510_v63 = vpop.eup %6509  ;;  %v9716_v31 = vand.u32 4294901760, %v7141_v49 }
 0x22f   :  { %v7383_v47 = vsub.f32 %v1109_v61, %v1207_v27  ;;  %v1078_v28 = vsel %vm7321_vm15, %v1075_v8, %v1072_v3  ;;  %v1090_v13 = vmul.f32 0.6931472, %v6510_v63  ;;  %v9717_v51 = vand.u32 4294901760, %v7174_v0 }
 0x230   :  { %v7379_v42 = vpack.c.bf16 %v1201_v41, %v9715_v7  ;;  %v7381_v34 = vpack.c.bf16 %v1422_v19, %v1410_v6  ;;  %v1110_v1 = vsel %vm918_vm0, %v7111_v45, %v1078_v28  ;;  %v1087_v20 = vsel %vm7329_vm1, %v1084_v32, %v1081_v12 }
 0x231   :  { %v1414_v19 = vand.u32 4294901760, %v7375_v22  ;;  %v1432_v8 = vand.u32 4294901760, %v7383_v47  ;;  %v1205_v52 = vand.u32 4294901760, %v1110_v1  ;;  %v1111_v53 = vsel %vm919_vm2, %v7204_v55, %v1087_v20 }
 0x232   :  { %5736 = vmatprep.subr.bf16.mxu1 %v7379_v42  ;;  %v1211_v45 = vand.u32 4294901760, %v1111_v53  ;;  %v7412_v41 = vpack.c.bf16 %v9717_v51, %v9716_v31  ;;  %v1096_v55 = vsel %vm7348_vm4, %v1093_v59, %v1090_v13  ;;  %v1404_v6 = vand.u32 4294901760, %v1403_v56  ;;  %v1134_v56 = vld [vmem:[#allocation3 + $0x60] sm:$0xff] }
 0x233   :  { %5738 = vmatpush1.bf16.msra.mxu1 %v7317_v46  ;;  %v1415_v32 = vsub.f32 %v7375_v22, %v1414_v19  ;;  %v7414_v61 = vsub.f32 %v1110_v1, %v1205_v52  ;;  %v9718_v12 = vand.u32 4294901760, %v7125_v38  ;;  %v9719_v7 = vand.u32 4294901760, %v7158_v43 }
 0x234   :  { %v7424_v63 = vsub.f32 %v1111_v53, %v1211_v45  ;;  %v1112_v20 = vsel %vm920_vm5, %v7208_v9, %v1096_v55  ;;  %v7429_v31 = vpack.c.bf16 %v1211_v45, %v1207_v27  ;;  %v1433_v59 = vsub.f32 %v7383_v47, %v1432_v8 }
 0x235   :  { %v7422_v28 = vpack.c.bf16 %v9719_v7, %v9718_v12  ;;  %v1416_v1 = vand.u32 4294901760, %v1415_v32  ;;  %v1209_v51 = vand.u32 4294901760, %v1112_v20  ;;  %v1426_v35 = vand.u32 4294901760, %v7414_v61 }
 0x236   :  { %v9720_v13 = vand.u32 4294901760, %v7182_v5  ;;  %v9721_v12 = vand.u32 4294901760, %v7296_v44  ;;  %v1444_v53 = vand.u32 4294901760, %v7424_v63  ;;  %v9722_v27 = vand.u32 4294901760, %v7168_v39 }
 0x237   :  { %v5751_v18 = vpack.c.bf16 %v1416_v1, %v1404_v6  ;;  %v9723_v45 = vand.u32 4294901760, %v7188_v37  ;;  %v7448_v55 = vsub.f32 %v1112_v20, %v1209_v51  ;;  %v7450_v3 = vpack.c.bf16 %v1209_v51, %v1205_v52 }
 0x238   :  { %v7437_v7 = vpack.c.bf16 %v9721_v12, %v9720_v13  ;;  %v7454_v13 = vsub.f32 %v7013_v29, %v7030_v57  ;;  %v9725_v12 = vand.u32 4294901760, %v7304_v2  ;;  %v1445_v1 = vsub.f32 %v7424_v63, %v1444_v53 }
 0x239   :  { %v7446_v32 = vpack.c.bf16 %v9723_v45, %v9722_v27  ;;  %v1170_v9 = vsel %vm1156_vm3, %v1134_v56, 0  ;;  %v9727_v26 = vand.u32 4294901760, %v7277_v40  ;;  %v9728_v27 = vand.u32 4294901760, %v7299_v30  ;;  %5740 = vmatprep.subr.bf16.mxu1 %v7450_v3  ;;  %v1135_v45 = vld [vmem:[#allocation3 + $0x68] sm:$0xff] }
 0x23a   :  { %v7458_v6 = vpack.c.bf16 %v1414_v19, %v9725_v12  ;;  %v7468_v52 = vpack.c.bf16 %v1444_v53, %v1432_v8  ;;  %v1268_v29 = vand.u32 4294901760, %v7024_v48  ;;  %v1427_v51 = vsub.f32 %v7414_v61, %v1426_v35  ;;  %5742 = vmatpush1.bf16.msra.mxu1 %v7429_v31 }
 0x23b   :  { %9724 = vst [vmem:[#allocation12_spill] sm:$0xff] %v7446_v32  ;;  %v7466_v20 = vpack.c.bf16 %v9728_v27, %v9727_v26  ;;  %v1438_v19 = vand.u32 4294901760, %v7448_v55  ;;  %v9731_v12 = vand.u32 4294901760, %v7010_v21  ;;  %v7482_v8 = vsub.f32 %v7019_v33, %v7033_v60  ;;  %1214 = vmatprep.subr.mxu1 %v6772_v14  ;;  %v1136_v32 = vld [vmem:[#allocation3 + $0x70] sm:$0xff] }
 0x23c   :  { %9726 = vst [vmem:[#allocation13_spill] sm:$0xff] %v7458_v6  ;;  %9730 = vst [vmem:[#allocation15_spill] sm:$0xff] %v7468_v52  ;;  %v1434_v53 = vand.u32 4294901760, %v1433_v59  ;;  %v1446_v48 = vand.u32 4294901760, %v1445_v1  ;;  %v1288_v27 = vand.u32 4294901760, %v7454_v13  ;;  %v7487_v25 = vand.u32 4294901760, %v1170_v9 }
 0x23d   :  { %9729 = vst [vmem:[#allocation14_spill] sm:$0xff] %v7466_v20  ;;  %v1278_v26 = vsub.f32 %v7010_v21, %v9731_v12  ;;  %v1439_v54 = vsub.f32 %v7448_v55, %v1438_v19  ;;  %v7489_v56 = vpack.c.bf16 %v1438_v19, %v1426_v35  ;;  %v1173_v20 = vsel %vm1156_vm3, %v1135_v45, 0 }
 0x23e   :  { %v5757_v52 = vpack.c.bf16 %v1446_v48, %v1434_v53  ;;  %v1428_v12 = vand.u32 4294901760, %v1427_v51  ;;  %1216 = vmatpush1.msra.mxu1 %v6770_v10  ;;  %v1299_v59 = vand.u32 4294901760, %v7482_v8  ;;  %v1289_v1 = vsub.f32 %v7454_v13, %v1288_v27 }
 0x23f   :  { %v1440_v6 = vand.u32 4294901760, %v1439_v54  ;;  %v1279_v33 = vand.u32 4294901760, %v1278_v26  ;;  %1269 = vmatmul.mubr.f32.vlgmr.msra.gmra.mrb[16].mxu1 %v1268_v29  ;;  %5744 = vmatprep.subr.bf16.mxu1 %v7319_v11  ;;  %v7499_v19 = vsub.f32 %v1170_v9, %v7487_v25  ;;  %v7501_v45 = vand.u32 4294901760, %v1173_v20  ;;  %v1137_v29 = vld [vmem:[#allocation3 + $0x78] sm:$0xff] }
 0x240   :  { %5746 = vmatpush1.bf16.msra.mxu1 %v7271_v36  ;;  %v9732_v54 = vmov 0.0   ;;  %v1176_v51 = vsel %vm1156_vm3, %v1136_v32, 0  ;;  %v1300_v11 = vsub.f32 %v7482_v8, %v1299_v59  ;;  %v1179_v36 = vsel %vm1156_vm3, %v1137_v29, 0 }
 0x241   :  { %v5755_v35 = vpack.c.bf16 %v1440_v6, %v1428_v12  ;;  %1274 = vmatprep.mubr.f32.mxu1 %v9732_v54  ;;  %5748 = vmatprep.subr.bf16.mxu1 %v7371_v17  ;;  %v1290_v6 = vand.u32 4294901760, %v1289_v1  ;;  %v1310_v9 = vand.u32 4294901760, %v7499_v19  ;;  %v7512_v26 = vsub.f32 %v1173_v20, %v7501_v45 }
 0x242   :  { %v7514_v53 = vand.u32 4294901760, %v1176_v51  ;;  %v1301_v17 = vand.u32 4294901760, %v1300_v11  ;;  %v7526_v12 = vand.u32 4294901760, %v1179_v36  ;;  %v9733_v29 = vpack.c.bf16 %v7174_v0, %v7141_v49 }
 0x243   :  { %1280 = vmatmul.mubr.f32.gmra.mrb[18].mxu1 %v1279_v33  ;;  %v1311_v32 = vsub.f32 %v7499_v19, %v1310_v9  ;;  %v1321_v48 = vand.u32 4294901760, %v7512_v26  ;;  %v9734_v49 = vpack.c.bf16 %v7158_v43, %v7125_v38  ;;  %v9735_v0 = vpack.c.bf16 %v7296_v44, %v7182_v5  ;;  %v9741_v5 = vld [vmem:[#allocation8_spill] sm:$0xff] }
 0x244   :  { %5750 = vmatpush1.bf16.msra.mxu1 %v7366_v62  ;;  %1285 = vmatprep.mubr.f32.mxu1 %v9732_v54  ;;  %v7524_v20 = vsub.f32 %v1176_v51, %v7514_v53  ;;  %v7535_v1 = vsub.f32 %v1179_v36, %v7526_v12  ;;  %v9736_v36 = vpack.c.bf16 %v7188_v37, %v7168_v39  ;;  %v9742_v37 = vld [vmem:[#allocation9_spill] sm:$0xff]  ;;  %v9745_v44 = vand.u32 4294901760, %v9741_v5 }
 0x245   :  { %5752 = vmatprep.subr.bf16.mxu1 %v5751_v18  ;;  %v1312_v62 = vand.u32 4294901760, %v1311_v32  ;;  %v1322_v18 = vsub.f32 %v7512_v26, %v1321_v48  ;;  %v9738_v38 = vpack.c.bf16 %v7299_v30, %v7277_v40  ;;  %v9739_v43 = vpack.c.bf16 %v7448_v55, %v7414_v61  ;;  %v9743_v30 = vld [vmem:[#allocation11_spill] sm:$0xff]  ;;  %v9744_v40 = vld [vmem:[#allocation10_spill] sm:$0xff] }
 0x246   :  { %v1332_v33 = vand.u32 4294901760, %v7524_v20  ;;  %v1343_v51 = vand.u32 4294901760, %v7535_v1  ;;  %v9740_v39 = vpack.c.bf16 %v7424_v63, %v7383_v47  ;;  %v9748_v47 = vld [vmem:[#allocation13_spill] sm:$0xff]  ;;  %v9751_v61 = vld [vmem:[#allocation7_spill] sm:$0xff] }
 0x247   :  { %1291 = vmatmul.mubr.f32.gmra.mrb[20].mxu1 %v1290_v6 }
 0x248   :  { %5754 = vmatpush1.bf16.msra.mxu1 %v7381_v34  ;;  %1296 = vmatprep.mubr.f32.mxu1 %v9732_v54  ;;  %v1323_v34 = vand.u32 4294901760, %v1322_v18  ;;  %v1344_v11 = vsub.f32 %v7535_v1, %v1343_v51 }
 0x249   :  { %5756 = vmatprep.subr.bf16.mxu1 %v5755_v35  ;;  %v1333_v35 = vsub.f32 %v7524_v20, %v1332_v33 }
 0x24a   :  { %v1345_v6 = vand.u32 4294901760, %v1344_v11 }
 0x24b   :  { %1302 = vmatmul.mubr.f32.gmra.mrb[22].mxu1 %v1301_v17  ;;  %v9737_v17 = vpack.c.bf16 %v7375_v22, %v7304_v2  ;;  %v9746_v2 = vand.u32 4294901760, %v7010_v21  ;;  %v9747_v22 = vld [vmem:[#allocation12_spill] sm:$0xff] }
 0x24c   :  { %5758 = vmatpush1.bf16.msra.mxu1 %v5757_v52  ;;  %1307 = vmatprep.mubr.f32.mxu1 %v9732_v54  ;;  %v1334_v52 = vand.u32 4294901760, %v1333_v35 }
 0x24d   :  { %1453 = vmatprep.subr.mxu1 %v6794_v24 }
 0x24f   :  { %1313 = vmatmul.mubr.f32.gmra.mrb[24].mxu1 %v1312_v62 }
 0x250   :  { %1459 = vmatpush1.msra.mxu1 %v6792_v23  ;;  %1318 = vmatprep.mubr.f32.mxu1 %v9732_v54 }
 0x251   :  { %5760 = vmatprep.subr.bf16.mxu1 %v9733_v29 }
 0x253   :  { %1324 = vmatmul.mubr.f32.gmra.mrb[26].mxu1 %v1323_v34 }
 0x254   :  { %1329 = vmatprep.mubr.f32.mxu1 %v9732_v54 }
 0x257   :  { %1335 = vmatmul.mubr.f32.gmra.mrb[28].mxu1 %v1334_v52 }
 0x258   :  { %1340 = vmatprep.mubr.f32.mxu1 %v9732_v54 }
 0x25b   :  { %1346 = vmatmul.mubr.f32.gmra.mrb[30].mxu1 %v1345_v6 }
 0x25c   :  { %1506 = vmatprep.mubr.f32.mxu1 %v9732_v54 }
 0x25f   :  { %1508 = vmatmul.mubr.f32.vlgmr.msra.gmra.mrb[16].mxu1 %v6989_v58 }
 0x260   :  { %5762 = vmatpush1.bf16.msra.mxu1 %v9734_v49  ;;  %1513 = vmatprep.mubr.f32.mxu1 %v9732_v54 }
 0x261   :  { %5764 = vmatprep.subr.bf16.mxu1 %v9735_v0 }
 0x263   :  { %1515 = vmatmul.mubr.f32.gmra.mrb[18].mxu1 %v7001_v4 }
 0x264   :  { %5766 = vmatpush1.bf16.msra.mxu1 %v9736_v36  ;;  %1520 = vmatprep.mubr.f32.mxu1 %v9732_v54 }
 0x265   :  { %5768 = vmatprep.subr.bf16.mxu1 %v9737_v17 }
 0x267   :  { %1522 = vmatmul.mubr.f32.gmra.mrb[20].mxu1 %v7030_v57 }
 0x268   :  { %5770 = vmatpush1.bf16.msra.mxu1 %v9738_v38  ;;  %1527 = vmatprep.mubr.f32.mxu1 %v9732_v54 }
 0x269   :  { %5772 = vmatprep.subr.bf16.mxu1 %v9739_v43 }
 0x26b   :  { %1529 = vmatmul.mubr.f32.gmra.mrb[22].mxu1 %v7033_v60 }
 0x26c   :  { %5774 = vmatpush1.bf16.msra.mxu1 %v9740_v39  ;;  %1534 = vmatprep.mubr.f32.mxu1 %v9732_v54 }
 0x26d   :  { %1613 = vmatprep.subr.mxu1 %v6778_v16 }
 0x26f   :  { %1536 = vmatmul.mubr.f32.gmra.mrb[24].mxu1 %v7487_v25 }
 0x270   :  { %1616 = vmatpush1.msra.mxu1 %v6775_v15  ;;  %1541 = vmatprep.mubr.f32.mxu1 %v9732_v54 }
 0x271   :  { %5776 = vmatprep.subr.bf16.mxu1 %v7214_v50 }
 0x273   :  { %1543 = vmatmul.mubr.f32.gmra.mrb[26].mxu1 %v7501_v45 }
 0x274   :  { %1548 = vmatprep.mubr.f32.mxu1 %v9732_v54 }
 0x277   :  { %1550 = vmatmul.mubr.f32.gmra.mrb[28].mxu1 %v7514_v53 }
 0x278   :  { %1555 = vmatprep.mubr.f32.mxu1 %v9732_v54 }
 0x27b   :  { %1557 = vmatmul.mubr.f32.gmra.mrb[30].mxu1 %v7526_v12 }
 0x27c   :  { %1663 = vmatprep.mubr.f32.mxu1 %v9732_v54 }
 0x27f   :  { %1666 = vmatmul.mubr.f32.vlgmr.msra.gmra.mrb[16].mxu1 %v9741_v5 }
 0x280   :  { %5778 = vmatpush1.bf16.msra.mxu1 %v9742_v37  ;;  %1671 = vmatprep.mubr.f32.mxu1 %v9732_v54 }
 0x281   :  { %5780 = vmatprep.subr.bf16.mxu1 %v9743_v30 }
 0x283   :  { %1674 = vmatmul.mubr.f32.gmra.mrb[18].mxu1 %v7010_v21  ;;  %v9750_v21 = vld [vmem:[#allocation15_spill] sm:$0xff] }
 0x284   :  { %5782 = vmatpush1.bf16.msra.mxu1 %v9744_v40  ;;  %1679 = vmatprep.mubr.f32.mxu1 %v9732_v54 }
 0x285   :  { %5784 = vmatprep.subr.bf16.mxu1 %v7379_v42 }
 0x287   :  { %1682 = vmatmul.mubr.f32.gmra.mrb[20].mxu1 %v7454_v13 }
 0x288   :  { %5786 = vmatpush1.bf16.msra.mxu1 %v7317_v46  ;;  %1687 = vmatprep.mubr.f32.mxu1 %v9732_v54 }
 0x289   :  { %5788 = vmatprep.subr.bf16.mxu1 %v7450_v3 }
 0x28b   :  { %1690 = vmatmul.mubr.f32.gmra.mrb[22].mxu1 %v7482_v8  ;;  %v2423_v8 = vld [vmem:[#allocation3 + $0x88] sm:$0xff] }
 0x28c   :  { %5790 = vmatpush1.bf16.msra.mxu1 %v7429_v31  ;;  %1695 = vmatprep.mubr.f32.mxu1 %v9732_v54 }
 0x28d   :  { %1761 = vmatprep.subr.mxu1 %v6772_v14 }
 0x28f   :  { %1698 = vmatmul.mubr.f32.gmra.mrb[24].mxu1 %v7499_v19 }
 0x290   :  { %1763 = vmatpush1.msra.mxu1 %v6770_v10  ;;  %1703 = vmatprep.mubr.f32.mxu1 %v9732_v54 }
 0x291   :  { %5792 = vmatprep.subr.bf16.mxu1 %v7412_v41  ;;  %v9749_v41 = vld [vmem:[#allocation14_spill] sm:$0xff] }
 0x293   :  { %1706 = vmatmul.mubr.f32.gmra.mrb[26].mxu1 %v7512_v26 }
 0x294   :  { %1711 = vmatprep.mubr.f32.mxu1 %v9732_v54 }
 0x297   :  { %1714 = vmatmul.mubr.f32.gmra.mrb[28].mxu1 %v7524_v20  ;;  %v2424_v20 = vld [vmem:[#allocation3 + $0x90] sm:$0xff] }
 0x298   :  { %1719 = vmatprep.mubr.f32.mxu1 %v9732_v54  ;;  %v7732_v11 = vsel %vm1156_vm3, %v2424_v20, 0 }
 0x29b   :  { %1722 = vmatmul.mubr.f32.gmra.mrb[30].mxu1 %v7535_v1 }
 0x29c   :  { %1810 = vmatprep.mubr.f32.mxu1 %v9732_v54 }
 0x29f   :  { %1814 = vmatmul.mubr.f32.vlgmr.msra.gmra.mrb[16].mxu1 %v9745_v44 }
 0x2a0   :  { %5794 = vmatpush1.bf16.msra.mxu1 %v7422_v28  ;;  %1819 = vmatprep.mubr.f32.mxu1 %v9732_v54  ;;  %v9752_v28 = vld [vmem:[#allocation6_spill] sm:$0xff] }
 0x2a1   :  { %5796 = vmatprep.subr.bf16.mxu1 %v7437_v7 }
 0x2a3   :  { %1823 = vmatmul.mubr.f32.gmra.mrb[18].mxu1 %v9746_v2 }
 0x2a4   :  { %5798 = vmatpush1.bf16.msra.mxu1 %v9747_v22  ;;  %1828 = vmatprep.mubr.f32.mxu1 %v9732_v54 }
 0x2a5   :  { %5800 = vmatprep.subr.bf16.mxu1 %v9748_v47 }
 0x2a7   :  { %1832 = vmatmul.mubr.f32.gmra.mrb[20].mxu1 %v1288_v27 }
 0x2a8   :  { %5802 = vmatpush1.bf16.msra.mxu1 %v9749_v41  ;;  %1837 = vmatprep.mubr.f32.mxu1 %v9732_v54 }
 0x2a9   :  { %5804 = vmatprep.subr.bf16.mxu1 %v7489_v56 }
 0x2ab   :  { %1841 = vmatmul.mubr.f32.gmra.mrb[22].mxu1 %v1299_v59 }
 0x2ac   :  { %5806 = vmatpush1.bf16.msra.mxu1 %v9750_v21  ;;  %1846 = vmatprep.mubr.f32.mxu1 %v9732_v54 }
 0x2ad   :  { %1950 = vmatprep.subr.mxu1 %v9751_v61 }
 0x2af   :  { %1850 = vmatmul.mubr.f32.gmra.mrb[24].mxu1 %v1310_v9 }
 0x2b0   :  { %1954 = vmatpush1.msra.mxu1 %v9752_v28  ;;  %1855 = vmatprep.mubr.f32.mxu1 %v9732_v54 }
 0x2b1   :  { %5808 = vmatprep.subr.bf16.mxu1 %v7214_v50 }
 0x2b3   :  { %1859 = vmatmul.mubr.f32.gmra.mrb[26].mxu1 %v1321_v48 }
 0x2b4   :  { %1864 = vmatprep.mubr.f32.mxu1 %v9732_v54 }
 0x2b7   :  { %1868 = vmatmul.mubr.f32.gmra.mrb[28].mxu1 %v1332_v33 }
 0x2b8   :  { %1873 = vmatprep.mubr.f32.mxu1 %v9732_v54 }
 0x2bb   :  { %1877 = vmatmul.mubr.f32.gmra.mrb[30].mxu1 %v1343_v51 }
 0x2bc   :  { %2001 = vmatprep.mubr.f32.mxu1 %v9732_v54 }
 0x2bf   :  { %2003 = vmatmul.mubr.f32.vlgmr.msra.gmra.mrb[16].mxu1 %v6989_v58 }
 0x2c0   :  { %5810 = vmatpush1.bf16.msra.mxu1 %v9742_v37  ;;  %2008 = vmatprep.mubr.f32.mxu1 %v9732_v54 }
 0x2c1   :  { %5812 = vmatprep.subr.bf16.mxu1 %v9743_v30 }
 0x2c3   :  { %2010 = vmatmul.mubr.f32.gmra.mrb[18].mxu1 %v7001_v4 }
 0x2c4   :  { %5814 = vmatpush1.bf16.msra.mxu1 %v9744_v40  ;;  %2015 = vmatprep.mubr.f32.mxu1 %v9732_v54  ;;  %v7745_v40 = vand.u32 4294901760, %v7732_v11 }
 0x2c5   :  { %5816 = vmatprep.subr.bf16.mxu1 %v7379_v42  ;;  %v2422_v42 = vld [vmem:[#allocation3 + $0x80] sm:$0xff] }
 0x2c7   :  { %2017 = vmatmul.mubr.f32.gmra.mrb[20].mxu1 %v7030_v57 }
 0x2c8   :  { %5818 = vmatpush1.bf16.msra.mxu1 %v7317_v46  ;;  %2022 = vmatprep.mubr.f32.mxu1 %v9732_v54 }
 0x2c9   :  { %5820 = vmatprep.subr.bf16.mxu1 %v7450_v3 }
 0x2cb   :  { %2024 = vmatmul.mubr.f32.gmra.mrb[22].mxu1 %v7033_v60 }
 0x2cc   :  { %5822 = vmatpush1.bf16.msra.mxu1 %v7429_v31  ;;  %2029 = vmatprep.mubr.f32.mxu1 %v9732_v54  ;;  %v2449_v31 = vsel %vm1156_vm3, %v2422_v42, 0 }
 0x2cd   :  { %2091 = vmatprep.subr.mxu1 %v6772_v14  ;;  %v7714_v56 = vand.u32 4294901760, %v2449_v31 }
 0x2cf   :  { %2031 = vmatmul.mubr.f32.gmra.mrb[24].mxu1 %v7487_v25  ;;  %v7723_v48 = vsub.f32 %v2449_v31, %v7714_v56 }
 0x2d0   :  { %2036 = vmatprep.mubr.f32.mxu1 %v9732_v54  ;;  %2093 = vmatpush1.msra.mxu1 %v6770_v10 }
 0x2d3   :  { %2038 = vmatmul.mubr.f32.gmra.mrb[26].mxu1 %v7501_v45 }
 0x2d4   :  { %2043 = vmatprep.mubr.f32.mxu1 %v9732_v54 }
 0x2d7   :  { %2045 = vmatmul.mubr.f32.gmra.mrb[28].mxu1 %v7514_v53 }
 0x2d8   :  { %2050 = vmatprep.mubr.f32.mxu1 %v9732_v54 }
 0x2db   :  { %2052 = vmatmul.mubr.f32.gmra.mrb[30].mxu1 %v7526_v12 }
 0x2dc   :  { %2140 = vmatprep.mubr.f32.mxu1 %v9732_v54 }
 0x2df   :  { %2142 = vmatmul.mubr.f32.vlgmr.msra.gmra.mrb[16].mxu1 %v6989_v58 }
 0x2e0   :  { %2147 = vmatprep.mubr.f32.mxu1 %v9732_v54 }
 0x2e3   :  { %2149 = vmatmul.mubr.f32.gmra.mrb[18].mxu1 %v7001_v4 }
 0x2e4   :  { %2154 = vmatprep.mubr.f32.mxu1 %v9732_v54 }
 0x2e7   :  { %2156 = vmatmul.mubr.f32.gmra.mrb[20].mxu1 %v7030_v57 }
 0x2e8   :  { %2161 = vmatprep.mubr.f32.mxu1 %v9732_v54 }
 0x2eb   :  { %2163 = vmatmul.mubr.f32.gmra.mrb[22].mxu1 %v7033_v60 }
 0x2ec   :  { %2168 = vmatprep.mubr.f32.mxu1 %v9732_v54 }
 0x2ef   :  { %2170 = vmatmul.mubr.f32.gmra.mrb[24].mxu1 %v7487_v25 }
 0x2f0   :  { %2175 = vmatprep.mubr.f32.mxu1 %v9732_v54 }
 0x2f3   :  { %2177 = vmatmul.mubr.f32.gmra.mrb[26].mxu1 %v7501_v45 }
 0x2f4   :  { %2182 = vmatprep.mubr.f32.mxu1 %v9732_v54 }
 0x2f7   :  { %2184 = vmatmul.mubr.f32.gmra.mrb[28].mxu1 %v7514_v53  ;;  %v2452_v53 = vsel %vm1156_vm3, %v2423_v8, 0 }
 0x2f8   :  { %2189 = vmatprep.mubr.f32.mxu1 %v9732_v54  ;;  %v7729_v34 = vand.u32 4294901760, %v2452_v53 }
 0x2fa   :  { %v7742_v30 = vsub.f32 %v2452_v53, %v7729_v34 }
 0x2fb   :  { %2191 = vmatmul.mubr.f32.gmra.mrb[30].mxu1 %v7526_v12 }
 0x2fc   :  { %3845 = vmatprep.mubr.f32.mxu1 %v9732_v54 }
 0x3b2   :  { %v7695_v58 = vpop.f32.mrb[16].mxu1 }
 0x3b3   :  { %v2213_v4 = vmul.f32 1.442695, %v7695_v58  ;;  %v7698_v57 = vpop.f32.mrb[17].mxu1  ;;  %vm2197_vm7 = vcmp.gt.f32.partialorder %v7695_v58, 20.0 }
 0x3b4   :  { %v2215_v60 = vmul.f32 1.442695, %v7698_v57  ;;  %vm2198_vm9 = vcmp.gt.f32.partialorder %v7698_v57, 20.0 }
 0x3b5   :  { %6511 = vpow2.f32 %v2213_v4 }
 0x3b6   :  { %6513 = vpow2.f32 %v2215_v60  ;;  %v7701_v50 = vpop.f32.mrb[18].mxu1 }
 0x3b7   :  { %v2217_v46 = vmul.f32 1.442695, %v7701_v50  ;;  %v7704_v25 = vpop.f32.mrb[19].mxu1  ;;  %vm2199_vm11 = vcmp.gt.f32.partialorder %v7701_v50, 20.0 }
 0x3b8   :  { %v2219_v3 = vmul.f32 1.442695, %v7704_v25  ;;  %vm2200_vm13 = vcmp.gt.f32.partialorder %v7704_v25, 20.0 }
 0x3b9   :  { %6515 = vpow2.f32 %v2217_v46 }
 0x3ba   :  { %6517 = vpow2.f32 %v2219_v3  ;;  %v7707_v63 = vpop.f32.mrb[20].mxu1 }
 0x3bb   :  { %v2221_v7 = vmul.f32 1.442695, %v7707_v63  ;;  %v7711_v55 = vpop.f32.mrb[21].mxu1  ;;  %vm2201_vm14 = vcmp.gt.f32.partialorder %v7707_v63, 20.0 }
 0x3bc   :  { %v2223_v13 = vmul.f32 1.442695, %v7711_v55  ;;  %vm2202_vm0 = vcmp.gt.f32.partialorder %v7711_v55, 20.0 }
 0x3bd   :  { %6519 = vpow2.f32 %v2221_v7 }
 0x3be   :  { %6521 = vpow2.f32 %v2223_v13  ;;  %v7716_v27 = vpop.f32.mrb[22].mxu1 }
 0x3bf   :  { %v6512_v59 = vpop.eup %6511  ;;  %v2225_v19 = vmul.f32 1.442695, %v7716_v27  ;;  %v7719_v45 = vpop.f32.mrb[23].mxu1  ;;  %vm2203_vm2 = vcmp.gt.f32.partialorder %v7716_v27, 20.0 }
 0x3c0   :  { %v6514_v9 = vpop.eup %6513  ;;  %v2245_v26 = vadd.f32 1.0, %v6512_v59  ;;  %v2248_v12 = vmul.f32 -0.5, %v6512_v59  ;;  %v2251_v51 = vand.u32 2147483647, %v6512_v59  ;;  %v2227_v60 = vmul.f32 1.442695, %v7719_v45 }
 0x3c1   :  { %v2254_v32 = vadd.f32 1.0, %v6514_v9  ;;  %6523 = vpow2.f32 %v2225_v19  ;;  %v2257_v62 = vmul.f32 -0.5, %v6514_v9  ;;  %v2260_v6 = vand.u32 2147483647, %v6514_v9 }
 0x3c2   :  { %6525 = vlog2.f32 %v2245_v26  ;;  %v7725_v18 = vpop.f32.mrb[24].mxu1  ;;  %v2249_v36 = vadd.f32 1.0, %v2248_v12  ;;  %vm7749_vm6 = vcmp.lt.f32.partialorder %v2251_v51, 0.0004427343  ;;  %vm2204_vm5 = vcmp.gt.f32.partialorder %v7719_v45, 20.0 }
 0x3c3   :  { %v6516_v33 = vpop.eup %6515  ;;  %6527 = vlog2.f32 %v2254_v32  ;;  %v7727_v1 = vpop.f32.mrb[25].mxu1  ;;  %v2258_v17 = vadd.f32 1.0, %v2257_v62  ;;  %vm7755_vm8 = vcmp.lt.f32.partialorder %v2260_v6, 0.0004427343 }
 0x3c4   :  { %v6518_v35 = vpop.eup %6517  ;;  %v2263_v29 = vadd.f32 1.0, %v6516_v33  ;;  %v2266_v52 = vmul.f32 -0.5, %v6516_v33  ;;  %v2269_v38 = vand.u32 2147483647, %v6516_v33  ;;  %v2250_v46 = vmul.f32 %v6512_v59, %v2249_v36 }
 0x3c5   :  { %v2272_v49 = vadd.f32 1.0, %v6518_v35  ;;  %v2275_v5 = vmul.f32 -0.5, %v6518_v35  ;;  %v2278_v47 = vand.u32 2147483647, %v6518_v35  ;;  %v2259_v42 = vmul.f32 %v6514_v9, %v2258_v17 }
 0x3c6   :  { %6529 = vlog2.f32 %v2263_v29  ;;  %v7735_v43 = vpop.f32.mrb[26].mxu1  ;;  %v2267_v22 = vadd.f32 1.0, %v2266_v52  ;;  %vm7762_vm10 = vcmp.lt.f32.partialorder %v2269_v38, 0.0004427343  ;;  %v2229_v59 = vmul.f32 1.442695, %v7725_v18 }
 0x3c7   :  { %v7737_v39 = vpop.eup %6519  ;;  %6531 = vlog2.f32 %v2272_v49  ;;  %v7739_v37 = vpop.f32.mrb[27].mxu1  ;;  %v2276_v13 = vadd.f32 1.0, %v2275_v5  ;;  %vm7775_vm12 = vcmp.lt.f32.partialorder %v2278_v47, 0.0004427343  ;;  %v2231_v29 = vmul.f32 1.442695, %v7727_v1 }
 0x3c8   :  { %v7747_v44 = vpop.eup %6521  ;;  %v2281_v41 = vadd.f32 1.0, %v7737_v39  ;;  %v2284_v8 = vmul.f32 -0.5, %v7737_v39  ;;  %v2268_v26 = vmul.f32 %v6516_v33, %v2267_v22  ;;  %v2287_v32 = vand.u32 2147483647, %v7737_v39 }
 0x3c9   :  { %v2290_v4 = vadd.f32 1.0, %v7747_v44  ;;  %v2293_v51 = vmul.f32 -0.5, %v7747_v44  ;;  %v2296_v33 = vand.u32 2147483647, %v7747_v44  ;;  %v2277_v17 = vmul.f32 %v6518_v35, %v2276_v13 }
 0x3ca   :  { %6533 = vlog2.f32 %v2281_v41  ;;  %v7766_v31 = vpop.f32.mrb[28].mxu1  ;;  %v2285_v38 = vadd.f32 1.0, %v2284_v8  ;;  %vm7798_vm15 = vcmp.lt.f32.partialorder %v2287_v32, 0.0004427343  ;;  %v2233_v35 = vmul.f32 1.442695, %v7735_v43 }
 0x3cb   :  { %v7768_v7 = vpop.eup %6523  ;;  %6535 = vlog2.f32 %v2290_v4  ;;  %v7773_v19 = vpop.f32.mrb[29].mxu1  ;;  %v2235_v13 = vmul.f32 1.442695, %v7739_v37  ;;  %vm7805_vm1 = vcmp.lt.f32.partialorder %v2296_v33, 0.0004427343 }
 0x3cc   :  { %v6526_v9 = vpop.eup %6525  ;;  %v2299_v20 = vadd.f32 1.0, %v7768_v7  ;;  %6537 = vpow2.f32 %v2227_v60  ;;  %v2302_v6 = vmul.f32 -0.5, %v7768_v7  ;;  %v2286_v32 = vmul.f32 %v7737_v39, %v2285_v38 }
 0x3cd   :  { %v6528_v12 = vpop.eup %6527  ;;  %v2247_v62 = vmul.f32 0.6931472, %v6526_v9 }
 0x3ce   :  { %v2256_v52 = vmul.f32 0.6931472, %v6528_v12  ;;  %6539 = vlog2.f32 %v2299_v20  ;;  %v7786_v49 = vpop.f32.mrb[30].mxu1  ;;  %v2303_v21 = vadd.f32 1.0, %v2302_v6  ;;  %v2237_v20 = vmul.f32 1.442695, %v7766_v31 }
 0x3cf   :  { %v2253_v36 = vsel %vm7749_vm6, %v2250_v46, %v2247_v62  ;;  %6541 = vpow2.f32 %v2229_v59  ;;  %v7791_v5 = vpop.f32.mrb[31].mxu1  ;;  %v2294_v59 = vadd.f32 1.0, %v2293_v51 }
 0x3d0   :  { %v6530_v22 = vpop.eup %6529  ;;  %v2389_v47 = vsel %vm2197_vm7, %v7695_v58, %v2253_v36  ;;  %v2262_v41 = vsel %vm7755_vm8, %v2259_v42, %v2256_v52  ;;  %6543 = vpow2.f32 %v2231_v29  ;;  %v2304_v36 = vmul.f32 %v7768_v7, %v2303_v21 }
 0x3d1   :  { %v6532_v2 = vpop.eup %6531  ;;  %v2474_v60 = vand.u32 4294901760, %v2389_v47  ;;  %v2265_v46 = vmul.f32 0.6931472, %v6530_v22  ;;  %v7812_v42 = vsel %vm2198_vm9, %v7698_v57, %v2262_v41  ;;  %v2305_v57 = vand.u32 2147483647, %v7768_v7 }
 0x3d2   :  { %v2274_v8 = vmul.f32 0.6931472, %v6532_v2  ;;  %6545 = vpow2.f32 %v2233_v35  ;;  %v9626_v52 = vand.u32 4294901760, %v7812_v42  ;;  %v2295_v6 = vmul.f32 %v7747_v44, %v2294_v59 }
 0x3d3   :  { %v2271_v9 = vsel %vm7762_vm10, %v2268_v26, %v2265_v46  ;;  %v7825_v3 = vsub.f32 %v2389_v47, %v2474_v60  ;;  %6547 = vpow2.f32 %v2235_v13  ;;  %vm2306_vm4 = vcmp.lt.f32.partialorder %v2305_v57, 0.0004427343 }
 0x3d4   :  { %v6534_v12 = vpop.eup %6533  ;;  %v2391_v62 = vsel %vm2199_vm11, %v7701_v50, %v2271_v9  ;;  %v2280_v51 = vsel %vm7775_vm12, %v2277_v17, %v2274_v8  ;;  %6549 = vpow2.f32 %v2237_v20  ;;  %v7855_v46 = vsub.f32 %v7812_v42, %v9626_v52 }
 0x3d5   :  { %v6536_v29 = vpop.eup %6535  ;;  %v2478_v26 = vand.u32 4294901760, %v2391_v62  ;;  %v2283_v39 = vmul.f32 0.6931472, %v6534_v12  ;;  %v7835_v53 = vsel %vm2200_vm13, %v7704_v25, %v2280_v51  ;;  %v9623_v2 = vand.u32 4294901760, %v7825_v3 }
 0x3d6   :  { %v2292_v33 = vmul.f32 0.6931472, %v6536_v29  ;;  %v6538_v50 = vpop.eup %6537  ;;  %v9625_v8 = vand.u32 4294901760, %v7835_v53  ;;  %v2239_v20 = vmul.f32 1.442695, %v7773_v19  ;;  %vm2205_vm7 = vcmp.gt.f32.partialorder %v7725_v18, 20.0 }
 0x3d7   :  { %v7830_v38 = vpack.c.bf16 %v2478_v26, %v2474_v60  ;;  %v2289_v17 = vsel %vm7798_vm15, %v2286_v32, %v2283_v39  ;;  %v7839_v47 = vsub.f32 %v2391_v62, %v2478_v26  ;;  %v2308_v41 = vadd.f32 1.0, %v6538_v50 }
 0x3d8   :  { %v6540_v22 = vpop.eup %6539  ;;  %v2393_v44 = vsel %vm2201_vm14, %v7707_v63, %v2289_v17  ;;  %v2298_v7 = vsel %vm7805_vm1, %v2295_v6, %v2292_v33  ;;  %v2311_v63 = vmul.f32 -0.5, %v6538_v50  ;;  %v7869_v12 = vsub.f32 %v7825_v3, %v9623_v2 }
 0x3d9   :  { %v6542_v35 = vpop.eup %6541  ;;  %v2482_v25 = vand.u32 4294901760, %v2393_v44  ;;  %v7850_v4 = vsel %vm2202_vm0, %v7711_v55, %v2298_v7  ;;  %v2301_v60 = vmul.f32 0.6931472, %v6540_v22  ;;  %6551 = vlog2.f32 %v2308_v41 }
 0x3da   :  { %v6544_v13 = vpop.eup %6543  ;;  %v2317_v21 = vadd.f32 1.0, %v6542_v35  ;;  %v9622_v9 = vand.u32 4294901760, %v7839_v47  ;;  %v9624_v55 = vand.u32 4294901760, %v7850_v4  ;;  %v2320_v51 = vmul.f32 -0.5, %v6542_v35 }
 0x3db   :  { %v7858_v59 = vsub.f32 %v2393_v44, %v2482_v25  ;;  %v2307_v58 = vsel %vm2306_vm4, %v2304_v36, %v2301_v60  ;;  %v2312_v29 = vadd.f32 1.0, %v2311_v63  ;;  %v2314_v26 = vand.u32 2147483647, %v6538_v50 }
 0x3dc   :  { %v2395_v32 = vsel %vm2203_vm2, %v7716_v27, %v2307_v58  ;;  %6553 = vlog2.f32 %v2317_v21  ;;  %v7871_v57 = vpop.eup %6545  ;;  %v2326_v39 = vadd.f32 1.0, %v6544_v13  ;;  %v2329_v33 = vmul.f32 -0.5, %v6544_v13 }
 0x3dd   :  { %v2486_v62 = vand.u32 4294901760, %v2395_v32  ;;  %v7873_v6 = vpop.eup %6547  ;;  %v7878_v27 = vsub.f32 %v7835_v53, %v9625_v8  ;;  %v9627_v36 = vand.u32 4294901760, %v7858_v59  ;;  %v7889_v44 = vsub.f32 %v7839_v47, %v9622_v9 }
 0x3de   :  { %v7894_v7 = vsub.f32 %v7850_v4, %v9624_v55  ;;  %v2323_v41 = vand.u32 2147483647, %v6542_v35  ;;  %6555 = vlog2.f32 %v2326_v39  ;;  %v7896_v60 = vpop.eup %6549  ;;  %v2330_v63 = vadd.f32 1.0, %v2329_v33 }
 0x3df   :  { %v7881_v17 = vpack.c.bf16 %v2486_v62, %v2482_v25  ;;  %v7883_v22 = vsub.f32 %v2395_v32, %v2486_v62  ;;  %v2321_v25 = vadd.f32 1.0, %v2320_v51  ;;  %v2332_v58 = vand.u32 2147483647, %v6544_v13 }
 0x3e0   :  { %v2335_v21 = vadd.f32 1.0, %v7871_v57  ;;  %v2313_v62 = vmul.f32 %v6538_v50, %v2312_v29  ;;  %vm7900_vm6 = vcmp.lt.f32.partialorder %v2314_v26, 0.0004427343  ;;  %v2344_v9 = vadd.f32 1.0, %v7873_v6 }
 0x3e1   :  { %9765 = vst [vmem:[#allocation8_spill] sm:$0xff] %v7881_v17  ;;  %v9628_v32 = vand.u32 4294901760, %v7883_v22  ;;  %v7909_v39 = vsub.f32 %v7858_v59, %v9627_v36  ;;  %v2338_v51 = vmul.f32 -0.5, %v7871_v57  ;;  %v2341_v33 = vand.u32 2147483647, %v7871_v57 }
 0x3e2   :  { %6557 = vlog2.f32 %v2335_v21  ;;  %vm7913_vm8 = vcmp.lt.f32.partialorder %v2323_v41, 0.0004427343  ;;  %v2347_v29 = vmul.f32 -0.5, %v7873_v6  ;;  %v2353_v26 = vadd.f32 1.0, %v7896_v60 }
 0x3e3   :  { %v6552_v2 = vpop.eup %6551  ;;  %6559 = vlog2.f32 %v2344_v9  ;;  %v2322_v8 = vmul.f32 %v6542_v35, %v2321_v25  ;;  %v2331_v52 = vmul.f32 %v6544_v13, %v2330_v63  ;;  %vm7919_vm9 = vcmp.lt.f32.partialorder %v2332_v58, 0.0004427343 }
 0x3e4   :  { %v2310_v55 = vmul.f32 0.6931472, %v6552_v2  ;;  %v7926_v21 = vsub.f32 %v7883_v22, %v9628_v32  ;;  %vm2206_vm10 = vcmp.gt.f32.partialorder %v7727_v1, 20.0  ;;  %6561 = vlog2.f32 %v2353_v26 }
 0x3e5   :  { %v2356_v9 = vmul.f32 -0.5, %v7896_v60  ;;  %v2241_v41 = vmul.f32 1.442695, %v7786_v49  ;;  %v2339_v2 = vadd.f32 1.0, %v2338_v51  ;;  %vm7933_vm11 = vcmp.lt.f32.partialorder %v2341_v33, 0.0004427343 }
 0x3e6   :  { %v6554_v28 = vpop.eup %6553  ;;  %v2316_v35 = vsel %vm7900_vm6, %v2313_v62, %v2310_v55  ;;  %6563 = vpow2.f32 %v2239_v20  ;;  %vm2207_vm12 = vcmp.gt.f32.partialorder %v7735_v43, 20.0  ;;  %v2348_v58 = vadd.f32 1.0, %v2347_v29 }
 0x3e7   :  { %v2396_v25 = vsel %vm2204_vm5, %v7719_v45, %v2316_v35  ;;  %v2319_v63 = vmul.f32 0.6931472, %v6554_v28  ;;  %v2350_v26 = vand.u32 2147483647, %v7873_v6  ;;  %vm2208_vm13 = vcmp.gt.f32.partialorder %v7739_v37, 20.0 }
 0x3e8   :  { %v2484_v32 = vand.u32 4294901760, %v2396_v25  ;;  %v2359_v0 = vand.u32 2147483647, %v7896_v60  ;;  %6565 = vpow2.f32 %v2241_v41  ;;  %v2243_v55 = vmul.f32 1.442695, %v7791_v5  ;;  %v6556_v62 = vpop.eup %6555 }
 0x3e9   :  { %v2325_v20 = vsel %vm7913_vm8, %v2322_v8, %v2319_v63  ;;  %v2357_v51 = vadd.f32 1.0, %v2356_v9  ;;  %v9774_v28 = vand.u32 4294901760, %v7812_v42  ;;  %v9775_v45 = vand.u32 4294901760, %v7835_v53 }
 0x3ea   :  { %v9633_v29 = vand.u32 4294901760, %v7855_v46  ;;  %v2397_v35 = vsel %vm2205_vm7, %v7725_v18, %v2325_v20  ;;  %v2328_v41 = vmul.f32 0.6931472, %v6556_v62  ;;  %v2340_v61 = vmul.f32 %v7871_v57, %v2339_v2 }
 0x3eb   :  { %v7951_v33 = vpack.c.bf16 %v9775_v45, %v9774_v28  ;;  %vm2209_vm14 = vcmp.gt.f32.partialorder %v7766_v31, 20.0  ;;  %6567 = vpow2.f32 %v2243_v55  ;;  %v2490_v8 = vand.u32 4294901760, %v2397_v35 }
 0x3ec   :  { %vm7959_vm15 = vcmp.lt.f32.partialorder %v2350_v26, 0.0004427343  ;;  %v9778_v42 = vand.u32 4294901760, %v7850_v4  ;;  %v9632_v9 = vand.u32 4294901760, %v7878_v27  ;;  %v6558_v18 = vpop.eup %6557  ;;  %v2334_v57 = vsel %vm7919_vm9, %v2331_v52, %v2328_v41 }
 0x3ed   :  { %5824 = vmatprep.subr.bf16.mxu0 %v7951_v33  ;;  %v7975_v2 = vsub.f32 %v7855_v46, %v9633_v29  ;;  %v2653_v63 = vand.u32 4294901760, %v7869_v12  ;;  %v2665_v26 = vand.u32 4294901760, %v7889_v44  ;;  %v6560_v4 = vpop.eup %6559  ;;  %v2337_v55 = vmul.f32 0.6931472, %v6558_v18 }
 0x3ee   :  { %v7966_v53 = vpack.c.bf16 %v2484_v32, %v9778_v42  ;;  %5826 = vmatpush1.bf16.msra.mxu0 %v7830_v38  ;;  %v2349_v62 = vmul.f32 %v7873_v6, %v2348_v58  ;;  %v2358_v20 = vmul.f32 %v7896_v60, %v2357_v51  ;;  %vm7981_vm0 = vcmp.lt.f32.partialorder %v2359_v0, 0.0004427343  ;;  %v6562_v45 = vpop.eup %6561 }
 0x3ef   :  { %v7986_v52 = vsub.f32 %v2397_v35, %v2490_v8  ;;  %v2398_v12 = vsel %vm2206_vm10, %v7727_v1, %v2334_v57  ;;  %v2346_v28 = vmul.f32 0.6931472, %v6560_v4  ;;  %v7991_v44 = vpack.c.bf16 %v2665_v26, %v2653_v63 }
 0x3f0   :  { %5828 = vmatprep.subr.bf16.mxu0 %v7966_v53  ;;  %v7993_v41 = vsub.f32 %v2396_v25, %v2484_v32  ;;  %v2343_v6 = vsel %vm7933_vm11, %v2340_v61, %v2337_v55  ;;  %v2658_v60 = vsub.f32 %v7878_v27, %v9632_v9  ;;  %v9631_v58 = vand.u32 4294901760, %v7894_v7  ;;  %v6564_v0 = vpop.eup %6563 }
 0x3f1   :  { %v2399_v1 = vsel %vm2207_vm12, %v7735_v43, %v2343_v6  ;;  %v2352_v51 = vsel %vm7959_vm15, %v2349_v62, %v2346_v28  ;;  %v2355_v35 = vmul.f32 0.6931472, %v6562_v45  ;;  %v2647_v32 = vand.u32 4294901760, %v7975_v2 }
 0x3f2   :  { %5830 = vmatpush1.bf16.msra.mxu0 %v7881_v17  ;;  %v2488_v61 = vand.u32 4294901760, %v2398_v12  ;;  %v2494_v13 = vand.u32 4294901760, %v2399_v1  ;;  %v2400_v25 = vsel %vm2208_vm13, %v7739_v37, %v2352_v51  ;;  %v2362_v42 = vadd.f32 1.0, %v6564_v0  ;;  %v8011_v18 = vpop.eup %6565 }
 0x3f3   :  { %v9629_v57 = vand.u32 4294901760, %v7986_v52  ;;  %v2492_v43 = vand.u32 4294901760, %v2400_v25  ;;  %v2361_v50 = vsel %vm7981_vm0, %v2358_v20, %v2355_v35  ;;  %v2365_v63 = vmul.f32 -0.5, %v6564_v0 }
 0x3f4   :  { %v8016_v26 = vpack.c.bf16 %v2494_v13, %v2490_v8  ;;  %v8018_v4 = vsub.f32 %v2399_v1, %v2494_v13  ;;  %v8023_v2 = vsel %vm2209_vm14, %v7766_v31, %v2361_v50  ;;  %6569 = vlog2.f32 %v2362_v42 }
 0x3f5   :  { %v8025_v37 = vpop.eup %6567  ;;  %v9634_v55 = vand.u32 4294901760, %v8023_v2  ;;  %v2368_v62 = vand.u32 2147483647, %v6564_v0  ;;  %v2659_v28 = vand.u32 4294901760, %v2658_v60  ;;  %v2670_v20 = vsub.f32 %v7894_v7, %v9631_v58 }
 0x3f6   :  { %v9630_v8 = vand.u32 4294901760, %v8018_v4  ;;  %v2366_v36 = vadd.f32 1.0, %v2365_v63  ;;  %v2371_v45 = vadd.f32 1.0, %v8011_v18  ;;  %v2374_v6 = vmul.f32 -0.5, %v8011_v18 }
 0x3f7   :  { %v8034_v31 = vsub.f32 %v2398_v12, %v2488_v61  ;;  %v2380_v1 = vadd.f32 1.0, %v8025_v37  ;;  %v2383_v51 = vmul.f32 -0.5, %v8025_v37  ;;  %v2681_v35 = vand.u32 4294901760, %v7993_v41 }
 0x3f8   :  { %v2700_v60 = vsub.f32 %v7986_v52, %v9629_v57  ;;  %v8042_v13 = vsub.f32 %v2400_v25, %v2492_v43  ;;  %6571 = vlog2.f32 %v2371_v45  ;;  %v2375_v42 = vadd.f32 1.0, %v2374_v6 }
 0x3f9   :  { %v2712_v50 = vsub.f32 %v8018_v4, %v9630_v8  ;;  %vm2210_vm1 = vcmp.gt.f32.partialorder %v7773_v19, 20.0  ;;  %vm8048_vm2 = vcmp.lt.f32.partialorder %v2368_v62, 0.0004427343  ;;  %v2377_v63 = vand.u32 2147483647, %v8011_v18 }
 0x3fa   :  { %6573 = vlog2.f32 %v2380_v1  ;;  %v8056_v25 = vsub.f32 %v8023_v2, %v9634_v55  ;;  %v2367_v45 = vmul.f32 %v6564_v0, %v2366_v36  ;;  %v8058_v6 = vpack.c.bf16 %v2492_v43, %v2488_v61 }
 0x3fb   :  { %v8060_v57 = vpack.c.bf16 %v2659_v28, %v2647_v32  ;;  %v2376_v8 = vmul.f32 %v8011_v18, %v2375_v42  ;;  %v2384_v58 = vadd.f32 1.0, %v2383_v51  ;;  %v2386_v62 = vand.u32 2147483647, %v8025_v37 }
 0x3fc   :  { %9783 = vst [vmem:[#allocation9_spill] sm:$0xff] %v8058_v6  ;;  %v2682_v9 = vsub.f32 %v7993_v41, %v2681_v35  ;;  %5832 = vmatprep.subr.bf16.mxu0 %v8058_v6  ;;  %v2677_v1 = vand.u32 4294901760, %v7909_v39  ;;  %v2689_v29 = vand.u32 4294901760, %v7926_v21  ;;  %v2693_v55 = vand.u32 4294901760, %v8034_v31 }
 0x3fd   :  { %v2705_v0 = vand.u32 4294901760, %v8042_v13  ;;  %5834 = vmatpush1.bf16.msra.mxu0 %v8016_v26  ;;  %v2671_v32 = vand.u32 4294901760, %v2670_v20  ;;  %v2701_v18 = vand.u32 4294901760, %v2700_v60  ;;  %v2713_v43 = vand.u32 4294901760, %v2712_v50 }
 0x3fe   :  { %v2683_v61 = vand.u32 4294901760, %v2682_v9  ;;  %v6570_v28 = vpop.eup %6569  ;;  %v8071_v36 = vpack.c.bf16 %v2689_v29, %v2677_v1  ;;  %v2694_v51 = vsub.f32 %v8034_v31, %v2693_v55  ;;  %v9787_v12 = vand.u32 4294901760, %v7825_v3  ;;  %v2425_v9 = vld [vmem:[#allocation3 + $0x98] sm:$0xff] }
 0x3ff   :  { %v2706_v42 = vsub.f32 %v8042_v13, %v2705_v0  ;;  %v2364_v21 = vmul.f32 0.6931472, %v6570_v28  ;;  %v8079_v17 = vpack.c.bf16 %v2713_v43, %v2701_v18  ;;  %v9784_v18 = vand.u32 4294901760, %v7855_v46 }
 0x400   :  { %v8077_v6 = vpack.c.bf16 %v2683_v61, %v2671_v32  ;;  %v2695_v20 = vand.u32 4294901760, %v2694_v51  ;;  %v9785_v43 = vand.u32 4294901760, %v7878_v27  ;;  %v9790_v61 = vand.u32 4294901760, %v7894_v7 }
 0x401   :  { %v2707_v60 = vand.u32 4294901760, %v2706_v42  ;;  %v2370_v1 = vsel %vm8048_vm2, %v2367_v45, %v2364_v21  ;;  %v9788_v45 = vand.u32 4294901760, %v7839_v47  ;;  %v9792_v39 = vand.u32 4294901760, %v7858_v59 }
 0x402   :  { %v8097_v28 = vpack.c.bf16 %v9785_v43, %v9784_v18  ;;  %v6572_v51 = vpop.eup %6571  ;;  %v2402_v42 = vsel %vm2210_vm1, %v7773_v19, %v2370_v1  ;;  %v8112_v32 = vpack.c.bf16 %v2681_v35, %v9790_v61  ;;  %v9793_v19 = vand.u32 4294901760, %v7883_v22 }
 0x403   :  { %v8102_v50 = vpack.c.bf16 %v2707_v60, %v2695_v20  ;;  %v8108_v21 = vpack.c.bf16 %v9788_v45, %v9787_v12  ;;  %v2496_v18 = vand.u32 4294901760, %v2402_v42  ;;  %v2373_v43 = vmul.f32 0.6931472, %v6572_v51 }
 0x404   :  { %9786 = vst [vmem:[#allocation11_spill] sm:$0xff] %v8097_v28  ;;  %9791 = vst [vmem:[#allocation12_spill] sm:$0xff] %v8112_v32  ;;  %v6574_v29 = vpop.eup %6573  ;;  %v8118_v20 = vpack.c.bf16 %v9793_v19, %v9792_v39  ;;  %v8120_v60 = vpack.c.bf16 %v2705_v0, %v2693_v55  ;;  %vm2378_vm4 = vcmp.lt.f32.partialorder %v2377_v63, 0.0004427343  ;;  %v2385_v12 = vmul.f32 %v8025_v37, %v2384_v58 }
 0x405   :  { %9789 = vst [vmem:[#allocation10_spill] sm:$0xff] %v8108_v21  ;;  %v2382_v1 = vmul.f32 0.6931472, %v6574_v29  ;;  %v9796_v45 = vand.u32 4294901760, %v7986_v52  ;;  %v9797_v35 = vand.u32 4294901760, %v8018_v4  ;;  %v8129_v51 = vsub.f32 %v2402_v42, %v2496_v18 }
 0x406   :  { %9794 = vst [vmem:[#allocation13_spill] sm:$0xff] %v8118_v20  ;;  %9795 = vst [vmem:[#allocation14_spill] sm:$0xff] %v8120_v60  ;;  %vm2211_vm5 = vcmp.gt.f32.partialorder %v7786_v49, 20.0  ;;  %v2379_v32 = vsel %vm2378_vm4, %v2376_v8, %v2373_v43  ;;  %vm2387_vm6 = vcmp.lt.f32.partialorder %v2386_v62, 0.0004427343  ;;  %vm2212_vm7 = vcmp.gt.f32.partialorder %v7791_v5, 20.0 }
 0x407   :  { %v8127_v61 = vpack.c.bf16 %v9797_v35, %v9796_v45  ;;  %v2403_v39 = vsel %vm2211_vm5, %v7786_v49, %v2379_v32  ;;  %v2388_v55 = vsel %vm2387_vm6, %v2385_v12, %v2382_v1  ;;  %v2458_v63 = vsel %vm1156_vm3, %v2425_v9, 0  ;;  %v2426_v62 = vld [vmem:[#allocation3 + $0xa0] sm:$0xff] }
 0x408   :  { %v2723_v58 = vand.u32 4294901760, %v8056_v25  ;;  %v2502_v37 = vand.u32 4294901760, %v2403_v39  ;;  %v2404_v0 = vsel %vm2212_vm7, %v7791_v5, %v2388_v55  ;;  %v9799_v42 = vand.u32 4294901760, %v7723_v48 }
 0x409   :  { %9798 = vst [vmem:[#allocation15_spill] sm:$0xff] %v8127_v61  ;;  %v2500_v29 = vand.u32 4294901760, %v2404_v0  ;;  %v2717_v8 = vand.u32 4294901760, %v8129_v51  ;;  %v9800_v49 = vand.u32 4294901760, %v8023_v2  ;;  %v9639_v9 = vand.u32 4294901760, %v7742_v30 }
 0x40a   :  { %v2558_v19 = vsub.f32 %v7723_v48, %v9799_v42  ;;  %v8145_v43 = vsub.f32 %v2403_v39, %v2502_v37  ;;  %v8148_v1 = vand.u32 4294901760, %v2458_v63  ;;  %v8156_v45 = vsub.f32 %v7732_v11, %v7745_v40 }
 0x40b   :  { %v8143_v32 = vpack.c.bf16 %v2502_v37, %v9800_v49  ;;  %v8150_v12 = vsub.f32 %v2404_v0, %v2500_v29  ;;  %v8152_v5 = vpack.c.bf16 %v2500_v29, %v2496_v18  ;;  %v2724_v35 = vsub.f32 %v8056_v25, %v2723_v58  ;;  %v2427_v29 = vld [vmem:[#allocation3 + $0xa8] sm:$0xff] }
 0x40c   :  { %v2735_v2 = vand.u32 4294901760, %v8145_v43  ;;  %v2461_v55 = vsel %vm1156_vm3, %v2426_v62, 0  ;;  %v2559_v37 = vand.u32 4294901760, %v2558_v19  ;;  %v2718_v0 = vsub.f32 %v8129_v51, %v2717_v8 }
 0x40d   :  { %9801 = vst [vmem:[#allocation16_spill] sm:$0xff] %v8143_v32  ;;  %5836 = vmatprep.subr.bf16.mxu0 %v8152_v5  ;;  %v2729_v18 = vand.u32 4294901760, %v8150_v12  ;;  %v2569_v62 = vsub.f32 %v7742_v30, %v9639_v9  ;;  %v8174_v49 = vsub.f32 %v2458_v63, %v8148_v1  ;;  %v2579_v39 = vand.u32 4294901760, %v8156_v45  ;;  %v2428_v63 = vld [vmem:[#allocation3 + $0xb0] sm:$0xff] }
 0x40e   :  { %v2736_v42 = vsub.f32 %v8145_v43, %v2735_v2  ;;  %5838 = vmatpush1.bf16.msra.mxu0 %v8143_v32  ;;  %v8176_v19 = vpack.c.bf16 %v2735_v2, %v2723_v58  ;;  %v8181_v11 = vand.u32 4294901760, %v2461_v55  ;;  %v2725_v20 = vand.u32 4294901760, %v2724_v35 }
 0x40f   :  { %2505 = vmatprep.subr.mxu0 %v6772_v14  ;;  %v2730_v61 = vsub.f32 %v8150_v12, %v2729_v18  ;;  %v8183_v60 = vpack.c.bf16 %v2729_v18, %v2717_v8  ;;  %v2464_v28 = vsel %vm1156_vm3, %v2427_v29, 0  ;;  %v2719_v9 = vand.u32 4294901760, %v2718_v0 }
 0x410   :  { %9802 = vst [vmem:[#allocation17_spill] sm:$0xff] %v8176_v19  ;;  %v2737_v21 = vand.u32 4294901760, %v2736_v42  ;;  %v2570_v58 = vand.u32 4294901760, %v2569_v62  ;;  %v2590_v2 = vand.u32 4294901760, %v8174_v49  ;;  %v2580_v8 = vsub.f32 %v8156_v45, %v2579_v39 }
 0x411   :  { %v2731_v32 = vand.u32 4294901760, %v2730_v61  ;;  %v8193_v18 = vsub.f32 %v2461_v55, %v8181_v11  ;;  %v8195_v0 = vand.u32 4294901760, %v2464_v28  ;;  %v2467_v61 = vsel %vm1156_vm3, %v2428_v63, 0 }
 0x412   :  { %2507 = vmatpush1.msra.mxu0 %v6770_v10  ;;  %v5853_v19 = vpack.c.bf16 %v2737_v21, %v2725_v20  ;;  %v2429_v21 = vld [vmem:[#allocation3 + $0xb8] sm:$0xff]  ;;  %v2581_v20 = vand.u32 4294901760, %v2580_v8  ;;  %v8208_v55 = vand.u32 4294901760, %v2467_v61 }
 0x413   :  { %2560 = vmatmul.mubr.f32.vlgmr.msra.gmra.mrb[16].mxu0 %v2559_v37  ;;  %5840 = vmatprep.subr.bf16.mxu0 %v8060_v57  ;;  %v5851_v35 = vpack.c.bf16 %v2731_v32, %v2719_v9  ;;  %v2591_v57 = vsub.f32 %v8174_v49, %v2590_v2  ;;  %v2601_v32 = vand.u32 4294901760, %v8193_v18  ;;  %v8206_v9 = vsub.f32 %v2464_v28, %v8195_v0 }
 0x414   :  { %5842 = vmatpush1.bf16.msra.mxu0 %v7991_v44  ;;  %2565 = vmatprep.mubr.f32.mxu0 %v9732_v54  ;;  %v2470_v44 = vsel %vm1156_vm3, %v2429_v21, 0  ;;  %v8219_v28 = vsub.f32 %v2467_v61, %v8208_v55 }
 0x415   :  { %5844 = vmatprep.subr.bf16.mxu0 %v8077_v6  ;;  %v2592_v6 = vand.u32 4294901760, %v2591_v57  ;;  %v2602_v37 = vsub.f32 %v8193_v18, %v2601_v32  ;;  %v2612_v29 = vand.u32 4294901760, %v8206_v9  ;;  %v8221_v42 = vand.u32 4294901760, %v2470_v44 }
 0x416   :  { %v2623_v62 = vand.u32 4294901760, %v8219_v28  ;;  %v9806_v57 = vpack.c.bf16 %v7883_v22, %v7858_v59  ;;  %v9810_v59 = vpack.c.bf16 %v8145_v43, %v8056_v25  ;;  %v9811_v22 = vld [vmem:[#allocation8_spill] sm:$0xff]  ;;  %v9818_v25 = vand.u32 4294901760, %v7742_v30  ;;  %v9820_v43 = vld [vmem:[#allocation14_spill] sm:$0xff] }
 0x417   :  { %2571 = vmatmul.mubr.f32.gmra.mrb[18].mxu0 %v2570_v58  ;;  %v8230_v63 = vsub.f32 %v2470_v44, %v8221_v42 }
 0x418   :  { %5846 = vmatpush1.bf16.msra.mxu0 %v8071_v36  ;;  %2576 = vmatprep.mubr.f32.mxu0 %v9732_v54  ;;  %v2603_v36 = vand.u32 4294901760, %v2602_v37  ;;  %v2624_v58 = vsub.f32 %v8219_v28, %v2623_v62 }
 0x419   :  { %5848 = vmatprep.subr.bf16.mxu0 %v8102_v50  ;;  %v2613_v50 = vsub.f32 %v8206_v9, %v2612_v29  ;;  %v2634_v8 = vand.u32 4294901760, %v8230_v63 }
 0x41b   :  { %2582 = vmatmul.mubr.f32.gmra.mrb[20].mxu0 %v2581_v20  ;;  %v2635_v61 = vsub.f32 %v8230_v63, %v2634_v8  ;;  %v9807_v20 = vpack.c.bf16 %v8042_v13, %v8034_v31  ;;  %v9816_v31 = vld [vmem:[#allocation10_spill] sm:$0xff]  ;;  %v9817_v13 = vld [vmem:[#allocation12_spill] sm:$0xff] }
 0x41c   :  { %5850 = vmatpush1.bf16.msra.mxu0 %v8079_v17  ;;  %2587 = vmatprep.mubr.f32.mxu0 %v9732_v54  ;;  %v2614_v17 = vand.u32 4294901760, %v2613_v50 }
 0x41d   :  { %5852 = vmatprep.subr.bf16.mxu0 %v5851_v35  ;;  %v9803_v35 = vpack.c.bf16 %v7878_v27, %v7855_v46  ;;  %v2636_v21 = vand.u32 4294901760, %v2635_v61  ;;  %v9804_v46 = vpack.c.bf16 %v7839_v47, %v7825_v3  ;;  %v9805_v27 = vpack.c.bf16 %v7993_v41, %v7894_v7  ;;  %v9812_v7 = vld [vmem:[#allocation9_spill] sm:$0xff]  ;;  %v9814_v41 = vld [vmem:[#allocation11_spill] sm:$0xff] }
 0x41e   :  { %v9808_v3 = vpack.c.bf16 %v8018_v4, %v7986_v52  ;;  %v9809_v47 = vpack.c.bf16 %v8150_v12, %v8129_v51  ;;  %v9813_v52 = vld [vmem:[#allocation16_spill] sm:$0xff]  ;;  %v9815_v4 = vand.u32 4294901760, %v7723_v48  ;;  %v9819_v51 = vld [vmem:[#allocation13_spill] sm:$0xff]  ;;  %v9823_v12 = vld [vmem:[#allocation7_spill] sm:$0xff] }
 0x41f   :  { %2593 = vmatmul.mubr.f32.gmra.mrb[22].mxu0 %v2592_v6 }
 0x420   :  { %5854 = vmatpush1.bf16.msra.mxu0 %v5853_v19  ;;  %2598 = vmatprep.mubr.f32.mxu0 %v9732_v54  ;;  %v2625_v19 = vand.u32 4294901760, %v2624_v58 }
 0x421   :  { %2744 = vmatprep.subr.mxu0 %v6794_v24 }
 0x423   :  { %2604 = vmatmul.mubr.f32.gmra.mrb[24].mxu0 %v2603_v36  ;;  %v3715_v36 = vld [vmem:[#allocation3 + $0xd0] sm:$0xff] }
 0x424   :  { %2750 = vmatpush1.msra.mxu0 %v6792_v23  ;;  %2609 = vmatprep.mubr.f32.mxu0 %v9732_v54 }
 0x425   :  { %5856 = vmatprep.subr.bf16.mxu0 %v9803_v35 }
 0x427   :  { %2615 = vmatmul.mubr.f32.gmra.mrb[26].mxu0 %v2614_v17 }
 0x428   :  { %2620 = vmatprep.mubr.f32.mxu0 %v9732_v54 }
 0x42b   :  { %2626 = vmatmul.mubr.f32.gmra.mrb[28].mxu0 %v2625_v19 }
 0x42c   :  { %2631 = vmatprep.mubr.f32.mxu0 %v9732_v54 }
 0x42f   :  { %2637 = vmatmul.mubr.f32.gmra.mrb[30].mxu0 %v2636_v21 }
 0x430   :  { %2797 = vmatprep.mubr.f32.mxu0 %v9732_v54 }
 0x433   :  { %2799 = vmatmul.mubr.f32.vlgmr.msra.gmra.mrb[16].mxu0 %v7714_v56 }
 0x434   :  { %5858 = vmatpush1.bf16.msra.mxu0 %v9804_v46  ;;  %2804 = vmatprep.mubr.f32.mxu0 %v9732_v54  ;;  %v8427_v46 = vsel %vm1156_vm3, %v3715_v36, 0 }
 0x435   :  { %5860 = vmatprep.subr.bf16.mxu0 %v9805_v27 }
 0x437   :  { %2806 = vmatmul.mubr.f32.gmra.mrb[18].mxu0 %v7729_v34 }
 0x438   :  { %5862 = vmatpush1.bf16.msra.mxu0 %v9806_v57  ;;  %2811 = vmatprep.mubr.f32.mxu0 %v9732_v54 }
 0x439   :  { %5864 = vmatprep.subr.bf16.mxu0 %v9807_v20 }
 0x43b   :  { %2813 = vmatmul.mubr.f32.gmra.mrb[20].mxu0 %v7745_v40 }
 0x43c   :  { %5866 = vmatpush1.bf16.msra.mxu0 %v9808_v3  ;;  %2818 = vmatprep.mubr.f32.mxu0 %v9732_v54 }
 0x43d   :  { %5868 = vmatprep.subr.bf16.mxu0 %v9809_v47 }
 0x43f   :  { %2820 = vmatmul.mubr.f32.gmra.mrb[22].mxu0 %v8148_v1 }
 0x440   :  { %5870 = vmatpush1.bf16.msra.mxu0 %v9810_v59  ;;  %2825 = vmatprep.mubr.f32.mxu0 %v9732_v54 }
 0x441   :  { %2904 = vmatprep.subr.mxu0 %v6778_v16 }
 0x443   :  { %2827 = vmatmul.mubr.f32.gmra.mrb[24].mxu0 %v8181_v11 }
 0x444   :  { %2907 = vmatpush1.msra.mxu0 %v6775_v15  ;;  %2832 = vmatprep.mubr.f32.mxu0 %v9732_v54 }
 0x445   :  { %5872 = vmatprep.subr.bf16.mxu0 %v7951_v33 }
 0x447   :  { %2834 = vmatmul.mubr.f32.gmra.mrb[26].mxu0 %v8195_v0 }
 0x448   :  { %2839 = vmatprep.mubr.f32.mxu0 %v9732_v54 }
 0x44b   :  { %2841 = vmatmul.mubr.f32.gmra.mrb[28].mxu0 %v8208_v55 }
 0x44c   :  { %2846 = vmatprep.mubr.f32.mxu0 %v9732_v54 }
 0x44f   :  { %2848 = vmatmul.mubr.f32.gmra.mrb[30].mxu0 %v8221_v42 }
 0x450   :  { %2954 = vmatprep.mubr.f32.mxu0 %v9732_v54 }
 0x453   :  { %2957 = vmatmul.mubr.f32.vlgmr.msra.gmra.mrb[16].mxu0 %v7723_v48  ;;  %v9821_v48 = vld [vmem:[#allocation15_spill] sm:$0xff] }
 0x454   :  { %5874 = vmatpush1.bf16.msra.mxu0 %v7830_v38  ;;  %2962 = vmatprep.mubr.f32.mxu0 %v9732_v54 }
 0x455   :  { %5876 = vmatprep.subr.bf16.mxu0 %v7966_v53 }
 0x457   :  { %2965 = vmatmul.mubr.f32.gmra.mrb[18].mxu0 %v7742_v30  ;;  %v9822_v30 = vld [vmem:[#allocation17_spill] sm:$0xff] }
 0x458   :  { %5878 = vmatpush1.bf16.msra.mxu0 %v9811_v22  ;;  %2970 = vmatprep.mubr.f32.mxu0 %v9732_v54 }
 0x459   :  { %5880 = vmatprep.subr.bf16.mxu0 %v9812_v7 }
 0x45b   :  { %2973 = vmatmul.mubr.f32.gmra.mrb[20].mxu0 %v8156_v45  ;;  %v9824_v45 = vld [vmem:[#allocation6_spill] sm:$0xff] }
 0x45c   :  { %5882 = vmatpush1.bf16.msra.mxu0 %v8016_v26  ;;  %2978 = vmatprep.mubr.f32.mxu0 %v9732_v54 }
 0x45d   :  { %5884 = vmatprep.subr.bf16.mxu0 %v8152_v5 }
 0x45f   :  { %2981 = vmatmul.mubr.f32.gmra.mrb[22].mxu0 %v8174_v49 }
 0x460   :  { %5886 = vmatpush1.bf16.msra.mxu0 %v9813_v52  ;;  %2986 = vmatprep.mubr.f32.mxu0 %v9732_v54 }
 0x461   :  { %3052 = vmatprep.subr.mxu0 %v6772_v14 }
 0x463   :  { %2989 = vmatmul.mubr.f32.gmra.mrb[24].mxu0 %v8193_v18 }
 0x464   :  { %3054 = vmatpush1.msra.mxu0 %v6770_v10  ;;  %2994 = vmatprep.mubr.f32.mxu0 %v9732_v54 }
 0x465   :  { %5888 = vmatprep.subr.bf16.mxu0 %v9814_v41 }
 0x467   :  { %2997 = vmatmul.mubr.f32.gmra.mrb[26].mxu0 %v8206_v9 }
 0x468   :  { %3002 = vmatprep.mubr.f32.mxu0 %v9732_v54 }
 0x46b   :  { %3005 = vmatmul.mubr.f32.gmra.mrb[28].mxu0 %v8219_v28 }
 0x46c   :  { %3010 = vmatprep.mubr.f32.mxu0 %v9732_v54 }
 0x46f   :  { %3013 = vmatmul.mubr.f32.gmra.mrb[30].mxu0 %v8230_v63 }
 0x470   :  { %3101 = vmatprep.mubr.f32.mxu0 %v9732_v54 }
 0x473   :  { %3105 = vmatmul.mubr.f32.vlgmr.msra.gmra.mrb[16].mxu0 %v9815_v4 }
 0x474   :  { %5890 = vmatpush1.bf16.msra.mxu0 %v9816_v31  ;;  %3110 = vmatprep.mubr.f32.mxu0 %v9732_v54  ;;  %v8440_v31 = vand.u32 4294901760, %v8427_v46 }
 0x475   :  { %5892 = vmatprep.subr.bf16.mxu0 %v9817_v13 }
 0x477   :  { %3114 = vmatmul.mubr.f32.gmra.mrb[18].mxu0 %v9818_v25 }
 0x478   :  { %5894 = vmatpush1.bf16.msra.mxu0 %v9819_v51  ;;  %3119 = vmatprep.mubr.f32.mxu0 %v9732_v54 }
 0x479   :  { %5896 = vmatprep.subr.bf16.mxu0 %v9820_v43 }
 0x47b   :  { %3123 = vmatmul.mubr.f32.gmra.mrb[20].mxu0 %v2579_v39 }
 0x47c   :  { %5898 = vmatpush1.bf16.msra.mxu0 %v9821_v48  ;;  %3128 = vmatprep.mubr.f32.mxu0 %v9732_v54 }
 0x47d   :  { %5900 = vmatprep.subr.bf16.mxu0 %v8183_v60  ;;  %v3713_v60 = vld [vmem:[#allocation3 + $0xc0] sm:$0xff] }
 0x47e   :  { %v3740_v39 = vsel %vm1156_vm3, %v3713_v60, 0 }
 0x47f   :  { %3132 = vmatmul.mubr.f32.gmra.mrb[22].mxu0 %v2590_v2  ;;  %v8409_v18 = vand.u32 4294901760, %v3740_v39 }
 0x480   :  { %5902 = vmatpush1.bf16.msra.mxu0 %v9822_v30  ;;  %3137 = vmatprep.mubr.f32.mxu0 %v9732_v54 }
 0x481   :  { %3241 = vmatprep.subr.mxu0 %v9823_v12 }
 0x483   :  { %3141 = vmatmul.mubr.f32.gmra.mrb[24].mxu0 %v2601_v32 }
 0x484   :  { %3245 = vmatpush1.msra.mxu0 %v9824_v45  ;;  %3146 = vmatprep.mubr.f32.mxu0 %v9732_v54 }
 0x485   :  { %5904 = vmatprep.subr.bf16.mxu0 %v7951_v33 }
 0x487   :  { %3150 = vmatmul.mubr.f32.gmra.mrb[26].mxu0 %v2612_v29 }
 0x488   :  { %3155 = vmatprep.mubr.f32.mxu0 %v9732_v54 }
 0x48b   :  { %3159 = vmatmul.mubr.f32.gmra.mrb[28].mxu0 %v2623_v62 }
 0x48c   :  { %3164 = vmatprep.mubr.f32.mxu0 %v9732_v54 }
 0x48f   :  { %3168 = vmatmul.mubr.f32.gmra.mrb[30].mxu0 %v2634_v8 }
 0x490   :  { %3292 = vmatprep.mubr.f32.mxu0 %v9732_v54 }
 0x493   :  { %3294 = vmatmul.mubr.f32.vlgmr.msra.gmra.mrb[16].mxu0 %v7714_v56 }
 0x494   :  { %5906 = vmatpush1.bf16.msra.mxu0 %v7830_v38  ;;  %3299 = vmatprep.mubr.f32.mxu0 %v9732_v54 }
 0x495   :  { %5908 = vmatprep.subr.bf16.mxu0 %v7966_v53 }
 0x497   :  { %3301 = vmatmul.mubr.f32.gmra.mrb[18].mxu0 %v7729_v34 }
 0x498   :  { %5910 = vmatpush1.bf16.msra.mxu0 %v9811_v22  ;;  %3306 = vmatprep.mubr.f32.mxu0 %v9732_v54 }
 0x499   :  { %5912 = vmatprep.subr.bf16.mxu0 %v9812_v7 }
 0x49b   :  { %3308 = vmatmul.mubr.f32.gmra.mrb[20].mxu0 %v7745_v40 }
 0x49c   :  { %5914 = vmatpush1.bf16.msra.mxu0 %v8016_v26  ;;  %3313 = vmatprep.mubr.f32.mxu0 %v9732_v54 }
 0x49d   :  { %5916 = vmatprep.subr.bf16.mxu0 %v8152_v5 }
 0x49f   :  { %3315 = vmatmul.mubr.f32.gmra.mrb[22].mxu0 %v8148_v1 }
 0x4a0   :  { %5918 = vmatpush1.bf16.msra.mxu0 %v9813_v52  ;;  %3320 = vmatprep.mubr.f32.mxu0 %v9732_v54 }
 0x4a1   :  { %3382 = vmatprep.subr.mxu0 %v6772_v14 }
 0x4a3   :  { %3322 = vmatmul.mubr.f32.gmra.mrb[24].mxu0 %v8181_v11 }
 0x4a4   :  { %3327 = vmatprep.mubr.f32.mxu0 %v9732_v54  ;;  %3384 = vmatpush1.msra.mxu0 %v6770_v10 }
 0x4a7   :  { %3329 = vmatmul.mubr.f32.gmra.mrb[26].mxu0 %v8195_v0 }
 0x4a8   :  { %3334 = vmatprep.mubr.f32.mxu0 %v9732_v54 }
 0x4ab   :  { %3336 = vmatmul.mubr.f32.gmra.mrb[28].mxu0 %v8208_v55 }
 0x4ac   :  { %3341 = vmatprep.mubr.f32.mxu0 %v9732_v54 }
 0x4af   :  { %3343 = vmatmul.mubr.f32.gmra.mrb[30].mxu0 %v8221_v42 }
 0x4b0   :  { %3431 = vmatprep.mubr.f32.mxu0 %v9732_v54 }
 0x4b3   :  { %3433 = vmatmul.mubr.f32.vlgmr.msra.gmra.mrb[16].mxu0 %v7714_v56 }
 0x4b4   :  { %3438 = vmatprep.mubr.f32.mxu0 %v9732_v54 }
 0x4b7   :  { %3440 = vmatmul.mubr.f32.gmra.mrb[18].mxu0 %v7729_v34 }
 0x4b8   :  { %3445 = vmatprep.mubr.f32.mxu0 %v9732_v54 }
 0x4bb   :  { %3447 = vmatmul.mubr.f32.gmra.mrb[20].mxu0 %v7745_v40 }
 0x4bc   :  { %3452 = vmatprep.mubr.f32.mxu0 %v9732_v54 }
 0x4bf   :  { %3454 = vmatmul.mubr.f32.gmra.mrb[22].mxu0 %v8148_v1 }
 0x4c0   :  { %3459 = vmatprep.mubr.f32.mxu0 %v9732_v54 }
 0x4c3   :  { %3461 = vmatmul.mubr.f32.gmra.mrb[24].mxu0 %v8181_v11 }
 0x4c4   :  { %3466 = vmatprep.mubr.f32.mxu0 %v9732_v54 }
 0x4c7   :  { %3468 = vmatmul.mubr.f32.gmra.mrb[26].mxu0 %v8195_v0  ;;  %v3714_v0 = vld [vmem:[#allocation3 + $0xc8] sm:$0xff] }
 0x4c8   :  { %3473 = vmatprep.mubr.f32.mxu0 %v9732_v54  ;;  %v3743_v29 = vsel %vm1156_vm3, %v3714_v0, 0 }
 0x4c9   :  { %v8424_v8 = vand.u32 4294901760, %v3743_v29 }
 0x4cb   :  { %3475 = vmatmul.mubr.f32.gmra.mrb[28].mxu0 %v8208_v55  ;;  %v8437_v4 = vsub.f32 %v3743_v29, %v8424_v8 }
 0x4cc   :  { %3480 = vmatprep.mubr.f32.mxu0 %v9732_v54 }
 0x4cf   :  { %3482 = vmatmul.mubr.f32.gmra.mrb[30].mxu0 %v8221_v42  ;;  %v8418_v42 = vsub.f32 %v3740_v39, %v8409_v18 }
 0x4d0   :  { %5273 = vmatprep.mubr.f32.mxu0 %v9732_v54 }
 0x586   :  { %v8390_v56 = vpop.f32.mrb[16].mxu0 }
 0x587   :  { %v3504_v34 = vmul.f32 1.442695, %v8390_v56  ;;  %v8393_v40 = vpop.f32.mrb[17].mxu0  ;;  %vm3488_vm9 = vcmp.gt.f32.partialorder %v8390_v56, 20.0 }
 0x588   :  { %v3506_v38 = vmul.f32 1.442695, %v8393_v40  ;;  %vm3489_vm11 = vcmp.gt.f32.partialorder %v8393_v40, 20.0 }
 0x589   :  { %6575 = vpow2.f32 %v3504_v34 }
 0x58a   :  { %6577 = vpow2.f32 %v3506_v38  ;;  %v8396_v33 = vpop.f32.mrb[18].mxu0 }
 0x58b   :  { %v3508_v53 = vmul.f32 1.442695, %v8396_v33  ;;  %v8399_v26 = vpop.f32.mrb[19].mxu0  ;;  %vm3490_vm13 = vcmp.gt.f32.partialorder %v8396_v33, 20.0 }
 0x58c   :  { %v3510_v1 = vmul.f32 1.442695, %v8399_v26  ;;  %vm3491_vm15 = vcmp.gt.f32.partialorder %v8399_v26, 20.0 }
 0x58d   :  { %6579 = vpow2.f32 %v3508_v53 }
 0x58e   :  { %6581 = vpow2.f32 %v3510_v1  ;;  %v8402_v5 = vpop.f32.mrb[20].mxu0 }
 0x58f   :  { %v3512_v11 = vmul.f32 1.442695, %v8402_v5  ;;  %v8406_v49 = vpop.f32.mrb[21].mxu0  ;;  %vm3492_vm0 = vcmp.gt.f32.partialorder %v8402_v5, 20.0 }
 0x590   :  { %v3514_v2 = vmul.f32 1.442695, %v8406_v49  ;;  %vm3493_vm2 = vcmp.gt.f32.partialorder %v8406_v49, 20.0 }
 0x591   :  { %6583 = vpow2.f32 %v3512_v11 }
 0x592   :  { %6585 = vpow2.f32 %v3514_v2  ;;  %v8411_v32 = vpop.f32.mrb[22].mxu0 }
 0x593   :  { %v6576_v9 = vpop.eup %6575  ;;  %v3516_v55 = vmul.f32 1.442695, %v8411_v32  ;;  %v8414_v44 = vpop.f32.mrb[23].mxu0  ;;  %vm3494_vm5 = vcmp.gt.f32.partialorder %v8411_v32, 20.0 }
 0x594   :  { %v6578_v6 = vpop.eup %6577  ;;  %v3536_v37 = vadd.f32 1.0, %v6576_v9  ;;  %v3539_v50 = vmul.f32 -0.5, %v6576_v9  ;;  %v3542_v19 = vand.u32 2147483647, %v6576_v9  ;;  %v3518_v38 = vmul.f32 1.442695, %v8414_v44 }
 0x595   :  { %v3545_v28 = vadd.f32 1.0, %v6578_v6  ;;  %6587 = vpow2.f32 %v3516_v55  ;;  %v3548_v62 = vmul.f32 -0.5, %v6578_v6  ;;  %v3551_v27 = vand.u32 2147483647, %v6578_v6 }
 0x596   :  { %6589 = vlog2.f32 %v3536_v37  ;;  %v8420_v63 = vpop.f32.mrb[24].mxu0  ;;  %v3540_v3 = vadd.f32 1.0, %v3539_v50  ;;  %vm8444_vm8 = vcmp.lt.f32.partialorder %v3542_v19, 0.0004427343  ;;  %vm3495_vm7 = vcmp.gt.f32.partialorder %v8414_v44, 20.0 }
 0x597   :  { %v6580_v17 = vpop.eup %6579  ;;  %6591 = vlog2.f32 %v3545_v28  ;;  %v8422_v58 = vpop.f32.mrb[25].mxu0  ;;  %v3549_v47 = vadd.f32 1.0, %v3548_v62  ;;  %vm8450_vm10 = vcmp.lt.f32.partialorder %v3551_v27, 0.0004427343 }
 0x598   :  { %v6582_v35 = vpop.eup %6581  ;;  %v3554_v61 = vadd.f32 1.0, %v6580_v17  ;;  %v3557_v21 = vmul.f32 -0.5, %v6580_v17  ;;  %v3560_v59 = vand.u32 2147483647, %v6580_v17  ;;  %v3541_v53 = vmul.f32 %v6576_v9, %v3540_v3 }
 0x599   :  { %v3563_v57 = vadd.f32 1.0, %v6582_v35  ;;  %v3566_v52 = vmul.f32 -0.5, %v6582_v35  ;;  %v3569_v43 = vand.u32 2147483647, %v6582_v35  ;;  %v3550_v60 = vmul.f32 %v6578_v6, %v3549_v47 }
 0x59a   :  { %6593 = vlog2.f32 %v3554_v61  ;;  %v8430_v22 = vpop.f32.mrb[26].mxu0  ;;  %v3558_v51 = vadd.f32 1.0, %v3557_v21  ;;  %vm8457_vm12 = vcmp.lt.f32.partialorder %v3560_v59, 0.0004427343  ;;  %v3520_v9 = vmul.f32 1.442695, %v8420_v63 }
 0x59b   :  { %v8432_v7 = vpop.eup %6583  ;;  %6595 = vlog2.f32 %v3563_v57  ;;  %v8434_v41 = vpop.f32.mrb[27].mxu0  ;;  %v3567_v2 = vadd.f32 1.0, %v3566_v52  ;;  %vm8470_vm14 = vcmp.lt.f32.partialorder %v3569_v43, 0.0004427343  ;;  %v3522_v61 = vmul.f32 1.442695, %v8422_v58 }
 0x59c   :  { %v8442_v13 = vpop.eup %6585  ;;  %v3572_v48 = vadd.f32 1.0, %v8432_v7  ;;  %v3575_v0 = vmul.f32 -0.5, %v8432_v7  ;;  %v3559_v37 = vmul.f32 %v6580_v17, %v3558_v51  ;;  %v3578_v28 = vand.u32 2147483647, %v8432_v7 }
 0x59d   :  { %v3581_v34 = vadd.f32 1.0, %v8442_v13  ;;  %v3584_v19 = vmul.f32 -0.5, %v8442_v13  ;;  %v3587_v17 = vand.u32 2147483647, %v8442_v13  ;;  %v3568_v47 = vmul.f32 %v6582_v35, %v3567_v2 }
 0x59e   :  { %6597 = vlog2.f32 %v3572_v48  ;;  %v8461_v39 = vpop.f32.mrb[28].mxu0  ;;  %v3576_v59 = vadd.f32 1.0, %v3575_v0  ;;  %vm8493_vm1 = vcmp.lt.f32.partialorder %v3578_v28, 0.0004427343  ;;  %v3524_v35 = vmul.f32 1.442695, %v8430_v22 }
 0x59f   :  { %v8463_v11 = vpop.eup %6587  ;;  %6599 = vlog2.f32 %v3581_v34  ;;  %v8468_v55 = vpop.f32.mrb[29].mxu0  ;;  %v3526_v2 = vmul.f32 1.442695, %v8434_v41  ;;  %vm8500_vm4 = vcmp.lt.f32.partialorder %v3587_v17, 0.0004427343 }
 0x5a0   :  { %v6590_v6 = vpop.eup %6589  ;;  %v3590_v36 = vadd.f32 1.0, %v8463_v11  ;;  %6601 = vpow2.f32 %v3518_v38  ;;  %v3593_v27 = vmul.f32 -0.5, %v8463_v11  ;;  %v3577_v28 = vmul.f32 %v8432_v7, %v3576_v59 }
 0x5a1   :  { %v6592_v50 = vpop.eup %6591  ;;  %v3538_v62 = vmul.f32 0.6931472, %v6590_v6 }
 0x5a2   :  { %v3547_v21 = vmul.f32 0.6931472, %v6592_v50  ;;  %6603 = vlog2.f32 %v3590_v36  ;;  %v8481_v57 = vpop.f32.mrb[30].mxu0  ;;  %v3594_v30 = vadd.f32 1.0, %v3593_v27  ;;  %v3528_v36 = vmul.f32 1.442695, %v8461_v39 }
 0x5a3   :  { %v3544_v3 = vsel %vm8444_vm8, %v3541_v53, %v3538_v62  ;;  %6605 = vpow2.f32 %v3520_v9  ;;  %v8486_v52 = vpop.f32.mrb[31].mxu0  ;;  %v3585_v9 = vadd.f32 1.0, %v3584_v19 }
 0x5a4   :  { %v6594_v51 = vpop.eup %6593  ;;  %v3680_v43 = vsel %vm3488_vm9, %v8390_v56, %v3544_v3  ;;  %v3553_v48 = vsel %vm8450_vm10, %v3550_v60, %v3547_v21  ;;  %6607 = vpow2.f32 %v3522_v61  ;;  %v3595_v3 = vmul.f32 %v8463_v11, %v3594_v30 }
 0x5a5   :  { %v6596_v25 = vpop.eup %6595  ;;  %v3765_v38 = vand.u32 4294901760, %v3680_v43  ;;  %v3556_v53 = vmul.f32 0.6931472, %v6594_v51  ;;  %v8507_v60 = vsel %vm3489_vm11, %v8393_v40, %v3553_v48  ;;  %v3596_v40 = vand.u32 2147483647, %v8463_v11 }
 0x5a6   :  { %v3565_v0 = vmul.f32 0.6931472, %v6596_v25  ;;  %6609 = vpow2.f32 %v3524_v35  ;;  %v9646_v21 = vand.u32 4294901760, %v8507_v60  ;;  %v3586_v27 = vmul.f32 %v8442_v13, %v3585_v9 }
 0x5a7   :  { %v3562_v6 = vsel %vm8457_vm12, %v3559_v37, %v3556_v53  ;;  %v8520_v1 = vsub.f32 %v3680_v43, %v3765_v38  ;;  %6611 = vpow2.f32 %v3526_v2  ;;  %vm3597_vm6 = vcmp.lt.f32.partialorder %v3596_v40, 0.0004427343 }
 0x5a8   :  { %v6598_v50 = vpop.eup %6597  ;;  %v3682_v62 = vsel %vm3490_vm13, %v8396_v33, %v3562_v6  ;;  %v3571_v19 = vsel %vm8470_vm14, %v3568_v47, %v3565_v0  ;;  %6613 = vpow2.f32 %v3528_v36  ;;  %v8550_v53 = vsub.f32 %v8507_v60, %v9646_v21 }
 0x5a9   :  { %v6600_v61 = vpop.eup %6599  ;;  %v3769_v37 = vand.u32 4294901760, %v3682_v62  ;;  %v3574_v7 = vmul.f32 0.6931472, %v6598_v50  ;;  %v8530_v29 = vsel %vm3491_vm15, %v8399_v26, %v3571_v19  ;;  %v9643_v25 = vand.u32 4294901760, %v8520_v1 }
 0x5aa   :  { %v3583_v17 = vmul.f32 0.6931472, %v6600_v61  ;;  %v6602_v33 = vpop.eup %6601  ;;  %v9645_v0 = vand.u32 4294901760, %v8530_v29  ;;  %v3530_v36 = vmul.f32 1.442695, %v8468_v55  ;;  %vm3496_vm9 = vcmp.gt.f32.partialorder %v8420_v63, 20.0 }
 0x5ab   :  { %v8525_v59 = vpack.c.bf16 %v3769_v37, %v3765_v38  ;;  %v3580_v47 = vsel %vm8493_vm1, %v3577_v28, %v3574_v7  ;;  %v8534_v43 = vsub.f32 %v3682_v62, %v3769_v37  ;;  %v3599_v48 = vadd.f32 1.0, %v6602_v33 }
 0x5ac   :  { %v6604_v51 = vpop.eup %6603  ;;  %v3684_v13 = vsel %vm3492_vm0, %v8402_v5, %v3580_v47  ;;  %v3589_v11 = vsel %vm8500_vm4, %v3586_v27, %v3583_v17  ;;  %v3602_v5 = vmul.f32 -0.5, %v6602_v33  ;;  %v8564_v50 = vsub.f32 %v8520_v1, %v9643_v25 }
 0x5ad   :  { %v6606_v35 = vpop.eup %6605  ;;  %v3773_v26 = vand.u32 4294901760, %v3684_v13  ;;  %v8545_v34 = vsel %vm3493_vm2, %v8406_v49, %v3589_v11  ;;  %v3592_v38 = vmul.f32 0.6931472, %v6604_v51  ;;  %6615 = vlog2.f32 %v3599_v48 }
 0x5ae   :  { %v6608_v2 = vpop.eup %6607  ;;  %v3608_v30 = vadd.f32 1.0, %v6606_v35  ;;  %v9642_v6 = vand.u32 4294901760, %v8534_v43  ;;  %v9644_v49 = vand.u32 4294901760, %v8545_v34  ;;  %v3611_v19 = vmul.f32 -0.5, %v6606_v35 }
 0x5af   :  { %v8553_v9 = vsub.f32 %v3684_v13, %v3773_v26  ;;  %v3598_v56 = vsel %vm3597_vm6, %v3595_v3, %v3592_v38  ;;  %v3603_v61 = vadd.f32 1.0, %v3602_v5  ;;  %v3605_v37 = vand.u32 2147483647, %v6602_v33 }
 0x5b0   :  { %v3686_v28 = vsel %vm3494_vm5, %v8411_v32, %v3598_v56  ;;  %6617 = vlog2.f32 %v3608_v30  ;;  %v8566_v40 = vpop.eup %6609  ;;  %v3617_v7 = vadd.f32 1.0, %v6608_v2  ;;  %v3620_v17 = vmul.f32 -0.5, %v6608_v2 }
 0x5b1   :  { %v3777_v62 = vand.u32 4294901760, %v3686_v28  ;;  %v8568_v27 = vpop.eup %6611  ;;  %v8573_v32 = vsub.f32 %v8530_v29, %v9645_v0  ;;  %v9647_v3 = vand.u32 4294901760, %v8553_v9  ;;  %v8584_v13 = vsub.f32 %v8534_v43, %v9642_v6 }
 0x5b2   :  { %v8589_v11 = vsub.f32 %v8545_v34, %v9644_v49  ;;  %v3614_v48 = vand.u32 2147483647, %v6606_v35  ;;  %6619 = vlog2.f32 %v3617_v7  ;;  %v8591_v38 = vpop.eup %6613  ;;  %v3621_v5 = vadd.f32 1.0, %v3620_v17 }
 0x5b3   :  { %v8576_v47 = vpack.c.bf16 %v3777_v62, %v3773_v26  ;;  %v8578_v51 = vsub.f32 %v3686_v28, %v3777_v62  ;;  %v3612_v26 = vadd.f32 1.0, %v3611_v19  ;;  %v3623_v56 = vand.u32 2147483647, %v6608_v2 }
 0x5b4   :  { %v3626_v30 = vadd.f32 1.0, %v8566_v40  ;;  %v3604_v62 = vmul.f32 %v6602_v33, %v3603_v61  ;;  %vm8595_vm8 = vcmp.lt.f32.partialorder %v3605_v37, 0.0004427343  ;;  %v3635_v6 = vadd.f32 1.0, %v8568_v27 }
 0x5b5   :  { %9837 = vst [vmem:[#allocation8_spill] sm:$0xff] %v8576_v47  ;;  %v9648_v28 = vand.u32 4294901760, %v8578_v51  ;;  %v8604_v7 = vsub.f32 %v8553_v9, %v9647_v3  ;;  %v3629_v19 = vmul.f32 -0.5, %v8566_v40  ;;  %v3632_v17 = vand.u32 2147483647, %v8566_v40 }
 0x5b6   :  { %6621 = vlog2.f32 %v3626_v30  ;;  %vm8608_vm10 = vcmp.lt.f32.partialorder %v3614_v48, 0.0004427343  ;;  %v3638_v61 = vmul.f32 -0.5, %v8568_v27  ;;  %v3644_v37 = vadd.f32 1.0, %v8591_v38 }
 0x5b7   :  { %v6616_v25 = vpop.eup %6615  ;;  %6623 = vlog2.f32 %v3635_v6  ;;  %v3613_v0 = vmul.f32 %v6606_v35, %v3612_v26  ;;  %v3622_v21 = vmul.f32 %v6608_v2, %v3621_v5  ;;  %vm8614_vm11 = vcmp.lt.f32.partialorder %v3623_v56, 0.0004427343 }
 0x5b8   :  { %v3601_v49 = vmul.f32 0.6931472, %v6616_v25  ;;  %v8621_v30 = vsub.f32 %v8578_v51, %v9648_v28  ;;  %vm3497_vm12 = vcmp.gt.f32.partialorder %v8422_v58, 20.0  ;;  %6625 = vlog2.f32 %v3644_v37 }
 0x5b9   :  { %v3647_v6 = vmul.f32 -0.5, %v8591_v38  ;;  %v3532_v48 = vmul.f32 1.442695, %v8481_v57  ;;  %v3630_v25 = vadd.f32 1.0, %v3629_v19  ;;  %vm8628_vm13 = vcmp.lt.f32.partialorder %v3632_v17, 0.0004427343 }
 0x5ba   :  { %v6618_v45 = vpop.eup %6617  ;;  %v3607_v35 = vsel %vm8595_vm8, %v3604_v62, %v3601_v49  ;;  %6627 = vpow2.f32 %v3530_v36  ;;  %vm3498_vm14 = vcmp.gt.f32.partialorder %v8430_v22, 20.0  ;;  %v3639_v56 = vadd.f32 1.0, %v3638_v61 }
 0x5bb   :  { %v3687_v26 = vsel %vm3495_vm7, %v8414_v44, %v3607_v35  ;;  %v3610_v5 = vmul.f32 0.6931472, %v6618_v45  ;;  %v3641_v37 = vand.u32 2147483647, %v8568_v27  ;;  %vm3499_vm15 = vcmp.gt.f32.partialorder %v8434_v41, 20.0 }
 0x5bc   :  { %v3775_v28 = vand.u32 4294901760, %v3687_v26  ;;  %v3650_v20 = vand.u32 2147483647, %v8591_v38  ;;  %6629 = vpow2.f32 %v3532_v48  ;;  %v3534_v49 = vmul.f32 1.442695, %v8486_v52  ;;  %v6620_v62 = vpop.eup %6619 }
 0x5bd   :  { %v3616_v36 = vsel %vm8608_vm10, %v3613_v0, %v3610_v5  ;;  %v3648_v19 = vadd.f32 1.0, %v3647_v6  ;;  %v9846_v45 = vand.u32 4294901760, %v8507_v60  ;;  %v9847_v44 = vand.u32 4294901760, %v8530_v29 }
 0x5be   :  { %v9653_v61 = vand.u32 4294901760, %v8550_v53  ;;  %v3688_v35 = vsel %vm3496_vm9, %v8420_v63, %v3616_v36  ;;  %v3619_v48 = vmul.f32 0.6931472, %v6620_v62  ;;  %v3631_v12 = vmul.f32 %v8566_v40, %v3630_v25 }
 0x5bf   :  { %v8646_v17 = vpack.c.bf16 %v9847_v44, %v9846_v45  ;;  %vm3500_vm0 = vcmp.gt.f32.partialorder %v8461_v39, 20.0  ;;  %6631 = vpow2.f32 %v3534_v49  ;;  %v3781_v0 = vand.u32 4294901760, %v3688_v35 }
 0x5c0   :  { %vm8654_vm1 = vcmp.lt.f32.partialorder %v3641_v37, 0.0004427343  ;;  %v9850_v60 = vand.u32 4294901760, %v8545_v34  ;;  %v9652_v6 = vand.u32 4294901760, %v8573_v32  ;;  %v6622_v63 = vpop.eup %6621  ;;  %v3625_v40 = vsel %vm8614_vm11, %v3622_v21, %v3619_v48 }
 0x5c1   :  { %5920 = vmatprep.subr.bf16.mxu1 %v8646_v17  ;;  %v8670_v25 = vsub.f32 %v8550_v53, %v9653_v61  ;;  %v3944_v5 = vand.u32 4294901760, %v8564_v50  ;;  %v3956_v37 = vand.u32 4294901760, %v8584_v13  ;;  %v6624_v34 = vpop.eup %6623  ;;  %v3628_v49 = vmul.f32 0.6931472, %v6622_v63 }
 0x5c2   :  { %v8661_v29 = vpack.c.bf16 %v3775_v28, %v9850_v60  ;;  %5922 = vmatpush1.bf16.msra.mxu1 %v8525_v59  ;;  %v3640_v62 = vmul.f32 %v8568_v27, %v3639_v56  ;;  %v3649_v36 = vmul.f32 %v8591_v38, %v3648_v19  ;;  %vm8676_vm2 = vcmp.lt.f32.partialorder %v3650_v20, 0.0004427343  ;;  %v6626_v44 = vpop.eup %6625 }
 0x5c3   :  { %v8681_v21 = vsub.f32 %v3688_v35, %v3781_v0  ;;  %v3689_v50 = vsel %vm3497_vm12, %v8422_v58, %v3625_v40  ;;  %v3637_v45 = vmul.f32 0.6931472, %v6624_v34  ;;  %v8686_v13 = vpack.c.bf16 %v3956_v37, %v3944_v5 }
 0x5c4   :  { %5924 = vmatprep.subr.bf16.mxu1 %v8661_v29  ;;  %v8688_v48 = vsub.f32 %v3687_v26, %v3775_v28  ;;  %v3634_v27 = vsel %vm8628_vm13, %v3631_v12, %v3628_v49  ;;  %v3949_v38 = vsub.f32 %v8573_v32, %v9652_v6  ;;  %v9651_v56 = vand.u32 4294901760, %v8589_v11  ;;  %v6628_v20 = vpop.eup %6627 }
 0x5c5   :  { %v3690_v58 = vsel %vm3498_vm14, %v8430_v22, %v3634_v27  ;;  %v3643_v19 = vsel %vm8654_vm1, %v3640_v62, %v3637_v45  ;;  %v3646_v35 = vmul.f32 0.6931472, %v6626_v44  ;;  %v3938_v28 = vand.u32 4294901760, %v8670_v25 }
 0x5c6   :  { %5926 = vmatpush1.bf16.msra.mxu1 %v8576_v47  ;;  %v3779_v12 = vand.u32 4294901760, %v3689_v50  ;;  %v3785_v2 = vand.u32 4294901760, %v3690_v58  ;;  %v3691_v26 = vsel %vm3499_vm15, %v8434_v41, %v3643_v19  ;;  %v3653_v60 = vadd.f32 1.0, %v6628_v20  ;;  %v8706_v63 = vpop.eup %6629 }
 0x5c7   :  { %v9649_v40 = vand.u32 4294901760, %v8681_v21  ;;  %v3783_v22 = vand.u32 4294901760, %v3691_v26  ;;  %v3652_v33 = vsel %vm8676_vm2, %v3649_v36, %v3646_v35  ;;  %v3656_v5 = vmul.f32 -0.5, %v6628_v20 }
 0x5c8   :  { %v8711_v37 = vpack.c.bf16 %v3785_v2, %v3781_v0  ;;  %v8713_v34 = vsub.f32 %v3690_v58, %v3785_v2  ;;  %v8718_v25 = vsel %vm3500_vm0, %v8461_v39, %v3652_v33  ;;  %6633 = vlog2.f32 %v3653_v60 }
 0x5c9   :  { %v8720_v41 = vpop.eup %6631  ;;  %v9654_v49 = vand.u32 4294901760, %v8718_v25  ;;  %v3659_v62 = vand.u32 2147483647, %v6628_v20  ;;  %v3950_v45 = vand.u32 4294901760, %v3949_v38  ;;  %v3961_v36 = vsub.f32 %v8589_v11, %v9651_v56 }
 0x5ca   :  { %v9650_v0 = vand.u32 4294901760, %v8713_v34  ;;  %v3657_v3 = vadd.f32 1.0, %v3656_v5  ;;  %v3662_v44 = vadd.f32 1.0, %v8706_v63  ;;  %v3665_v27 = vmul.f32 -0.5, %v8706_v63 }
 0x5cb   :  { %v8729_v39 = vsub.f32 %v3689_v50, %v3779_v12  ;;  %v3671_v58 = vadd.f32 1.0, %v8720_v41  ;;  %v3674_v19 = vmul.f32 -0.5, %v8720_v41  ;;  %v3972_v35 = vand.u32 4294901760, %v8688_v48 }
 0x5cc   :  { %v3991_v38 = vsub.f32 %v8681_v21, %v9649_v40  ;;  %v8737_v2 = vsub.f32 %v3691_v26, %v3783_v22  ;;  %6635 = vlog2.f32 %v3662_v44  ;;  %v3666_v60 = vadd.f32 1.0, %v3665_v27 }
 0x5cd   :  { %v4003_v33 = vsub.f32 %v8713_v34, %v9650_v0  ;;  %vm3501_vm4 = vcmp.gt.f32.partialorder %v8468_v55, 20.0  ;;  %vm8743_vm5 = vcmp.lt.f32.partialorder %v3659_v62, 0.0004427343  ;;  %v3668_v5 = vand.u32 2147483647, %v8706_v63 }
 0x5ce   :  { %6637 = vlog2.f32 %v3671_v58  ;;  %v8751_v26 = vsub.f32 %v8718_v25, %v9654_v49  ;;  %v3658_v44 = vmul.f32 %v6628_v20, %v3657_v3  ;;  %v8753_v27 = vpack.c.bf16 %v3783_v22, %v3779_v12 }
 0x5cf   :  { %v8755_v40 = vpack.c.bf16 %v3950_v45, %v3938_v28  ;;  %v3667_v0 = vmul.f32 %v8706_v63, %v3666_v60  ;;  %v3675_v56 = vadd.f32 1.0, %v3674_v19  ;;  %v3677_v62 = vand.u32 2147483647, %v8720_v41 }
 0x5d0   :  { %9855 = vst [vmem:[#allocation9_spill] sm:$0xff] %v8753_v27  ;;  %v3973_v6 = vsub.f32 %v8688_v48, %v3972_v35  ;;  %5928 = vmatprep.subr.bf16.mxu1 %v8753_v27  ;;  %v3968_v58 = vand.u32 4294901760, %v8604_v7  ;;  %v3980_v61 = vand.u32 4294901760, %v8621_v30  ;;  %v3984_v49 = vand.u32 4294901760, %v8729_v39 }
 0x5d1   :  { %v3996_v20 = vand.u32 4294901760, %v8737_v2  ;;  %5930 = vmatpush1.bf16.msra.mxu1 %v8711_v37  ;;  %v3962_v28 = vand.u32 4294901760, %v3961_v36  ;;  %v3992_v63 = vand.u32 4294901760, %v3991_v38  ;;  %v4004_v22 = vand.u32 4294901760, %v4003_v33 }
 0x5d2   :  { %v3974_v12 = vand.u32 4294901760, %v3973_v6  ;;  %v6634_v45 = vpop.eup %6633  ;;  %v8766_v3 = vpack.c.bf16 %v3980_v61, %v3968_v58  ;;  %v3985_v19 = vsub.f32 %v8729_v39, %v3984_v49  ;;  %v9859_v50 = vand.u32 4294901760, %v8520_v1  ;;  %v3716_v6 = vld [vmem:[#allocation3 + $0xd8] sm:$0xff] }
 0x5d3   :  { %v3997_v60 = vsub.f32 %v8737_v2, %v3996_v20  ;;  %v3655_v30 = vmul.f32 0.6931472, %v6634_v45  ;;  %v8774_v47 = vpack.c.bf16 %v4004_v22, %v3992_v63  ;;  %v9856_v63 = vand.u32 4294901760, %v8550_v53 }
 0x5d4   :  { %v8772_v27 = vpack.c.bf16 %v3974_v12, %v3962_v28  ;;  %v3986_v36 = vand.u32 4294901760, %v3985_v19  ;;  %v9857_v22 = vand.u32 4294901760, %v8573_v32  ;;  %v9862_v12 = vand.u32 4294901760, %v8589_v11 }
 0x5d5   :  { %v3998_v38 = vand.u32 4294901760, %v3997_v60  ;;  %v3661_v58 = vsel %vm8743_vm5, %v3658_v44, %v3655_v30  ;;  %v9860_v44 = vand.u32 4294901760, %v8534_v43  ;;  %v9864_v7 = vand.u32 4294901760, %v8553_v9 }
 0x5d6   :  { %v8792_v45 = vpack.c.bf16 %v9857_v22, %v9856_v63  ;;  %v6636_v19 = vpop.eup %6635  ;;  %v3693_v60 = vsel %vm3501_vm4, %v8468_v55, %v3661_v58  ;;  %v8807_v28 = vpack.c.bf16 %v3972_v35, %v9862_v12  ;;  %v9865_v55 = vand.u32 4294901760, %v8578_v51 }
 0x5d7   :  { %v8797_v33 = vpack.c.bf16 %v3998_v38, %v3986_v36  ;;  %v8803_v30 = vpack.c.bf16 %v9860_v44, %v9859_v50  ;;  %v3787_v63 = vand.u32 4294901760, %v3693_v60  ;;  %v3664_v22 = vmul.f32 0.6931472, %v6636_v19 }
 0x5d8   :  { %9858 = vst [vmem:[#allocation16_spill] sm:$0xff] %v8792_v45  ;;  %9863 = vst [vmem:[#allocation10_spill] sm:$0xff] %v8807_v28  ;;  %v6638_v61 = vpop.eup %6637  ;;  %v8813_v36 = vpack.c.bf16 %v9865_v55, %v9864_v7  ;;  %v8815_v38 = vpack.c.bf16 %v3996_v20, %v3984_v49  ;;  %vm3669_vm6 = vcmp.lt.f32.partialorder %v3668_v5, 0.0004427343  ;;  %v3676_v50 = vmul.f32 %v8720_v41, %v3675_v56 }
 0x5d9   :  { %9861 = vst [vmem:[#allocation11_spill] sm:$0xff] %v8803_v30  ;;  %v3673_v58 = vmul.f32 0.6931472, %v6638_v61  ;;  %v9868_v44 = vand.u32 4294901760, %v8681_v21  ;;  %v9869_v35 = vand.u32 4294901760, %v8713_v34  ;;  %v8824_v19 = vsub.f32 %v3693_v60, %v3787_v63 }
 0x5da   :  { %9866 = vst [vmem:[#allocation12_spill] sm:$0xff] %v8813_v36  ;;  %9867 = vst [vmem:[#allocation13_spill] sm:$0xff] %v8815_v38  ;;  %vm3502_vm7 = vcmp.gt.f32.partialorder %v8481_v57, 20.0  ;;  %v3670_v28 = vsel %vm3669_vm6, %v3667_v0, %v3664_v22  ;;  %vm3678_vm8 = vcmp.lt.f32.partialorder %v3677_v62, 0.0004427343  ;;  %vm3503_vm9 = vcmp.gt.f32.partialorder %v8486_v52, 20.0 }
 0x5db   :  { %v8822_v12 = vpack.c.bf16 %v9869_v35, %v9868_v44  ;;  %v3694_v7 = vsel %vm3502_vm7, %v8481_v57, %v3670_v28  ;;  %v3679_v49 = vsel %vm3678_vm8, %v3676_v50, %v3673_v58  ;;  %v3749_v5 = vsel %vm1156_vm3, %v3716_v6, 0  ;;  %v3717_v62 = vld [vmem:[#allocation3 + $0xe0] sm:$0xff] }
 0x5dc   :  { %v4014_v56 = vand.u32 4294901760, %v8751_v26  ;;  %v3793_v41 = vand.u32 4294901760, %v3694_v7  ;;  %v3695_v20 = vsel %vm3503_vm9, %v8486_v52, %v3679_v49  ;;  %v9871_v60 = vand.u32 4294901760, %v8418_v42 }
 0x5dd   :  { %9870 = vst [vmem:[#allocation14_spill] sm:$0xff] %v8822_v12  ;;  %v3791_v61 = vand.u32 4294901760, %v3695_v20  ;;  %v4008_v0 = vand.u32 4294901760, %v8824_v19  ;;  %v9872_v57 = vand.u32 4294901760, %v8718_v25  ;;  %v9659_v6 = vand.u32 4294901760, %v8437_v4 }
 0x5de   :  { %v3849_v55 = vsub.f32 %v8418_v42, %v9871_v60  ;;  %v8840_v22 = vsub.f32 %v3694_v7, %v3793_v41  ;;  %v8843_v58 = vand.u32 4294901760, %v3749_v5  ;;  %v8851_v44 = vsub.f32 %v8427_v46, %v8440_v31 }
 0x5df   :  { %v8838_v28 = vpack.c.bf16 %v3793_v41, %v9872_v57  ;;  %v8845_v50 = vsub.f32 %v3695_v20, %v3791_v61  ;;  %v8847_v52 = vpack.c.bf16 %v3791_v61, %v3787_v63  ;;  %v4015_v35 = vsub.f32 %v8751_v26, %v4014_v56  ;;  %v3718_v61 = vld [vmem:[#allocation3 + $0xe8] sm:$0xff] }
 0x5e0   :  { %v4026_v25 = vand.u32 4294901760, %v8840_v22  ;;  %v3752_v49 = vsel %vm1156_vm3, %v3717_v62, 0  ;;  %v3850_v41 = vand.u32 4294901760, %v3849_v55  ;;  %v4009_v20 = vsub.f32 %v8824_v19, %v4008_v0 }
 0x5e1   :  { %9873 = vst [vmem:[#allocation15_spill] sm:$0xff] %v8838_v28  ;;  %5932 = vmatprep.subr.bf16.mxu1 %v8847_v52  ;;  %v4020_v63 = vand.u32 4294901760, %v8845_v50  ;;  %v3860_v62 = vsub.f32 %v8437_v4, %v9659_v6  ;;  %v8869_v57 = vsub.f32 %v3749_v5, %v8843_v58  ;;  %v3870_v7 = vand.u32 4294901760, %v8851_v44  ;;  %v3719_v5 = vld [vmem:[#allocation3 + $0xf0] sm:$0xff] }
 0x5e2   :  { %v4027_v60 = vsub.f32 %v8840_v22, %v4026_v25  ;;  %5934 = vmatpush1.bf16.msra.mxu1 %v8838_v28  ;;  %v8871_v55 = vpack.c.bf16 %v4026_v25, %v4014_v56  ;;  %v8876_v46 = vand.u32 4294901760, %v3752_v49  ;;  %v4016_v36 = vand.u32 4294901760, %v4015_v35 }
 0x5e3   :  { %3796 = vmatprep.subr.mxu1 %v6772_v14  ;;  %v4021_v12 = vsub.f32 %v8845_v50, %v4020_v63  ;;  %v8878_v38 = vpack.c.bf16 %v4020_v63, %v4008_v0  ;;  %v3755_v45 = vsel %vm1156_vm3, %v3718_v61, 0  ;;  %v4010_v6 = vand.u32 4294901760, %v4009_v20 }
 0x5e4   :  { %9874 = vst [vmem:[#allocation17_spill] sm:$0xff] %v8871_v55  ;;  %v4028_v30 = vand.u32 4294901760, %v4027_v60  ;;  %v3861_v56 = vand.u32 4294901760, %v3860_v62  ;;  %v3881_v25 = vand.u32 4294901760, %v8869_v57  ;;  %v3871_v0 = vsub.f32 %v8851_v44, %v3870_v7 }
 0x5e5   :  { %v4022_v28 = vand.u32 4294901760, %v4021_v12  ;;  %v8888_v63 = vsub.f32 %v3752_v49, %v8876_v46  ;;  %v8890_v20 = vand.u32 4294901760, %v3755_v45  ;;  %v3758_v12 = vsel %vm1156_vm3, %v3719_v5, 0 }
 0x5e6   :  { %3798 = vmatpush1.msra.mxu1 %v6770_v10  ;;  %v5949_v55 = vpack.c.bf16 %v4028_v30, %v4016_v36  ;;  %v3720_v30 = vld [vmem:[#allocation3 + $0xf8] sm:$0xff]  ;;  %v3872_v36 = vand.u32 4294901760, %v3871_v0  ;;  %v8903_v49 = vand.u32 4294901760, %v3758_v12 }
 0x5e7   :  { %3851 = vmatmul.mubr.f32.vlgmr.msra.gmra.mrb[32].mxu1 %v3850_v41  ;;  %5936 = vmatprep.subr.bf16.mxu1 %v8755_v40  ;;  %v5947_v35 = vpack.c.bf16 %v4022_v28, %v4010_v6  ;;  %v3882_v40 = vsub.f32 %v8869_v57, %v3881_v25  ;;  %v3892_v28 = vand.u32 4294901760, %v8888_v63  ;;  %v8901_v6 = vsub.f32 %v3755_v45, %v8890_v20 }
 0x5e8   :  { %5938 = vmatpush1.bf16.msra.mxu1 %v8686_v13  ;;  %3856 = vmatprep.mubr.f32.mxu1 %v9732_v54  ;;  %v3761_v13 = vsel %vm1156_vm3, %v3720_v30, 0  ;;  %v8914_v45 = vsub.f32 %v3758_v12, %v8903_v49 }
 0x5e9   :  { %5940 = vmatprep.subr.bf16.mxu1 %v8772_v27  ;;  %v3883_v27 = vand.u32 4294901760, %v3882_v40  ;;  %v3893_v41 = vsub.f32 %v8888_v63, %v3892_v28  ;;  %v3903_v61 = vand.u32 4294901760, %v8901_v6  ;;  %v8916_v60 = vand.u32 4294901760, %v3761_v13 }
 0x5ea   :  { %v3914_v62 = vand.u32 4294901760, %v8914_v45  ;;  %v9878_v40 = vpack.c.bf16 %v8578_v51, %v8553_v9  ;;  %v9882_v9 = vpack.c.bf16 %v8840_v22, %v8751_v26  ;;  %v9883_v51 = vld [vmem:[#allocation8_spill] sm:$0xff]  ;;  %v9890_v26 = vand.u32 4294901760, %v8437_v4  ;;  %v9892_v22 = vld [vmem:[#allocation13_spill] sm:$0xff] }
 0x5eb   :  { %3862 = vmatmul.mubr.f32.gmra.mrb[34].mxu1 %v3861_v56  ;;  %v8925_v5 = vsub.f32 %v3761_v13, %v8916_v60  ;;  %v5003_v13 = vld [vmem:[%s9598_s2] sm:$0xff] }
 0x5ec   :  { %5942 = vmatpush1.bf16.msra.mxu1 %v8766_v3  ;;  %3867 = vmatprep.mubr.f32.mxu1 %v9732_v54  ;;  %v3894_v3 = vand.u32 4294901760, %v3893_v41  ;;  %v3915_v56 = vsub.f32 %v8914_v45, %v3914_v62 }
 0x5ed   :  { %5944 = vmatprep.subr.bf16.mxu1 %v8797_v33  ;;  %v3904_v33 = vsub.f32 %v8901_v6, %v3903_v61  ;;  %v3925_v0 = vand.u32 4294901760, %v8925_v5 }
 0x5ef   :  { %3873 = vmatmul.mubr.f32.gmra.mrb[36].mxu1 %v3872_v36  ;;  %v3926_v12 = vsub.f32 %v8925_v5, %v3925_v0  ;;  %v9879_v36 = vpack.c.bf16 %v8737_v2, %v8729_v39  ;;  %v9888_v39 = vld [vmem:[#allocation11_spill] sm:$0xff]  ;;  %v9889_v2 = vld [vmem:[#allocation10_spill] sm:$0xff] }
 0x5f0   :  { %5946 = vmatpush1.bf16.msra.mxu1 %v8774_v47  ;;  %3878 = vmatprep.mubr.f32.mxu1 %v9732_v54  ;;  %v3905_v47 = vand.u32 4294901760, %v3904_v33 }
 0x5f1   :  { %5948 = vmatprep.subr.bf16.mxu1 %v5947_v35  ;;  %v9875_v35 = vpack.c.bf16 %v8573_v32, %v8550_v53  ;;  %v3927_v30 = vand.u32 4294901760, %v3926_v12  ;;  %v9876_v53 = vpack.c.bf16 %v8534_v43, %v8520_v1  ;;  %v9877_v32 = vpack.c.bf16 %v8688_v48, %v8589_v11  ;;  %v9884_v11 = vld [vmem:[#allocation9_spill] sm:$0xff]  ;;  %v9886_v48 = vld [vmem:[#allocation16_spill] sm:$0xff] }
 0x5f2   :  { %v9880_v1 = vpack.c.bf16 %v8713_v34, %v8681_v21  ;;  %v9881_v43 = vpack.c.bf16 %v8845_v50, %v8824_v19  ;;  %v9885_v21 = vld [vmem:[#allocation15_spill] sm:$0xff]  ;;  %v9887_v34 = vand.u32 4294901760, %v8418_v42  ;;  %v9891_v19 = vld [vmem:[#allocation12_spill] sm:$0xff] }
 0x5f3   :  { %3884 = vmatmul.mubr.f32.gmra.mrb[38].mxu1 %v3883_v27  ;;  %v9895_v50 = vld [vmem:[#allocation7_spill] sm:$0xff] }
 0x5f4   :  { %5950 = vmatpush1.bf16.msra.mxu1 %v5949_v55  ;;  %3889 = vmatprep.mubr.f32.mxu1 %v9732_v54  ;;  %v3916_v55 = vand.u32 4294901760, %v3915_v56 }
 0x5f5   :  { %4035 = vmatprep.subr.mxu1 %v6794_v24 }
 0x5f7   :  { %3895 = vmatmul.mubr.f32.gmra.mrb[40].mxu1 %v3894_v3 }
 0x5f8   :  { %4041 = vmatpush1.msra.mxu1 %v6792_v23  ;;  %3900 = vmatprep.mubr.f32.mxu1 %v9732_v54 }
 0x5f9   :  { %5952 = vmatprep.subr.bf16.mxu1 %v9875_v35 }
 0x5fb   :  { %3906 = vmatmul.mubr.f32.gmra.mrb[42].mxu1 %v3905_v47 }
 0x5fc   :  { %3911 = vmatprep.mubr.f32.mxu1 %v9732_v54 }
 0x5ff   :  { %3917 = vmatmul.mubr.f32.gmra.mrb[44].mxu1 %v3916_v55 }
 0x600   :  { %3922 = vmatprep.mubr.f32.mxu1 %v9732_v54 }
 0x603   :  { %3928 = vmatmul.mubr.f32.gmra.mrb[46].mxu1 %v3927_v30 }
 0x604   :  { %4088 = vmatprep.mubr.f32.mxu1 %v9732_v54 }
 0x607   :  { %4090 = vmatmul.mubr.f32.vlgmr.msra.gmra.mrb[32].mxu1 %v8409_v18 }
 0x608   :  { %5954 = vmatpush1.bf16.msra.mxu1 %v9876_v53  ;;  %4095 = vmatprep.mubr.f32.mxu1 %v9732_v54 }
 0x609   :  { %5956 = vmatprep.subr.bf16.mxu1 %v9877_v32 }
 0x60b   :  { %4097 = vmatmul.mubr.f32.gmra.mrb[34].mxu1 %v8424_v8 }
 0x60c   :  { %5958 = vmatpush1.bf16.msra.mxu1 %v9878_v40  ;;  %4102 = vmatprep.mubr.f32.mxu1 %v9732_v54 }
 0x60d   :  { %5960 = vmatprep.subr.bf16.mxu1 %v9879_v36 }
 0x60f   :  { %4104 = vmatmul.mubr.f32.gmra.mrb[36].mxu1 %v8440_v31 }
 0x610   :  { %5962 = vmatpush1.bf16.msra.mxu1 %v9880_v1  ;;  %4109 = vmatprep.mubr.f32.mxu1 %v9732_v54 }
 0x611   :  { %5964 = vmatprep.subr.bf16.mxu1 %v9881_v43 }
 0x613   :  { %4111 = vmatmul.mubr.f32.gmra.mrb[38].mxu1 %v8843_v58 }
 0x614   :  { %5966 = vmatpush1.bf16.msra.mxu1 %v9882_v9  ;;  %4116 = vmatprep.mubr.f32.mxu1 %v9732_v54 }
 0x615   :  { %4195 = vmatprep.subr.mxu1 %v6778_v16 }
 0x617   :  { %4118 = vmatmul.mubr.f32.gmra.mrb[40].mxu1 %v8876_v46 }
 0x618   :  { %4198 = vmatpush1.msra.mxu1 %v6775_v15  ;;  %4123 = vmatprep.mubr.f32.mxu1 %v9732_v54 }
 0x619   :  { %5968 = vmatprep.subr.bf16.mxu1 %v8646_v17 }
 0x61b   :  { %4125 = vmatmul.mubr.f32.gmra.mrb[42].mxu1 %v8890_v20 }
 0x61c   :  { %4130 = vmatprep.mubr.f32.mxu1 %v9732_v54 }
 0x61f   :  { %4132 = vmatmul.mubr.f32.gmra.mrb[44].mxu1 %v8903_v49 }
 0x620   :  { %4137 = vmatprep.mubr.f32.mxu1 %v9732_v54 }
 0x623   :  { %4139 = vmatmul.mubr.f32.gmra.mrb[46].mxu1 %v8916_v60 }
 0x624   :  { %4245 = vmatprep.mubr.f32.mxu1 %v9732_v54 }
 0x627   :  { %4248 = vmatmul.mubr.f32.vlgmr.msra.gmra.mrb[32].mxu1 %v8418_v42  ;;  %v9893_v42 = vld [vmem:[#allocation14_spill] sm:$0xff] }
 0x628   :  { %5970 = vmatpush1.bf16.msra.mxu1 %v8525_v59  ;;  %4253 = vmatprep.mubr.f32.mxu1 %v9732_v54 }
 0x629   :  { %5972 = vmatprep.subr.bf16.mxu1 %v8661_v29 }
 0x62b   :  { %4256 = vmatmul.mubr.f32.gmra.mrb[34].mxu1 %v8437_v4  ;;  %v9894_v4 = vld [vmem:[#allocation17_spill] sm:$0xff] }
 0x62c   :  { %5974 = vmatpush1.bf16.msra.mxu1 %v9883_v51  ;;  %4261 = vmatprep.mubr.f32.mxu1 %v9732_v54 }
 0x62d   :  { %5976 = vmatprep.subr.bf16.mxu1 %v9884_v11 }
 0x62f   :  { %4264 = vmatmul.mubr.f32.gmra.mrb[36].mxu1 %v8851_v44  ;;  %v9896_v44 = vld [vmem:[#allocation6_spill] sm:$0xff] }
 0x630   :  { %5978 = vmatpush1.bf16.msra.mxu1 %v8711_v37  ;;  %4269 = vmatprep.mubr.f32.mxu1 %v9732_v54 }
 0x631   :  { %5980 = vmatprep.subr.bf16.mxu1 %v8847_v52 }
 0x633   :  { %4272 = vmatmul.mubr.f32.gmra.mrb[38].mxu1 %v8869_v57 }
 0x634   :  { %5982 = vmatpush1.bf16.msra.mxu1 %v9885_v21  ;;  %4277 = vmatprep.mubr.f32.mxu1 %v9732_v54 }
 0x635   :  { %4343 = vmatprep.subr.mxu1 %v6772_v14 }
 0x637   :  { %4280 = vmatmul.mubr.f32.gmra.mrb[40].mxu1 %v8888_v63 }
 0x638   :  { %4345 = vmatpush1.msra.mxu1 %v6770_v10  ;;  %4285 = vmatprep.mubr.f32.mxu1 %v9732_v54 }
 0x639   :  { %5984 = vmatprep.subr.bf16.mxu1 %v9886_v48 }
 0x63b   :  { %4288 = vmatmul.mubr.f32.gmra.mrb[42].mxu1 %v8901_v6 }
 0x63c   :  { %4293 = vmatprep.mubr.f32.mxu1 %v9732_v54 }
 0x63f   :  { %4296 = vmatmul.mubr.f32.gmra.mrb[44].mxu1 %v8914_v45 }
 0x640   :  { %4301 = vmatprep.mubr.f32.mxu1 %v9732_v54 }
 0x643   :  { %4304 = vmatmul.mubr.f32.gmra.mrb[46].mxu1 %v8925_v5  ;;  %v9118_v5 = vsel %vm1156_vm3, %v5003_v13, 0 }
 0x644   :  { %4392 = vmatprep.mubr.f32.mxu1 %v9732_v54  ;;  %v9132_v40 = vand.u32 4294901760, %v9118_v5 }
 0x647   :  { %4396 = vmatmul.mubr.f32.vlgmr.msra.gmra.mrb[32].mxu1 %v9887_v34 }
 0x648   :  { %5986 = vmatpush1.bf16.msra.mxu1 %v9888_v39  ;;  %4401 = vmatprep.mubr.f32.mxu1 %v9732_v54 }
 0x649   :  { %5988 = vmatprep.subr.bf16.mxu1 %v9889_v2 }
 0x64b   :  { %4405 = vmatmul.mubr.f32.gmra.mrb[34].mxu1 %v9890_v26 }
 0x64c   :  { %5990 = vmatpush1.bf16.msra.mxu1 %v9891_v19  ;;  %4410 = vmatprep.mubr.f32.mxu1 %v9732_v54 }
 0x64d   :  { %5992 = vmatprep.subr.bf16.mxu1 %v9892_v22 }
 0x64f   :  { %4414 = vmatmul.mubr.f32.gmra.mrb[36].mxu1 %v3870_v7 }
 0x650   :  { %5994 = vmatpush1.bf16.msra.mxu1 %v9893_v42  ;;  %4419 = vmatprep.mubr.f32.mxu1 %v9732_v54 }
 0x651   :  { %5996 = vmatprep.subr.bf16.mxu1 %v8878_v38 }
 0x653   :  { %4423 = vmatmul.mubr.f32.gmra.mrb[38].mxu1 %v3881_v25 }
 0x654   :  { %5998 = vmatpush1.bf16.msra.mxu1 %v9894_v4  ;;  %4428 = vmatprep.mubr.f32.mxu1 %v9732_v54 }
 0x655   :  { %4532 = vmatprep.subr.mxu1 %v9895_v50 }
 0x657   :  { %4432 = vmatmul.mubr.f32.gmra.mrb[40].mxu1 %v3892_v28 }
 0x658   :  { %4536 = vmatpush1.msra.mxu1 %v9896_v44  ;;  %4437 = vmatprep.mubr.f32.mxu1 %v9732_v54 }
 0x659   :  { %6000 = vmatprep.subr.bf16.mxu1 %v8646_v17 }
 0x65b   :  { %4441 = vmatmul.mubr.f32.gmra.mrb[42].mxu1 %v3903_v61 }
 0x65c   :  { %4446 = vmatprep.mubr.f32.mxu1 %v9732_v54 }
 0x65f   :  { %4450 = vmatmul.mubr.f32.gmra.mrb[44].mxu1 %v3914_v62 }
 0x660   :  { %4455 = vmatprep.mubr.f32.mxu1 %v9732_v54 }
 0x663   :  { %4459 = vmatmul.mubr.f32.gmra.mrb[46].mxu1 %v3925_v0 }
 0x664   :  { %4583 = vmatprep.mubr.f32.mxu1 %v9732_v54 }
 0x667   :  { %4585 = vmatmul.mubr.f32.vlgmr.msra.gmra.mrb[32].mxu1 %v8409_v18 }
 0x668   :  { %6002 = vmatpush1.bf16.msra.mxu1 %v8525_v59  ;;  %4590 = vmatprep.mubr.f32.mxu1 %v9732_v54 }
 0x669   :  { %6004 = vmatprep.subr.bf16.mxu1 %v8661_v29 }
 0x66b   :  { %4592 = vmatmul.mubr.f32.gmra.mrb[34].mxu1 %v8424_v8 }
 0x66c   :  { %6006 = vmatpush1.bf16.msra.mxu1 %v9883_v51  ;;  %4597 = vmatprep.mubr.f32.mxu1 %v9732_v54 }
 0x66d   :  { %6008 = vmatprep.subr.bf16.mxu1 %v9884_v11 }
 0x66f   :  { %4599 = vmatmul.mubr.f32.gmra.mrb[36].mxu1 %v8440_v31 }
 0x670   :  { %6010 = vmatpush1.bf16.msra.mxu1 %v8711_v37  ;;  %4604 = vmatprep.mubr.f32.mxu1 %v9732_v54 }
 0x671   :  { %6012 = vmatprep.subr.bf16.mxu1 %v8847_v52 }
 0x673   :  { %4606 = vmatmul.mubr.f32.gmra.mrb[38].mxu1 %v8843_v58 }
 0x674   :  { %6014 = vmatpush1.bf16.msra.mxu1 %v9885_v21  ;;  %4611 = vmatprep.mubr.f32.mxu1 %v9732_v54 }
 0x675   :  { %4673 = vmatprep.subr.mxu1 %v6772_v14 }
 0x677   :  { %4613 = vmatmul.mubr.f32.gmra.mrb[40].mxu1 %v8876_v46 }
 0x678   :  { %4618 = vmatprep.mubr.f32.mxu1 %v9732_v54  ;;  %4675 = vmatpush1.msra.mxu1 %v6770_v10 }
 0x67b   :  { %4620 = vmatmul.mubr.f32.gmra.mrb[42].mxu1 %v8890_v20 }
 0x67c   :  { %4625 = vmatprep.mubr.f32.mxu1 %v9732_v54 }
 0x67f   :  { %4627 = vmatmul.mubr.f32.gmra.mrb[44].mxu1 %v8903_v49 }
 0x680   :  { %4632 = vmatprep.mubr.f32.mxu1 %v9732_v54 }
 0x683   :  { %4634 = vmatmul.mubr.f32.gmra.mrb[46].mxu1 %v8916_v60 }
 0x684   :  { %4722 = vmatprep.mubr.f32.mxu1 %v9732_v54 }
 0x687   :  { %4724 = vmatmul.mubr.f32.vlgmr.msra.gmra.mrb[32].mxu1 %v8409_v18 }
 0x688   :  { %4729 = vmatprep.mubr.f32.mxu1 %v9732_v54 }
 0x68b   :  { %4731 = vmatmul.mubr.f32.gmra.mrb[34].mxu1 %v8424_v8 }
 0x68c   :  { %4736 = vmatprep.mubr.f32.mxu1 %v9732_v54 }
 0x68f   :  { %4738 = vmatmul.mubr.f32.gmra.mrb[36].mxu1 %v8440_v31 }
 0x690   :  { %4743 = vmatprep.mubr.f32.mxu1 %v9732_v54 }
 0x693   :  { %4745 = vmatmul.mubr.f32.gmra.mrb[38].mxu1 %v8843_v58 }
 0x694   :  { %4750 = vmatprep.mubr.f32.mxu1 %v9732_v54 }
 0x697   :  { %4752 = vmatmul.mubr.f32.gmra.mrb[40].mxu1 %v8876_v46 }
 0x698   :  { %4757 = vmatprep.mubr.f32.mxu1 %v9732_v54 }
 0x69b   :  { %4759 = vmatmul.mubr.f32.gmra.mrb[42].mxu1 %v8890_v20 }
 0x69c   :  { %4764 = vmatprep.mubr.f32.mxu1 %v9732_v54 }
 0x69f   :  { %4766 = vmatmul.mubr.f32.gmra.mrb[44].mxu1 %v8903_v49 }
 0x6a0   :  { %4771 = vmatprep.mubr.f32.mxu1 %v9732_v54 }
 0x6a3   :  { %4773 = vmatmul.mubr.f32.gmra.mrb[46].mxu1 %v8916_v60 }
 0x6a4   :  { %5107 = vmatprep.mubr.f32.mxu1 %v9732_v54 }
 0x75a   :  { %v9085_v18 = vpop.f32.mrb[32].mxu1 }
 0x75b   :  { %v4795_v8 = vmul.f32 1.442695, %v9085_v18  ;;  %v9088_v31 = vpop.f32.mrb[33].mxu1  ;;  %vm4779_vm3 = vcmp.gt.f32.partialorder %v9085_v18, 20.0 }
 0x75c   :  { %v4797_v59 = vmul.f32 1.442695, %v9088_v31  ;;  %vm4780_vm12 = vcmp.gt.f32.partialorder %v9088_v31, 20.0 }
 0x75d   :  { %6639 = vpow2.f32 %v4795_v8 }
 0x75e   :  { %6641 = vpow2.f32 %v4797_v59  ;;  %v9091_v17 = vpop.f32.mrb[34].mxu1 }
 0x75f   :  { %v4799_v29 = vmul.f32 1.442695, %v9091_v17  ;;  %v9094_v37 = vpop.f32.mrb[35].mxu1  ;;  %vm4781_vm13 = vcmp.gt.f32.partialorder %v9091_v17, 20.0 }
 0x760   :  { %v4801_v38 = vmul.f32 1.442695, %v9094_v37  ;;  %vm4782_vm2 = vcmp.gt.f32.partialorder %v9094_v37, 20.0 }
 0x761   :  { %6643 = vpow2.f32 %v4799_v29 }
 0x762   :  { %6645 = vpow2.f32 %v4801_v38  ;;  %v9097_v58 = vpop.f32.mrb[36].mxu1 }
 0x763   :  { %v4803_v52 = vmul.f32 1.442695, %v9097_v58  ;;  %v9100_v7 = vpop.f32.mrb[37].mxu1  ;;  %vm4783_vm0 = vcmp.gt.f32.partialorder %v9097_v58, 20.0 }
 0x764   :  { %v4805_v46 = vmul.f32 1.442695, %v9100_v7  ;;  %vm4784_vm4 = vcmp.gt.f32.partialorder %v9100_v7, 20.0 }
 0x765   :  { %6647 = vpow2.f32 %v4803_v52 }
 0x766   :  { %6649 = vpow2.f32 %v4805_v46  ;;  %v9103_v57 = vpop.f32.mrb[38].mxu1 }
 0x767   :  { %v6640_v25 = vpop.eup %6639  ;;  %v4807_v63 = vmul.f32 1.442695, %v9103_v57  ;;  %v9106_v20 = vpop.f32.mrb[39].mxu1  ;;  %vm4785_vm6 = vcmp.gt.f32.partialorder %v9103_v57, 20.0 }
 0x768   :  { %v6642_v28 = vpop.eup %6641  ;;  %v4827_v6 = vadd.f32 1.0, %v6640_v25  ;;  %v4830_v27 = vmul.f32 -0.5, %v6640_v25  ;;  %v4833_v60 = vand.u32 2147483647, %v6640_v25  ;;  %v4809_v51 = vmul.f32 1.442695, %v9106_v20 }
 0x769   :  { %v4836_v49 = vadd.f32 1.0, %v6642_v28  ;;  %6651 = vpow2.f32 %v4807_v63  ;;  %v4839_v41 = vmul.f32 -0.5, %v6642_v28  ;;  %v4842_v47 = vand.u32 2147483647, %v6642_v28 }
 0x76a   :  { %6653 = vlog2.f32 %v4827_v6  ;;  %v9111_v61 = vpop.f32.mrb[40].mxu1  ;;  %v4831_v0 = vadd.f32 1.0, %v4830_v27  ;;  %vm9125_vm10 = vcmp.lt.f32.partialorder %v4833_v60, 0.0004427343  ;;  %vm4786_vm8 = vcmp.gt.f32.partialorder %v9106_v20, 20.0 }
 0x76b   :  { %v6644_v45 = vpop.eup %6643  ;;  %6655 = vlog2.f32 %v4836_v49  ;;  %v9113_v3 = vpop.f32.mrb[41].mxu1  ;;  %v4840_v35 = vadd.f32 1.0, %v4839_v41  ;;  %vm9140_vm11 = vcmp.lt.f32.partialorder %v4842_v47, 0.0004427343  ;;  %v4811_v4 = vmul.f32 1.442695, %v9111_v61 }
 0x76c   :  { %v9115_v33 = vpop.eup %6645  ;;  %v4845_v62 = vadd.f32 1.0, %v6644_v45  ;;  %v4848_v55 = vmul.f32 -0.5, %v6644_v45  ;;  %v4851_v1 = vand.u32 2147483647, %v6644_v45  ;;  %v4832_v34 = vmul.f32 %v6640_v25, %v4831_v0 }
 0x76d   :  { %v4854_v56 = vadd.f32 1.0, %v9115_v33  ;;  %v4857_v43 = vmul.f32 -0.5, %v9115_v33  ;;  %v4860_v21 = vand.u32 2147483647, %v9115_v33  ;;  %v4841_v39 = vmul.f32 %v6642_v28, %v4840_v35 }
 0x76e   :  { %6657 = vlog2.f32 %v4845_v62  ;;  %v9121_v12 = vpop.f32.mrb[42].mxu1  ;;  %v4849_v2 = vadd.f32 1.0, %v4848_v55  ;;  %vm9157_vm14 = vcmp.lt.f32.partialorder %v4851_v1, 0.0004427343  ;;  %v4813_v6 = vmul.f32 1.442695, %v9113_v3 }
 0x76f   :  { %v9123_v30 = vpop.eup %6647  ;;  %6659 = vlog2.f32 %v4854_v56  ;;  %v9129_v32 = vpop.f32.mrb[43].mxu1  ;;  %v4858_v38 = vadd.f32 1.0, %v4857_v43  ;;  %vm9163_vm15 = vcmp.lt.f32.partialorder %v4860_v21, 0.0004427343  ;;  %v4815_v53 = vmul.f32 1.442695, %v9121_v12 }
 0x770   :  { %v9134_v36 = vpop.eup %6649  ;;  %v4863_v9 = vadd.f32 1.0, %v9123_v30  ;;  %v4866_v22 = vmul.f32 -0.5, %v9123_v30  ;;  %v4869_v42 = vand.u32 2147483647, %v9123_v30  ;;  %v4850_v13 = vmul.f32 %v6644_v45, %v4849_v2 }
 0x771   :  { %v4872_v48 = vadd.f32 1.0, %v9134_v36  ;;  %v4875_v52 = vmul.f32 -0.5, %v9134_v36  ;;  %v4878_v27 = vand.u32 2147483647, %v9134_v36 }
 0x772   :  { %6661 = vlog2.f32 %v4863_v9  ;;  %v9147_v26 = vpop.f32.mrb[44].mxu1  ;;  %v4867_v62 = vadd.f32 1.0, %v4866_v22  ;;  %vm9174_vm1 = vcmp.lt.f32.partialorder %v4869_v42, 0.0004427343 }
 0x773   :  { %v9149_v19 = vpop.eup %6651  ;;  %6663 = vlog2.f32 %v4872_v48  ;;  %v9155_v8 = vpop.f32.mrb[45].mxu1  ;;  %v4876_v55 = vadd.f32 1.0, %v4875_v52  ;;  %vm9191_vm5 = vcmp.lt.f32.partialorder %v4878_v27, 0.0004427343  ;;  %v4819_v22 = vmul.f32 1.442695, %v9147_v26 }
 0x774   :  { %v6654_v59 = vpop.eup %6653  ;;  %v4881_v46 = vadd.f32 1.0, %v9149_v19  ;;  %6665 = vpow2.f32 %v4809_v51  ;;  %v4884_v9 = vmul.f32 -0.5, %v9149_v19  ;;  %v4817_v51 = vmul.f32 1.442695, %v9129_v32 }
 0x775   :  { %v6656_v25 = vpop.eup %6655  ;;  %v4829_v63 = vmul.f32 0.6931472, %v6654_v59  ;;  %v4887_v2 = vand.u32 2147483647, %v9149_v19  ;;  %v4877_v59 = vmul.f32 %v9134_v36, %v4876_v55 }
 0x776   :  { %v4838_v49 = vmul.f32 0.6931472, %v6656_v25  ;;  %6667 = vlog2.f32 %v4881_v46  ;;  %v9169_v41 = vpop.f32.mrb[46].mxu1  ;;  %v4885_v52 = vadd.f32 1.0, %v4884_v9 }
 0x777   :  { %v4835_v60 = vsel %vm9125_vm10, %v4832_v34, %v4829_v63  ;;  %6669 = vpow2.f32 %v4811_v4  ;;  %v9178_v56 = vpop.f32.mrb[47].mxu1  ;;  %v4868_v4 = vmul.f32 %v9123_v30, %v4867_v62  ;;  %vm9219_vm7 = vcmp.lt.f32.partialorder %v4887_v2, 0.0004427343 }
 0x778   :  { %v6658_v0 = vpop.eup %6657  ;;  %v4971_v45 = vsel %vm4779_vm3, %v9085_v18, %v4835_v60  ;;  %v4844_v35 = vsel %vm9140_vm11, %v4841_v39, %v4838_v49  ;;  %6671 = vpow2.f32 %v4813_v6  ;;  %v4859_v18 = vmul.f32 %v9115_v33, %v4858_v38 }
 0x779   :  { %v6660_v1 = vpop.eup %6659  ;;  %v4847_v43 = vmul.f32 0.6931472, %v6658_v0  ;;  %v5027_v21 = vand.u32 4294901760, %v4971_v45  ;;  %v9198_v34 = vsel %vm4780_vm12, %v9088_v31, %v4844_v35  ;;  %6673 = vpow2.f32 %v4815_v53 }
 0x77a   :  { %v4856_v48 = vmul.f32 0.6931472, %v6660_v1  ;;  %6675 = vpow2.f32 %v4817_v51  ;;  %v5025_v25 = vand.u32 4294901760, %v9198_v34  ;;  %v4886_v55 = vmul.f32 %v9149_v19, %v4885_v52 }
 0x77b   :  { %v4853_v39 = vsel %vm9157_vm14, %v4850_v13, %v4847_v43  ;;  %v9210_v46 = vsub.f32 %v4971_v45, %v5027_v21  ;;  %6677 = vpow2.f32 %v4819_v22  ;;  %vm4787_vm10 = vcmp.gt.f32.partialorder %v9111_v61, 20.0 }
 0x77c   :  { %v6662_v42 = vpop.eup %6661  ;;  %v4973_v33 = vsel %vm4781_vm13, %v9091_v17, %v4853_v39  ;;  %v4862_v63 = vsel %vm9163_vm15, %v4859_v18, %v4856_v48  ;;  %vm4788_vm12 = vcmp.gt.f32.partialorder %v9113_v3, 20.0  ;;  %vm4789_vm13 = vcmp.gt.f32.partialorder %v9121_v12, 20.0 }
 0x77d   :  { %v6664_v31 = vpop.eup %6663  ;;  %v5031_v38 = vand.u32 4294901760, %v4973_v33  ;;  %v4865_v29 = vmul.f32 0.6931472, %v6662_v42  ;;  %v9233_v47 = vsel %vm4782_vm2, %v9094_v37, %v4862_v63  ;;  %v9663_v53 = vand.u32 4294901760, %v9210_v46 }
 0x77e   :  { %v4874_v6 = vmul.f32 0.6931472, %v6664_v31  ;;  %v6666_v49 = vpop.eup %6665  ;;  %v5029_v48 = vand.u32 4294901760, %v9233_v47  ;;  %vm4790_vm15 = vcmp.gt.f32.partialorder %v9129_v32, 20.0 }
 0x77f   :  { %v9215_v17 = vpack.c.bf16 %v5031_v38, %v5027_v21  ;;  %v4871_v30 = vsel %vm9174_vm1, %v4868_v4, %v4865_v29  ;;  %v9223_v27 = vsub.f32 %v4973_v33, %v5031_v38  ;;  %v4890_v62 = vadd.f32 1.0, %v6666_v49 }
 0x780   :  { %v6668_v13 = vpop.eup %6667  ;;  %v4975_v28 = vsel %vm4783_vm0, %v9097_v58, %v4871_v30  ;;  %v4880_v60 = vsel %vm9191_vm5, %v4877_v59, %v4874_v6  ;;  %v9240_v58 = vsub.f32 %v9198_v34, %v5025_v25  ;;  %v4893_v19 = vmul.f32 -0.5, %v6666_v49 }
 0x781   :  { %v6670_v0 = vpop.eup %6669  ;;  %v5035_v45 = vand.u32 4294901760, %v4975_v28  ;;  %v4883_v35 = vmul.f32 0.6931472, %v6668_v13  ;;  %v9245_v1 = vsel %vm4784_vm4, %v9100_v7, %v4880_v60  ;;  %6679 = vlog2.f32 %v4890_v62 }
 0x782   :  { %v6672_v43 = vpop.eup %6671  ;;  %v4899_v51 = vadd.f32 1.0, %v6670_v0  ;;  %v9662_v21 = vand.u32 4294901760, %v9223_v27  ;;  %v4821_v7 = vmul.f32 1.442695, %v9155_v8  ;;  %v5033_v11 = vand.u32 4294901760, %v9245_v1 }
 0x783   :  { %v9247_v37 = vsub.f32 %v4975_v28, %v5035_v45  ;;  %v4889_v9 = vsel %vm9219_vm7, %v4886_v55, %v4883_v35  ;;  %v4902_v2 = vmul.f32 -0.5, %v6670_v0  ;;  %v9258_v22 = vpop.eup %6673  ;;  %v9263_v42 = vsub.f32 %v9210_v46, %v9663_v53 }
 0x784   :  { %v4977_v18 = vsel %vm4785_vm6, %v9103_v57, %v4889_v9  ;;  %6681 = vlog2.f32 %v4899_v51  ;;  %v4896_v33 = vand.u32 2147483647, %v6666_v49  ;;  %v4908_v4 = vadd.f32 1.0, %v6672_v43  ;;  %v9265_v31 = vpop.eup %6675 }
 0x785   :  { %v5039_v39 = vand.u32 4294901760, %v4977_v18  ;;  %v4911_v59 = vmul.f32 -0.5, %v6672_v43  ;;  %v9664_v57 = vand.u32 4294901760, %v9247_v37  ;;  %v4894_v52 = vadd.f32 1.0, %v4893_v19  ;;  %v9283_v36 = vpop.eup %6677 }
 0x786   :  { %v9276_v63 = vsub.f32 %v9223_v27, %v9662_v21  ;;  %v9281_v6 = vsub.f32 %v9233_v47, %v5029_v48  ;;  %v4905_v30 = vand.u32 2147483647, %v6670_v0  ;;  %6683 = vlog2.f32 %v4908_v4 }
 0x787   :  { %v9268_v38 = vpack.c.bf16 %v5039_v39, %v5035_v45  ;;  %v9270_v29 = vsub.f32 %v4977_v18, %v5039_v39  ;;  %v9288_v13 = vsub.f32 %v9245_v1, %v5033_v11  ;;  %v4903_v28 = vadd.f32 1.0, %v4902_v2 }
 0x788   :  { %v4912_v60 = vadd.f32 1.0, %v4911_v59  ;;  %v4917_v62 = vadd.f32 1.0, %v9258_v22  ;;  %vm9292_vm9 = vcmp.lt.f32.partialorder %v4896_v33, 0.0004427343  ;;  %v4914_v55 = vand.u32 2147483647, %v6672_v43 }
 0x789   :  { %v9666_v45 = vand.u32 4294901760, %v9270_v29  ;;  %v4926_v9 = vadd.f32 1.0, %v9265_v31  ;;  %v9301_v19 = vsub.f32 %v9247_v37, %v9664_v57  ;;  %v4895_v51 = vmul.f32 %v6666_v49, %v4894_v52 }
 0x78a   :  { %6685 = vlog2.f32 %v4917_v62  ;;  %v4920_v18 = vmul.f32 -0.5, %v9258_v22  ;;  %vm9304_vm3 = vcmp.lt.f32.partialorder %v4905_v30, 0.0004427343  ;;  %v4923_v33 = vand.u32 2147483647, %v9258_v22 }
 0x78b   :  { %v6680_v39 = vpop.eup %6679  ;;  %6687 = vlog2.f32 %v4926_v9  ;;  %v4935_v4 = vadd.f32 1.0, %v9283_v36  ;;  %v4904_v21 = vmul.f32 %v6670_v0, %v4903_v28  ;;  %v4913_v53 = vmul.f32 %v6672_v43, %v4912_v60 }
 0x78c   :  { %v4892_v59 = vmul.f32 0.6931472, %v6680_v39  ;;  %v4929_v57 = vmul.f32 -0.5, %v9265_v31  ;;  %v9314_v49 = vsub.f32 %v9270_v29, %v9666_v45  ;;  %vm9316_vm11 = vcmp.lt.f32.partialorder %v4914_v55, 0.0004427343 }
 0x78d   :  { %6689 = vlog2.f32 %v4935_v4  ;;  %v4823_v30 = vmul.f32 1.442695, %v9169_v41  ;;  %v4921_v0 = vadd.f32 1.0, %v4920_v18  ;;  %v4938_v43 = vmul.f32 -0.5, %v9283_v36 }
 0x78e   :  { %v6682_v62 = vpop.eup %6681  ;;  %v4898_v9 = vsel %vm9292_vm9, %v4895_v51, %v4892_v59  ;;  %6691 = vpow2.f32 %v4821_v7  ;;  %vm9329_vm14 = vcmp.lt.f32.partialorder %v4923_v33, 0.0004427343  ;;  %v4932_v35 = vand.u32 2147483647, %v9265_v31 }
 0x78f   :  { %v4978_v28 = vsel %vm4786_vm8, %v9106_v20, %v4898_v9  ;;  %v4901_v60 = vmul.f32 0.6931472, %v6682_v62  ;;  %v4930_v18 = vadd.f32 1.0, %v4929_v57  ;;  %6693 = vpow2.f32 %v4823_v30 }
 0x790   :  { %v5037_v51 = vand.u32 4294901760, %v4978_v28  ;;  %v4825_v7 = vmul.f32 1.442695, %v9178_v56  ;;  %v6684_v39 = vpop.eup %6683  ;;  %v4941_v4 = vand.u32 2147483647, %v9283_v36  ;;  %v9343_v33 = vpack.c.bf16 %v5029_v48, %v5025_v25 }
 0x791   :  { %v4907_v20 = vsel %vm9304_vm3, %v4904_v21, %v4901_v60  ;;  %v9671_v59 = vand.u32 4294901760, %v9240_v58  ;;  %v4910_v30 = vmul.f32 0.6931472, %v6684_v39  ;;  %vm4791_vm0 = vcmp.gt.f32.partialorder %v9147_v26, 20.0 }
 0x792   :  { %v4979_v57 = vsel %vm4787_vm10, %v9111_v61, %v4907_v20  ;;  %v4939_v62 = vadd.f32 1.0, %v4938_v43  ;;  %6695 = vpow2.f32 %v4825_v7  ;;  %v4922_v21 = vmul.f32 %v9258_v22, %v4921_v0  ;;  %6016 = vmatprep.subr.bf16.mxu1 %v9343_v33 }
 0x793   :  { %vm9351_vm1 = vcmp.lt.f32.partialorder %v4932_v35, 0.0004427343  ;;  %v9358_v34 = vpack.c.bf16 %v5037_v51, %v5033_v11  ;;  %v9670_v25 = vand.u32 4294901760, %v9281_v6  ;;  %v5043_v47 = vand.u32 4294901760, %v4979_v57  ;;  %6018 = vmatpush1.bf16.msra.mxu1 %v9215_v17 }
 0x794   :  { %v6686_v61 = vpop.eup %6685  ;;  %v4916_v48 = vsel %vm9316_vm11, %v4913_v53, %v4910_v30  ;;  %v5129_v22 = vand.u32 4294901760, %v9263_v42  ;;  %v5141_v9 = vand.u32 4294901760, %v9276_v63  ;;  %v4931_v60 = vmul.f32 %v9265_v31, %v4930_v18 }
 0x795   :  { %v6688_v0 = vpop.eup %6687  ;;  %v4919_v43 = vmul.f32 0.6931472, %v6686_v61  ;;  %vm9367_vm2 = vcmp.lt.f32.partialorder %v4941_v4, 0.0004427343  ;;  %6020 = vmatprep.subr.bf16.mxu1 %v9358_v34  ;;  %v5122_v53 = vsub.f32 %v9240_v58, %v9671_v59  ;;  %v9375_v11 = vsub.f32 %v4978_v28, %v5037_v51 }
 0x796   :  { %v4928_v52 = vmul.f32 0.6931472, %v6688_v0  ;;  %v4940_v42 = vmul.f32 %v9283_v36, %v4939_v62  ;;  %v6033_v63 = vpack.c.bf16 %v5141_v9, %v5129_v22  ;;  %v4980_v31 = vsel %vm4788_vm12, %v9113_v3, %v4916_v48 }
 0x797   :  { %v6690_v35 = vpop.eup %6689  ;;  %v4925_v18 = vsel %vm9329_vm14, %v4922_v21, %v4919_v43  ;;  %v5134_v7 = vsub.f32 %v9281_v6, %v9670_v25  ;;  %v9668_v39 = vand.u32 4294901760, %v9288_v13  ;;  %v9387_v51 = vsub.f32 %v4979_v57, %v5043_v47  ;;  %6022 = vmatpush1.bf16.msra.mxu1 %v9268_v38 }
 0x798   :  { %v6692_v28 = vpop.eup %6691  ;;  %v4981_v36 = vsel %vm4789_vm13, %v9121_v12, %v4925_v18  ;;  %v4934_v20 = vsel %vm9351_vm1, %v4931_v60, %v4928_v52  ;;  %v4937_v3 = vmul.f32 0.6931472, %v6690_v35  ;;  %v5123_v62 = vand.u32 4294901760, %v5122_v53 }
 0x799   :  { %v5047_v55 = vand.u32 4294901760, %v4981_v36  ;;  %v4982_v4 = vsel %vm4790_vm15, %v9129_v32, %v4934_v20  ;;  %v4944_v30 = vadd.f32 1.0, %v6692_v28  ;;  %v9398_v21 = vpop.eup %6693  ;;  %v5041_v57 = vand.u32 4294901760, %v4980_v31 }
 0x79a   :  { %v5045_v61 = vand.u32 4294901760, %v4982_v4  ;;  %v4943_v12 = vsel %vm9367_vm2, %v4940_v42, %v4937_v3  ;;  %v4947_v48 = vmul.f32 -0.5, %v6692_v28  ;;  %v9665_v0 = vand.u32 4294901760, %v9387_v51 }
 0x79b   :  { %v9402_v2 = vpack.c.bf16 %v5047_v55, %v5043_v47  ;;  %v9404_v22 = vsub.f32 %v4981_v36, %v5047_v55  ;;  %v9409_v9 = vsel %vm4791_vm0, %v9147_v26, %v4943_v12  ;;  %6697 = vlog2.f32 %v4944_v30 }
 0x79c   :  { %v9411_v32 = vpop.eup %6695  ;;  %v4950_v43 = vand.u32 2147483647, %v6692_v28  ;;  %v5135_v60 = vand.u32 4294901760, %v5134_v7  ;;  %v5146_v1 = vsub.f32 %v9288_v13, %v9668_v39  ;;  %v9669_v53 = vand.u32 4294901760, %v9409_v9 }
 0x79d   :  { %v9667_v47 = vand.u32 4294901760, %v9404_v22  ;;  %v4948_v52 = vadd.f32 1.0, %v4947_v48  ;;  %v4953_v42 = vadd.f32 1.0, %v9398_v21  ;;  %v4956_v26 = vmul.f32 -0.5, %v9398_v21 }
 0x79e   :  { %v4962_v35 = vadd.f32 1.0, %v9411_v32  ;;  %v4965_v18 = vmul.f32 -0.5, %v9411_v32  ;;  %v5157_v36 = vand.u32 4294901760, %v9375_v11  ;;  %v9424_v7 = vsub.f32 %v4980_v31, %v5041_v57 }
 0x79f   :  { %v9426_v20 = vsub.f32 %v4982_v4, %v5045_v61  ;;  %6699 = vlog2.f32 %v4953_v42  ;;  %v4959_v3 = vand.u32 2147483647, %v9398_v21  ;;  %v5176_v55 = vsub.f32 %v9387_v51, %v9665_v0 }
 0x7a0   :  { %v5188_v30 = vsub.f32 %v9404_v22, %v9667_v47  ;;  %vm4792_vm4 = vcmp.gt.f32.partialorder %v9155_v8, 20.0  ;;  %vm9436_vm5 = vcmp.lt.f32.partialorder %v4950_v43, 0.0004427343  ;;  %6701 = vlog2.f32 %v4962_v35 }
 0x7a1   :  { %v9443_v31 = vsub.f32 %v9409_v9, %v9669_v53  ;;  %v4949_v4 = vmul.f32 %v6692_v28, %v4948_v52  ;;  %v6031_v48 = vpack.c.bf16 %v5135_v60, %v5123_v62  ;;  %v9445_v42 = vpack.c.bf16 %v5045_v61, %v5041_v57 }
 0x7a2   :  { %v4957_v0 = vadd.f32 1.0, %v4956_v26  ;;  %v4966_v45 = vadd.f32 1.0, %v4965_v18  ;;  %v4968_v47 = vand.u32 2147483647, %v9411_v32  ;;  %v5158_v39 = vsub.f32 %v9375_v11, %v5157_v36 }
 0x7a3   :  { %vm9449_vm6 = vcmp.lt.f32.partialorder %v4959_v3, 0.0004427343  ;;  %6032 = vmatprep.subr.bf16.mxu0 %v6031_v48  ;;  %6024 = vmatprep.subr.bf16.mxu1 %v9445_v42  ;;  %v5153_v35 = vand.u32 4294901760, %v9301_v19  ;;  %v5165_v28 = vand.u32 4294901760, %v9314_v49  ;;  %v5169_v62 = vand.u32 4294901760, %v9424_v7 }
 0x7a4   :  { %v5181_v57 = vand.u32 4294901760, %v9426_v20  ;;  %6034 = vmatpush1.bf16.msra.mxu0 %v6033_v63  ;;  %v5147_v61 = vand.u32 4294901760, %v5146_v1  ;;  %v5159_v60 = vand.u32 4294901760, %v5158_v39  ;;  %6026 = vmatpush1.bf16.msra.mxu1 %v9402_v2  ;;  %v5177_v52 = vand.u32 4294901760, %v5176_v55 }
 0x7a5   :  { %v5189_v26 = vand.u32 4294901760, %v5188_v30  ;;  %v6698_v18 = vpop.eup %6697  ;;  %v6037_v3 = vpack.c.bf16 %v5165_v28, %v5153_v35  ;;  %v5170_v48 = vsub.f32 %v9424_v7, %v5169_v62  ;;  %v6047_v19 = vpack.c.bf16 %v9281_v6, %v9240_v58 }
 0x7a6   :  { %v5182_v53 = vsub.f32 %v9426_v20, %v5181_v57  ;;  %v4946_v49 = vmul.f32 0.6931472, %v6698_v18  ;;  %v6035_v25 = vpack.c.bf16 %v5159_v60, %v5147_v61  ;;  %v6049_v63 = vpack.c.bf16 %v9223_v27, %v9210_v46 }
 0x7a7   :  { %v6041_v59 = vpack.c.bf16 %v5189_v26, %v5177_v52  ;;  %v5171_v39 = vand.u32 4294901760, %v5170_v48  ;;  %v9927_v60 = vand.u32 4294901760, %v9240_v58  ;;  %v4958_v12 = vmul.f32 %v9398_v21, %v4957_v0 }
 0x7a8   :  { %v5183_v1 = vand.u32 4294901760, %v5182_v53  ;;  %v4952_v35 = vsel %vm9436_vm5, %v4949_v4, %v4946_v49  ;;  %6036 = vmatprep.subr.bf16.mxu0 %v6035_v25  ;;  %v9928_v53 = vand.u32 4294901760, %v9281_v6  ;;  %v9929_v4 = vand.u32 4294901760, %v9210_v46 }
 0x7a9   :  { %v6700_v26 = vpop.eup %6699  ;;  %v4984_v18 = vsel %vm4792_vm4, %v9155_v8, %v4952_v35  ;;  %6038 = vmatpush1.bf16.msra.mxu0 %v6037_v3  ;;  %v9930_v48 = vand.u32 4294901760, %v9223_v27  ;;  %v9932_v55 = vand.u32 4294901760, %v9247_v37  ;;  %v9933_v8 = vand.u32 4294901760, %v9270_v29 }
 0x7aa   :  { %v9479_v52 = vpack.c.bf16 %v9928_v53, %v9927_v60  ;;  %v6039_v25 = vpack.c.bf16 %v5183_v1, %v5171_v39  ;;  %v6702_v61 = vpop.eup %6701  ;;  %v5049_v28 = vand.u32 4294901760, %v4984_v18  ;;  %v4955_v30 = vmul.f32 0.6931472, %v6700_v26 }
 0x7ab   :  { %v9489_v49 = vpack.c.bf16 %v9930_v48, %v9929_v4  ;;  %v9931_v60 = vand.u32 4294901760, %v9288_v13  ;;  %v9499_v21 = vpack.c.bf16 %v9933_v8, %v9932_v55  ;;  %v4964_v0 = vmul.f32 0.6931472, %v6702_v61 }
 0x7ac   :  { %v4967_v3 = vmul.f32 %v9411_v32, %v4966_v45  ;;  %6040 = vmatprep.subr.bf16.mxu0 %v6039_v25  ;;  %v9502_v39 = vpack.c.bf16 %v5181_v57, %v5169_v62  ;;  %v9934_v1 = vand.u32 4294901760, %v9387_v51  ;;  %v9935_v35 = vand.u32 4294901760, %v9404_v22 }
 0x7ad   :  { %v9493_v53 = vpack.c.bf16 %v5157_v36, %v9931_v60  ;;  %v5192_v36 = vsub.f32 %v4984_v18, %v5049_v28  ;;  %vm4793_vm7 = vcmp.gt.f32.partialorder %v9169_v41, 20.0  ;;  %v4961_v4 = vsel %vm9449_vm6, %v4958_v12, %v4955_v30  ;;  %6042 = vmatpush1.bf16.msra.mxu0 %v6041_v59 }
 0x7ae   :  { %v9508_v26 = vpack.c.bf16 %v9935_v35, %v9934_v1  ;;  %vm4969_vm8 = vcmp.lt.f32.partialorder %v4968_v47, 0.0004427343  ;;  %v4985_v55 = vsel %vm4793_vm7, %v9169_v41, %v4961_v4  ;;  %vm4794_vm9 = vcmp.gt.f32.partialorder %v9178_v56, 20.0 }
 0x7af   :  { %v4970_v45 = vsel %vm4969_vm8, %v4967_v3, %v4964_v0  ;;  %v9517_v32 = vsub.f32 %v9118_v5, %v9132_v40  ;;  %v5199_v62 = vand.u32 4294901760, %v9443_v31  ;;  %v5055_v57 = vand.u32 4294901760, %v4985_v55 }
 0x7b0   :  { %v4986_v61 = vsel %vm4794_vm9, %v9178_v56, %v4970_v45  ;;  %v5193_v25 = vand.u32 4294901760, %v5192_v36  ;;  %v9936_v47 = vand.u32 4294901760, %v9409_v9  ;;  %v9940_v58 = vpack.c.bf16 %v9404_v22, %v9387_v51 }
 0x7b1   :  { %v5053_v18 = vand.u32 4294901760, %v4986_v61  ;;  %v5110_v43 = vand.u32 4294901760, %v9517_v32  ;;  %v5210_v30 = vsub.f32 %v4985_v55, %v5055_v57  ;;  %v5200_v48 = vsub.f32 %v9443_v31, %v5199_v62 }
 0x7b2   :  { %v9524_v41 = vpack.c.bf16 %v5055_v57, %v9936_v47  ;;  %v5194_v56 = vsub.f32 %v5192_v36, %v5193_v25 }
 0x7b3   :  { %v5204_v12 = vsub.f32 %v4986_v61, %v5053_v18  ;;  %v9526_v59 = vpack.c.bf16 %v5053_v18, %v5049_v28  ;;  %v5111_v5 = vsub.f32 %v9517_v32, %v5110_v43  ;;  %v5211_v60 = vand.u32 4294901760, %v5210_v30 }
 0x7b4   :  { %v6061_v8 = vpack.c.bf16 %v5210_v30, %v9443_v31  ;;  %v5201_v55 = vand.u32 4294901760, %v5200_v48  ;;  %v5195_v57 = vand.u32 4294901760, %v5194_v56 }
 0x7b5   :  { %6028 = vmatprep.subr.bf16.mxu1 %v9526_v59  ;;  %v5205_v0 = vand.u32 4294901760, %v5204_v12  ;;  %v6059_v3 = vpack.c.bf16 %v5204_v12, %v5192_v36  ;;  %v5212_v1 = vsub.f32 %v5210_v30, %v5211_v60  ;;  %v6093_v9 = vpack.c.bf16 %v5211_v60, %v5199_v62 }
 0x7b6   :  { %6030 = vmatpush1.bf16.msra.mxu1 %v9524_v41  ;;  %v5112_v4 = vand.u32 4294901760, %v5111_v5  ;;  %v9937_v36 = vpack.c.bf16 %v9375_v11, %v9288_v13 }
 0x7b7   :  { %v5206_v35 = vsub.f32 %v5204_v12, %v5205_v0  ;;  %v6091_v28 = vpack.c.bf16 %v5205_v0, %v5193_v25  ;;  %5058 = vmatprep.subr.mxu1 %v6772_v14  ;;  %v5213_v45 = vand.u32 4294901760, %v5212_v1 }
 0x7b9   :  { %v5207_v61 = vand.u32 4294901760, %v5206_v35  ;;  %v6045_v18 = vpack.c.bf16 %v5213_v45, %v5201_v55 }
 0x7ba   :  { %5060 = vmatpush1.msra.mxu1 %v6770_v10 }
 0x7bb   :  { %v6043_v31 = vpack.c.bf16 %v5207_v61, %v5195_v57  ;;  %5113 = vmatmul.mubr.f32.vlgmr.msra.gmra.mrb[48].mxu1 %v5112_v4 }
 0x7bd   :  { %6044 = vmatprep.subr.bf16.mxu0 %v6043_v31 }
 0x7be   :  { %6046 = vmatpush1.bf16.msra.mxu0 %v6045_v18 }
 0x7bf   :  { %5220 = vmatprep.subr.mxu0 %v6794_v24  ;;  %v9938_v24 = vpack.c.bf16 %v9270_v29, %v9247_v37 }
 0x7c2   :  { %5226 = vmatpush1.msra.mxu0 %v6792_v23  ;;  %v9939_v23 = vpack.c.bf16 %v9426_v20, %v9424_v7 }
 0x7c3   :  { %6048 = vmatprep.subr.bf16.mxu0 %v6047_v19  ;;  %5275 = vmatmul.mubr.f32.vlgmr.msra.gmra.mrb[32].mxu0 %v9132_v40 }
 0x7c4   :  { %6050 = vmatpush1.bf16.msra.mxu0 %v6049_v63  ;;  %5381 = vmatprep.mubr.f32.mxu0 %v9732_v54 }
 0x7c5   :  { %6052 = vmatprep.subr.bf16.mxu0 %v9937_v36 }
 0x7c8   :  { %6054 = vmatpush1.bf16.msra.mxu0 %v9938_v24 }
 0x7c9   :  { %6056 = vmatprep.subr.bf16.mxu0 %v9939_v23 }
 0x7cc   :  { %6058 = vmatpush1.bf16.msra.mxu0 %v9940_v58 }
 0x7cd   :  { %6060 = vmatprep.subr.bf16.mxu0 %v6059_v3 }
 0x7d0   :  { %6062 = vmatpush1.bf16.msra.mxu0 %v6061_v8 }
 0x7d1   :  { %5331 = vmatprep.subr.mxu0 %v6778_v16 }
 0x7d4   :  { %5334 = vmatpush1.msra.mxu0 %v6775_v15 }
 0x7d5   :  { %6064 = vmatprep.subr.bf16.mxu0 %v9343_v33  ;;  %5384 = vmatmul.mubr.f32.vlgmr.msra.gmra.mrb[32].mxu0 %v9517_v32 }
 0x7d6   :  { %6066 = vmatpush1.bf16.msra.mxu0 %v9215_v17  ;;  %5472 = vmatprep.mubr.f32.mxu0 %v9732_v54 }
 0x7d7   :  { %6068 = vmatprep.subr.bf16.mxu0 %v9358_v34 }
 0x7da   :  { %6070 = vmatpush1.bf16.msra.mxu0 %v9268_v38 }
 0x7db   :  { %6072 = vmatprep.subr.bf16.mxu0 %v9445_v42 }
 0x7de   :  { %6074 = vmatpush1.bf16.msra.mxu0 %v9402_v2 }
 0x7df   :  { %6076 = vmatprep.subr.bf16.mxu0 %v9526_v59 }
 0x7e2   :  { %6078 = vmatpush1.bf16.msra.mxu0 %v9524_v41 }
 0x7e3   :  { %5423 = vmatprep.subr.mxu0 %v6772_v14 }
 0x7e6   :  { %5425 = vmatpush1.msra.mxu0 %v6770_v10 }
 0x7e7   :  { %6080 = vmatprep.subr.bf16.mxu0 %v9479_v52  ;;  %5476 = vmatmul.mubr.f32.vlgmr.msra.gmra.mrb[32].mxu0 %v5110_v43 }
 0x7e8   :  { %6082 = vmatpush1.bf16.msra.mxu0 %v9489_v49  ;;  %5600 = vmatprep.mubr.f32.mxu0 %v9732_v54 }
 0x7e9   :  { %6084 = vmatprep.subr.bf16.mxu0 %v9493_v53 }
 0x7ec   :  { %6086 = vmatpush1.bf16.msra.mxu0 %v9499_v21 }
 0x7ed   :  { %6088 = vmatprep.subr.bf16.mxu0 %v9502_v39 }
 0x7f0   :  { %6090 = vmatpush1.bf16.msra.mxu0 %v9508_v26 }
 0x7f1   :  { %6092 = vmatprep.subr.bf16.mxu0 %v6091_v28 }
 0x7f4   :  { %6094 = vmatpush1.bf16.msra.mxu0 %v6093_v9 }
 0x7f5   :  { %5549 = vmatprep.subr.mxu0 %v9895_v50 }
 0x7f8   :  { %5553 = vmatpush1.msra.mxu0 %v9896_v44  ;;  %v5704_v44 = vlaneseq }
 0x7f9   :  { %6096 = vmatprep.subr.bf16.mxu0 %v9343_v33  ;;  %5602 = vmatmul.mubr.f32.vlgmr.msra.gmra.mrb[32].mxu0 %v9132_v40 }
 0x7fa   :  { %6098 = vmatpush1.bf16.msra.mxu0 %v9215_v17  ;;  %5690 = vmatprep.mubr.f32.mxu0 %v9732_v54  ;;  %v6732_v54 = vmov 1966171168   ;;  %v5705_v17 = vshrl.u32 %v5704_v44, 7  ;;  %vm5718_vm10 = vcmp.lt.s32.totalorder %v5704_v44, 256 }
 0x7fb   :  { %6100 = vmatprep.subr.bf16.mxu0 %v9358_v34  ;;  %v5702_v50 = vunpack.c.l.s4 %v6732_v54 }
 0x7fd   :  { %v5703_v46 = vunpack.c.0.s8 %v5702_v50 }
 0x7fe   :  { %6102 = vmatpush1.bf16.msra.mxu0 %v9268_v38 }
 0x7ff   :  { %6104 = vmatprep.subr.bf16.mxu0 %v9445_v42  ;;  %v5706_v6 = vsub.s32 %v5703_v46, %v5705_v17 }
 0x802   :  { %6106 = vmatpush1.bf16.msra.mxu0 %v9402_v2 }
 0x803   :  { %6108 = vmatprep.subr.bf16.mxu0 %v9526_v59 }
 0x806   :  { %6110 = vmatpush1.bf16.msra.mxu0 %v9524_v41 }
 0x807   :  { %5641 = vmatprep.subr.mxu0 %v6772_v14 }
 0x80a   :  { %5643 = vmatpush1.msra.mxu0 %v6770_v10 }
 0x80b   :  { %5692 = vmatmul.mubr.f32.vlgmr.msra.gmra.mrb[32].mxu0 %v9132_v40 }
 0x88e   :  { %v5114_v15 = vpop.f32.mrb[48].mxu1 }
 0x88f   :  { %v5116_v16 = vpop.f32.mrb[49].mxu1 }
 0x8de   :  { %v5693_v27 = vpop.f32.mrb[32].mxu0 }
 0x8df   :  { %v6127_v37 = vadd.f32 %v5693_v27, %v5114_v15  ;;  %v5695_v38 = vpop.f32.mrb[33].mxu0 }
 0x8e0   :  { %v6128_v29 = vadd.f32 %v5695_v38, %v5116_v16 }
 0x8e2   :  { %v5700_v13 = vcombine.low %v6127_v37, %v6128_v29 }
 0x8e4   :  { %v5707_v33 = vrot.slane %v5700_v13, %v5706_v6 }
 0x8e6   :  { %v5714_v14 = vrot.slane %v5707_v33, %v5706_v6 }
 0x8e8   :  { %5720 = vst.msk [vmem:[%s9599_s3] sm:$0x3] %vm5718_vm10, %v5714_v14 }
 0x8e9   :  { %5725 = vsyncpa [#allocation4], 1 }

</bundles_post_ra>
